<compile_context>
chip_gen: v6e
topology: v6e:2x2x1
jax: 0.10.0
libtpu: 0.0.40
codegen_flags: <defaults>
</compile_context>

<pallas_src>
import functools

import jax
import jax.numpy as jnp
from jax.experimental import pallas as pl
from jax.experimental.pallas import tpu as pltpu

LEAKY_SLOPE = 0.01  # torch.nn.LeakyReLU default negative_slope
BN_EPS = 1e-5


def _resblock_chain_kernel(x_ref, w1_ref, b1_ref, w2_ref, b2_ref, o_ref,
                           act_ref, *, seq_len):
    """Grid = (num_row_tiles, K).  One step = one ResBlock applied to one row tile.

    x_ref  : (TILE_M, C)    bf16  flattened (batch*length, channels) input rows
    w1_ref : (1, C, Ch)     bf16  1x1-conv weight, BN1 scale folded in
    b1_ref : (1, 1, Ch)     f32   folded conv1-bias + BN1 shift
    w2_ref : (1, 5, Ch, C)  bf16  k=5-conv weight (tap-major), BN2 scale folded in
    b2_ref : (1, 1, C)      f32   folded conv2-bias + BN2 shift
    o_ref  : (TILE_M, C)    bf16  output rows
    act_ref: (TILE_M, C)    f32   VMEM scratch carrying the activation across blocks
    """
    k = pl.program_id(1)

    @pl.when(k == 0)
    def _():
        act_ref[...] = x_ref[...].astype(jnp.float32)

    tile_m = act_ref.shape[0]
    x = act_ref[...]                                  # (TILE_M, C) f32, block input / residual
    xb = x.astype(jnp.bfloat16)

    # --- ConvBNReLU #1: 1x1 conv == one matmul (BN1 scale already folded into w1).
    h = jnp.dot(xb, w1_ref[0], preferred_element_type=jnp.float32) + b1_ref[0]
    h = jnp.maximum(h, LEAKY_SLOPE * h)               # LeakyReLU

    # --- ConvBNReLU #2: k=5, pad=2 conv as 5 accumulating per-tap dots.
    # Each row tile holds whole sequences of length seq_len, so the in-sequence
    # position (row % seq_len) masks the boundary taps and prevents taps from
    # leaking across adjacent flattened batch elements.
    pos = jax.lax.broadcasted_iota(jnp.int32, (tile_m, 1), 0) % seq_len
    y = None
    for t in range(5):                                # static, unrolled
        d = t - 2
        if d == 0:
            tap = h
        else:
            tap = pltpu.roll(h, (-d) % tile_m, axis=0)    # tap[r] = h[(r + d) % tile_m] (XLU)
            mask = (pos >= -d) if d < 0 else (pos < seq_len - d)
            tap = jnp.where(mask, tap, 0.0)               # zero rows outside the sequence
        contrib = jnp.dot(tap.astype(jnp.bfloat16), w2_ref[0, t],
                          preferred_element_type=jnp.float32)
        y = contrib if y is None else y + contrib
    y = y + b2_ref[0]
    y = jnp.maximum(y, LEAKY_SLOPE * y)

    out = y + x                                       # residual add (f32)
    act_ref[...] = out                                # carry to the next fused block

    @pl.when(k == pl.num_programs(1) - 1)
    def _():
        o_ref[...] = out.astype(o_ref.dtype)


def resblock_chain_forward(x_nlc, w1s, b1s, w2s, b2s, *, b_tile=None):
    """Apply K fused ResBlocks to x (channels-last).  x_nlc: (N, L, C) float32."""
    N, L, C = x_nlc.shape
    K, _, Ch = w1s.shape
    assert C % 128 == 0 and Ch % 128 == 0, "channels must be lane-aligned"

    if b_tile is None:
        b_tile = max(1, min(N, max(1, 256 // L)))     # aim for >=256 rows per step
        while N % b_tile:
            b_tile -= 1
    tile_m = b_tile * L
    assert tile_m % 8 == 0, "row tile must be sublane-aligned"
    num_m = N // b_tile
    total_rows = N * L

    x_flat = x_nlc.reshape(total_rows, C).astype(jnp.bfloat16)

    flops = 2 * total_rows * (C * Ch + 5 * Ch * C) * K
    weight_bytes = int(w1s.size) * 2 + int(w2s.size) * 2 + int(b1s.size) * 4 + int(b2s.size) * 4
    bytes_accessed = total_rows * C * 2 * 2 + num_m * weight_bytes

    kernel = pl.pallas_call(
        functools.partial(_resblock_chain_kernel, seq_len=L),
        out_shape=jax.ShapeDtypeStruct((total_rows, C), jnp.bfloat16),
        grid_spec=pltpu.PrefetchScalarGridSpec(
            num_scalar_prefetch=0,
            grid=(num_m, K),                          # rows parallel, block-chain sequential
            in_specs=[
                pl.BlockSpec((tile_m, C), lambda m, k: (m, 0)),
                pl.BlockSpec((1, C, Ch), lambda m, k: (k, 0, 0)),
                pl.BlockSpec((1, 1, Ch), lambda m, k: (k, 0, 0)),
                pl.BlockSpec((1, 5, Ch, C), lambda m, k: (k, 0, 0, 0)),
                pl.BlockSpec((1, 1, C), lambda m, k: (k, 0, 0)),
            ],
            out_specs=pl.BlockSpec((tile_m, C), lambda m, k: (m, 0)),
            scratch_shapes=[pltpu.VMEM((tile_m, C), jnp.float32)],
        ),
        compiler_params=pltpu.CompilerParams(
            dimension_semantics=("parallel", "arbitrary")),
        cost_estimate=pl.CostEstimate(
            flops=flops, transcendentals=0, bytes_accessed=bytes_accessed),
    )
    out_flat = kernel(x_flat, w1s, b1s, w2s, b2s)
    return out_flat.reshape(N, L, C)


def make_block_params(key, nin):
    """Deterministic synthetic parameters matching ResBlock(nin) shapes."""
    nh = nin // 2
    ks = jax.random.split(key, 12)
    conv1_w = jax.random.normal(ks[0], (nh, nin, 1), jnp.float32) * 0.1
    conv1_b = jax.random.normal(ks[1], (nh,), jnp.float32) * 0.1
    conv2_w = jax.random.normal(ks[2], (nin, nh, 5), jnp.float32) * 0.1
    conv2_b = jax.random.normal(ks[3], (nin,), jnp.float32) * 0.1
    g1 = 1.0 + 0.1 * jax.random.normal(ks[4], (nh,), jnp.float32)
    be1 = 0.1 * jax.random.normal(ks[5], (nh,), jnp.float32)
    m1 = 0.1 * jax.random.normal(ks[6], (nh,), jnp.float32)
    v1 = jnp.abs(1.0 + 0.1 * jax.random.normal(ks[7], (nh,), jnp.float32))
    g2 = 1.0 + 0.1 * jax.random.normal(ks[8], (nin,), jnp.float32)
    be2 = 0.1 * jax.random.normal(ks[9], (nin,), jnp.float32)
    m2 = 0.1 * jax.random.normal(ks[10], (nin,), jnp.float32)
    v2 = jnp.abs(1.0 + 0.1 * jax.random.normal(ks[11], (nin,), jnp.float32))
    return dict(conv1_w=conv1_w, conv1_b=conv1_b, conv2_w=conv2_w, conv2_b=conv2_b,
                g1=g1, be1=be1, m1=m1, v1=v1, g2=g2, be2=be2, m2=m2, v2=v2)


def fold_block_params(p):
    """Fold conv bias + eval-mode BN (scale AND shift) into per-block kernel tensors.

    BN(conv(x)) = (s*W) x + (s*(bias - mean) + beta),  s = gamma / sqrt(var + eps)
    Weights cast to bf16 AFTER folding; biases stay f32.
    """
    nh = p["conv1_w"].shape[0]
    nin = p["conv2_w"].shape[0]
    s1 = p["g1"] / jnp.sqrt(p["v1"] + BN_EPS)
    b1 = (p["conv1_b"] - p["m1"]) * s1 + p["be1"]
    w1 = jnp.transpose(p["conv1_w"][:, :, 0], (1, 0)) * s1[None, :]        # (nin, nh)
    s2 = p["g2"] / jnp.sqrt(p["v2"] + BN_EPS)
    b2 = (p["conv2_b"] - p["m2"]) * s2 + p["be2"]
    w2 = jnp.transpose(p["conv2_w"], (2, 1, 0)) * s2[None, None, :]        # (5, nh, nin)
    return (w1.astype(jnp.bfloat16),
            b1.reshape(1, nh).astype(jnp.float32),
            w2.astype(jnp.bfloat16),
            b2.reshape(1, nin).astype(jnp.float32))


def stack_folded(params_list):
    folded = [fold_block_params(p) for p in params_list]
    w1s = jnp.stack([f[0] for f in folded])     # (K, C, Ch) bf16
    b1s = jnp.stack([f[1] for f in folded])     # (K, 1, Ch) f32
    w2s = jnp.stack([f[2] for f in folded])     # (K, 5, Ch, C) bf16
    b2s = jnp.stack([f[3] for f in folded])     # (K, 1, C) f32
    return w1s, b1s, w2s, b2s


def reference_resblock(x_ncl, p):
    """Pure-JAX f32 reference of ResBlock.forward (eval-mode BN), NCL layout."""
    def conv_bn_lrelu(x, w, b, g, be, m, v, pad):
        y = jax.lax.conv_general_dilated(
            x, w, window_strides=(1,), padding=[(pad, pad)],
            dimension_numbers=("NCH", "OIH", "NCH"))
        y = y + b[None, :, None]
        y = g[None, :, None] * (y - m[None, :, None]) / \
            jnp.sqrt(v[None, :, None] + BN_EPS) + be[None, :, None]
        return jnp.where(y > 0, y, LEAKY_SLOPE * y)

    h = conv_bn_lrelu(x_ncl, p["conv1_w"], p["conv1_b"],
                      p["g1"], p["be1"], p["m1"], p["v1"], pad=0)
    y = conv_bn_lrelu(h, p["conv2_w"], p["conv2_b"],
                      p["g2"], p["be2"], p["m2"], p["v2"], pad=2)
    return y + x_ncl


def _check(out_ncl, ref):
    err = float(jnp.max(jnp.abs(out_ncl - ref)))
    tol = 5e-2 * float(jnp.max(jnp.abs(ref))) + 5e-2   # bf16 operands/IO, f32 accumulation
    assert err <= tol, (err, tol)


if __name__ == "__main__":
    key = jax.random.PRNGKey(0)
    K_CHAIN = 2                              # number of fused ResBlock(nin) applications
    k_x, *k_blocks = jax.random.split(key, 1 + K_CHAIN)

    # ResBlock(nin=256) == ResBlock(base*8) from ModelInfer; small demo batch/length.
    N, C, L = 16, 256, 64                    # batch, channels (nin), sequence length
    x_ncl = jax.random.normal(k_x, (N, C, L), jnp.float32)        # PyTorch NCL layout
    params_list = [make_block_params(kb, C) for kb in k_blocks]

    # NCL -> NLC (channels on the 128-lane axis); back to NCL after the kernel.
    x_nlc = jnp.transpose(x_ncl, (0, 2, 1))

    # --- Check 1: single ResBlock (exactly the module's ResBlock.forward).
    w1s, b1s, w2s, b2s = stack_folded(params_list[:1])
    out_nlc = resblock_chain_forward(x_nlc, w1s, b1s, w2s, b2s)
    out_ncl = jax.block_until_ready(jnp.transpose(out_nlc.astype(jnp.float32), (0, 2, 1)))
    assert out_ncl.shape == (N, C, L)
    _check(out_ncl, reference_resblock(x_ncl, params_list[0]))

    # --- Check 2: K fused ResBlocks in one pallas_call (activation stays in VMEM).
    w1s, b1s, w2s, b2s = stack_folded(params_list)
    out_nlc = resblock_chain_forward(x_nlc, w1s, b1s, w2s, b2s)
    out_ncl = jax.block_until_ready(jnp.transpose(out_nlc.astype(jnp.float32), (0, 2, 1)))
    ref = x_ncl
    for p in params_list:
        ref = reference_resblock(ref, p)
    _check(out_ncl, ref)

    print("KERNEL_OK")
</pallas_src>

<mosaic_0001>
module attributes {stable_mosaic.version = 11 : i64} {
  func.func @_resblock_chain_kernel(%arg0: i32, %arg1: i32, %arg2: memref<256x256xbf16, #tpu.memory_space<vmem>>, %arg3: memref<1x256x128xbf16, #tpu.memory_space<vmem>>, %arg4: memref<1x1x128xf32, #tpu.memory_space<vmem>>, %arg5: memref<1x5x128x256xbf16, #tpu.memory_space<vmem>>, %arg6: memref<1x1x256xf32, #tpu.memory_space<vmem>>, %arg7: memref<256x256xbf16, #tpu.memory_space<vmem>>, %arg8: memref<256x256xf32, #tpu.memory_space<vmem>>) attributes {dimension_semantics = [#tpu.dimension_semantics<parallel>, #tpu.dimension_semantics<arbitrary>], iteration_bounds = array<i64: 4, 1>, scalar_prefetch = 0 : i64, scratch_operands = 1 : i64, tpu.core_type = #tpu.core_type<tc>, window_params = [{transform_indices = @transform_0, window_bounds = array<i64: 256, 256>}, {transform_indices = @transform_1, window_bounds = array<i64: 1, 256, 128>}, {transform_indices = @transform_2, window_bounds = array<i64: 1, 1, 128>}, {transform_indices = @transform_3, window_bounds = array<i64: 1, 5, 128, 256>}, {transform_indices = @transform_4, window_bounds = array<i64: 1, 1, 256>}, {transform_indices = @transform_5, window_bounds = array<i64: 256, 256>}]} {
    %c0_i32 = arith.constant 0 : i32
    %0 = arith.cmpi eq, %arg1, %c0_i32 : i32
    %1 = arith.extui %0 : i1 to i32
    %c0_i32_0 = arith.constant 0 : i32
    %2 = arith.cmpi ne, %1, %c0_i32_0 : i32
    scf.if %2 {
      %c0_49 = arith.constant 0 : index
      %c0_50 = arith.constant 0 : index
      %96 = vector.load %arg2[%c0_49, %c0_50] : memref<256x256xbf16, #tpu.memory_space<vmem>>, vector<256x256xbf16>
      %97 = arith.extf %96 : vector<256x256xbf16> to vector<256x256xf32>
      %c0_51 = arith.constant 0 : index
      %c0_52 = arith.constant 0 : index
      %98 = vector.load %arg8[%c0_51, %c0_52] : memref<256x256xf32, #tpu.memory_space<vmem>>, vector<256x256xf32>
      tpu.vector_store %arg8[%c0_51, %c0_52], %97 {strides = array<i32>} : memref<256x256xf32, #tpu.memory_space<vmem>>, vector<256x256xf32>,
    } else {
    }
    %c0 = arith.constant 0 : index
    %c0_1 = arith.constant 0 : index
    %3 = vector.load %arg8[%c0, %c0_1] : memref<256x256xf32, #tpu.memory_space<vmem>>, vector<256x256xf32>
    %4 = arith.truncf %3 : vector<256x256xf32> to vector<256x256xbf16>
    %c0_2 = arith.constant 0 : index
    %c0_3 = arith.constant 0 : index
    %c0_4 = arith.constant 0 : index
    %5 = vector.load %arg3[%c0_2, %c0_3, %c0_4] : memref<1x256x128xbf16, #tpu.memory_space<vmem>>, vector<1x256x128xbf16>
    %6 = vector.shape_cast %5 : vector<1x256x128xbf16> to vector<256x128xbf16>
    %cst = arith.constant dense<0.000000e+00> : vector<256x128xf32>
    %7 = tpu.matmul %4, %6, %cst {dimension_numbers = #tpu.dot_dimension_numbers<[1], [0], [0], [1], [0, 0, 1, 1], [], []>} : vector<256x256xbf16>, vector<256x128xbf16>, vector<256x128xf32> -> vector<256x128xf32>
    %c0_5 = arith.constant 0 : index
    %c0_6 = arith.constant 0 : index
    %c0_7 = arith.constant 0 : index
    %8 = vector.load %arg4[%c0_5, %c0_6, %c0_7] : memref<1x1x128xf32, #tpu.memory_space<vmem>>, vector<1x1x128xf32>
    %9 = vector.shape_cast %8 : vector<1x1x128xf32> to vector<1x128xf32>
    %10 = vector.broadcast %9 : vector<1x128xf32> to vector<256x128xf32>
    %11 = arith.addf %7, %10 : vector<256x128xf32>
    %cst_8 = arith.constant 0.00999999977 : f32
    %12 = vector.broadcast %cst_8 : f32 to vector<256x128xf32>
    %13 = arith.mulf %12, %11 : vector<256x128xf32>
    %14 = arith.maximumf %11, %13 : vector<256x128xf32>
    %15 = tpu.iota {dimensions = array<i32: 0>} : vector<256x1xi32>
    %c64_i32 = arith.constant 64 : i32
    %c0_i32_9 = arith.constant 0 : i32
    %16 = arith.cmpi eq, %c64_i32, %c0_i32_9 : i32
    %c1_i32 = arith.constant 1 : i32
    %17 = arith.select %16, %c1_i32, %c64_i32 : i32
    %18 = vector.broadcast %17 : i32 to vector<256x1xi32>
    %19 = arith.remsi %15, %18 : vector<256x1xi32>
    %c0_i32_10 = arith.constant 0 : i32
    %20 = vector.broadcast %c0_i32_10 : i32 to vector<256x1xi32>
    %21 = arith.cmpi ne, %19, %20 : vector<256x1xi32>
    %c0_i32_11 = arith.constant 0 : i32
    %22 = vector.broadcast %c0_i32_11 : i32 to vector<256x1xi32>
    %23 = arith.cmpi slt, %19, %22 : vector<256x1xi32>
    %c0_i32_12 = arith.constant 0 : i32
    %24 = arith.cmpi slt, %17, %c0_i32_12 : i32
    %25 = vector.broadcast %24 : i1 to vector<256x1xi1>
    %26 = vector.broadcast %25 : vector<256x1xi1> to vector<256x1xi1>
    %27 = arith.xori %23, %26 : vector<256x1xi1>
    %28 = arith.andi %27, %21 : vector<256x1xi1>
    %29 = vector.broadcast %17 : i32 to vector<256x1xi32>
    %30 = arith.addi %19, %29 : vector<256x1xi32>
    %31 = arith.select %28, %30, %19 : vector<256x1xi1>, vector<256x1xi32>
    %c2_i32 = arith.constant 2 : i32
    %32 = tpu.dynamic_rotate %14 by %c2_i32 dim 0 : vector<256x128xf32>, i32 -> vector<256x128xf32>
    %c2_i32_13 = arith.constant 2 : i32
    %33 = vector.broadcast %c2_i32_13 : i32 to vector<256x1xi32>
    %34 = arith.cmpi sge, %31, %33 : vector<256x1xi32>
    %cst_14 = arith.constant 0.000000e+00 : f32
    %35 = vector.shape_cast %34 : vector<256x1xi1> to vector<256x1xi1>
    %36 = vector.broadcast %35 : vector<256x1xi1> to vector<256x128xi1>
    %37 = vector.broadcast %cst_14 : f32 to vector<256x128xf32>
    %38 = arith.select %36, %32, %37 : vector<256x128xi1>, vector<256x128xf32>
    %39 = arith.truncf %38 : vector<256x128xf32> to vector<256x128xbf16>
    %c0_15 = arith.constant 0 : index
    %c0_16 = arith.constant 0 : index
    %c0_17 = arith.constant 0 : index
    %c0_18 = arith.constant 0 : index
    %40 = vector.load %arg5[%c0_15, %c0_16, %c0_17, %c0_18] : memref<1x5x128x256xbf16, #tpu.memory_space<vmem>>, vector<1x1x128x256xbf16>
    %41 = vector.shape_cast %40 : vector<1x1x128x256xbf16> to vector<128x256xbf16>
    %cst_19 = arith.constant dense<0.000000e+00> : vector<256x256xf32>
    %42 = tpu.matmul %39, %41, %cst_19 {dimension_numbers = #tpu.dot_dimension_numbers<[1], [0], [0], [1], [0, 0, 1, 1], [], []>} : vector<256x128xbf16>, vector<128x256xbf16>, vector<256x256xf32> -> vector<256x256xf32>
    %c1_i32_20 = arith.constant 1 : i32
    %43 = tpu.dynamic_rotate %14 by %c1_i32_20 dim 0 : vector<256x128xf32>, i32 -> vector<256x128xf32>
    %c1_i32_21 = arith.constant 1 : i32
    %44 = vector.broadcast %c1_i32_21 : i32 to vector<256x1xi32>
    %45 = arith.cmpi sge, %31, %44 : vector<256x1xi32>
    %cst_22 = arith.constant 0.000000e+00 : f32
    %46 = vector.shape_cast %45 : vector<256x1xi1> to vector<256x1xi1>
    %47 = vector.broadcast %46 : vector<256x1xi1> to vector<256x128xi1>
    %48 = vector.broadcast %cst_22 : f32 to vector<256x128xf32>
    %49 = arith.select %47, %43, %48 : vector<256x128xi1>, vector<256x128xf32>
    %50 = arith.truncf %49 : vector<256x128xf32> to vector<256x128xbf16>
    %c0_23 = arith.constant 0 : index
    %c1 = arith.constant 1 : index
    %c0_24 = arith.constant 0 : index
    %c0_25 = arith.constant 0 : index
    %51 = vector.load %arg5[%c0_23, %c1, %c0_24, %c0_25] : memref<1x5x128x256xbf16, #tpu.memory_space<vmem>>, vector<1x1x128x256xbf16>
    %52 = vector.shape_cast %51 : vector<1x1x128x256xbf16> to vector<128x256xbf16>
    %cst_26 = arith.constant dense<0.000000e+00> : vector<256x256xf32>
    %53 = tpu.matmul %50, %52, %cst_26 {dimension_numbers = #tpu.dot_dimension_numbers<[1], [0], [0], [1], [0, 0, 1, 1], [], []>} : vector<256x128xbf16>, vector<128x256xbf16>, vector<256x256xf32> -> vector<256x256xf32>
    %54 = arith.addf %42, %53 : vector<256x256xf32>
    %55 = arith.truncf %14 : vector<256x128xf32> to vector<256x128xbf16>
    %c0_27 = arith.constant 0 : index
    %c2 = arith.constant 2 : index
    %c0_28 = arith.constant 0 : index
    %c0_29 = arith.constant 0 : index
    %56 = vector.load %arg5[%c0_27, %c2, %c0_28, %c0_29] : memref<1x5x128x256xbf16, #tpu.memory_space<vmem>>, vector<1x1x128x256xbf16>
    %57 = vector.shape_cast %56 : vector<1x1x128x256xbf16> to vector<128x256xbf16>
    %cst_30 = arith.constant dense<0.000000e+00> : vector<256x256xf32>
    %58 = tpu.matmul %55, %57, %cst_30 {dimension_numbers = #tpu.dot_dimension_numbers<[1], [0], [0], [1], [0, 0, 1, 1], [], []>} : vector<256x128xbf16>, vector<128x256xbf16>, vector<256x256xf32> -> vector<256x256xf32>
    %59 = arith.addf %54, %58 : vector<256x256xf32>
    %c255_i32 = arith.constant 255 : i32
    %60 = tpu.dynamic_rotate %14 by %c255_i32 dim 0 : vector<256x128xf32>, i32 -> vector<256x128xf32>
    %c63_i32 = arith.constant 63 : i32
    %61 = vector.broadcast %c63_i32 : i32 to vector<256x1xi32>
    %62 = arith.cmpi slt, %31, %61 : vector<256x1xi32>
    %cst_31 = arith.constant 0.000000e+00 : f32
    %63 = vector.shape_cast %62 : vector<256x1xi1> to vector<256x1xi1>
    %64 = vector.broadcast %63 : vector<256x1xi1> to vector<256x128xi1>
    %65 = vector.broadcast %cst_31 : f32 to vector<256x128xf32>
    %66 = arith.select %64, %60, %65 : vector<256x128xi1>, vector<256x128xf32>
    %67 = arith.truncf %66 : vector<256x128xf32> to vector<256x128xbf16>
    %c0_32 = arith.constant 0 : index
    %c3 = arith.constant 3 : index
    %c0_33 = arith.constant 0 : index
    %c0_34 = arith.constant 0 : index
    %68 = vector.load %arg5[%c0_32, %c3, %c0_33, %c0_34] : memref<1x5x128x256xbf16, #tpu.memory_space<vmem>>, vector<1x1x128x256xbf16>
    %69 = vector.shape_cast %68 : vector<1x1x128x256xbf16> to vector<128x256xbf16>
    %cst_35 = arith.constant dense<0.000000e+00> : vector<256x256xf32>
    %70 = tpu.matmul %67, %69, %cst_35 {dimension_numbers = #tpu.dot_dimension_numbers<[1], [0], [0], [1], [0, 0, 1, 1], [], []>} : vector<256x128xbf16>, vector<128x256xbf16>, vector<256x256xf32> -> vector<256x256xf32>
    %71 = arith.addf %59, %70 : vector<256x256xf32>
    %c254_i32 = arith.constant 254 : i32
    %72 = tpu.dynamic_rotate %14 by %c254_i32 dim 0 : vector<256x128xf32>, i32 -> vector<256x128xf32>
    %c62_i32 = arith.constant 62 : i32
    %73 = vector.broadcast %c62_i32 : i32 to vector<256x1xi32>
    %74 = arith.cmpi slt, %31, %73 : vector<256x1xi32>
    %cst_36 = arith.constant 0.000000e+00 : f32
    %75 = vector.shape_cast %74 : vector<256x1xi1> to vector<256x1xi1>
    %76 = vector.broadcast %75 : vector<256x1xi1> to vector<256x128xi1>
    %77 = vector.broadcast %cst_36 : f32 to vector<256x128xf32>
    %78 = arith.select %76, %72, %77 : vector<256x128xi1>, vector<256x128xf32>
    %79 = arith.truncf %78 : vector<256x128xf32> to vector<256x128xbf16>
    %c0_37 = arith.constant 0 : index
    %c4 = arith.constant 4 : index
    %c0_38 = arith.constant 0 : index
    %c0_39 = arith.constant 0 : index
    %80 = vector.load %arg5[%c0_37, %c4, %c0_38, %c0_39] : memref<1x5x128x256xbf16, #tpu.memory_space<vmem>>, vector<1x1x128x256xbf16>
    %81 = vector.shape_cast %80 : vector<1x1x128x256xbf16> to vector<128x256xbf16>
    %cst_40 = arith.constant dense<0.000000e+00> : vector<256x256xf32>
    %82 = tpu.matmul %79, %81, %cst_40 {dimension_numbers = #tpu.dot_dimension_numbers<[1], [0], [0], [1], [0, 0, 1, 1], [], []>} : vector<256x128xbf16>, vector<128x256xbf16>, vector<256x256xf32> -> vector<256x256xf32>
    %83 = arith.addf %71, %82 : vector<256x256xf32>
    %c0_41 = arith.constant 0 : index
    %c0_42 = arith.constant 0 : index
    %c0_43 = arith.constant 0 : index
    %84 = vector.load %arg6[%c0_41, %c0_42, %c0_43] : memref<1x1x256xf32, #tpu.memory_space<vmem>>, vector<1x1x256xf32>
    %85 = vector.shape_cast %84 : vector<1x1x256xf32> to vector<1x256xf32>
    %86 = vector.broadcast %85 : vector<1x256xf32> to vector<256x256xf32>
    %87 = arith.addf %83, %86 : vector<256x256xf32>
    %cst_44 = arith.constant 0.00999999977 : f32
    %88 = vector.broadcast %cst_44 : f32 to vector<256x256xf32>
    %89 = arith.mulf %88, %87 : vector<256x256xf32>
    %90 = arith.maximumf %87, %89 : vector<256x256xf32>
    %91 = arith.addf %90, %3 : vector<256x256xf32>
    %c0_45 = arith.constant 0 : index
    %c0_46 = arith.constant 0 : index
    %92 = vector.load %arg8[%c0_45, %c0_46] : memref<256x256xf32, #tpu.memory_space<vmem>>, vector<256x256xf32>
    tpu.vector_store %arg8[%c0_45, %c0_46], %91 {strides = array<i32>} : memref<256x256xf32, #tpu.memory_space<vmem>>, vector<256x256xf32>,
    %c0_i32_47 = arith.constant 0 : i32
    %93 = arith.cmpi eq, %arg1, %c0_i32_47 : i32
    %94 = arith.extui %93 : i1 to i32
    %c0_i32_48 = arith.constant 0 : i32
    %95 = arith.cmpi ne, %94, %c0_i32_48 : i32
    scf.if %95 {
      %96 = arith.truncf %91 : vector<256x256xf32> to vector<256x256xbf16>
      %c0_49 = arith.constant 0 : index
      %c0_50 = arith.constant 0 : index
      %97 = vector.load %arg7[%c0_49, %c0_50] : memref<256x256xbf16, #tpu.memory_space<vmem>>, vector<256x256xbf16>
      tpu.vector_store %arg7[%c0_49, %c0_50], %96 {strides = array<i32>} : memref<256x256xbf16, #tpu.memory_space<vmem>>, vector<256x256xbf16>,
    } else {
    }
    return
  }
  func.func @transform_0(%arg0: i32, %arg1: i32) -> (i32, i32) {
    %c0_i32 = arith.constant 0 : i32
    %c0_i32_0 = arith.constant 0 : i32
    return %arg0, %c0_i32 : i32, i32
  }
  func.func @transform_1(%arg0: i32, %arg1: i32) -> (i32, i32, i32) {
    %c0_i32 = arith.constant 0 : i32
    %c0_i32_0 = arith.constant 0 : i32
    %c0_i32_1 = arith.constant 0 : i32
    return %arg1, %c0_i32, %c0_i32_0 : i32, i32, i32
  }
  func.func @transform_2(%arg0: i32, %arg1: i32) -> (i32, i32, i32) {
    %c0_i32 = arith.constant 0 : i32
    %c0_i32_0 = arith.constant 0 : i32
    %c0_i32_1 = arith.constant 0 : i32
    return %arg1, %c0_i32, %c0_i32_0 : i32, i32, i32
  }
  func.func @transform_3(%arg0: i32, %arg1: i32) -> (i32, i32, i32, i32) {
    %c0_i32 = arith.constant 0 : i32
    %c0_i32_0 = arith.constant 0 : i32
    %c0_i32_1 = arith.constant 0 : i32
    %c0_i32_2 = arith.constant 0 : i32
    return %arg1, %c0_i32, %c0_i32_0, %c0_i32_1 : i32, i32, i32, i32
  }
  func.func @transform_4(%arg0: i32, %arg1: i32) -> (i32, i32, i32) {
    %c0_i32 = arith.constant 0 : i32
    %c0_i32_0 = arith.constant 0 : i32
    %c0_i32_1 = arith.constant 0 : i32
    return %arg1, %c0_i32, %c0_i32_0 : i32, i32, i32
  }
  func.func @transform_5(%arg0: i32, %arg1: i32) -> (i32, i32) {
    %c0_i32 = arith.constant 0 : i32
    %c0_i32_0 = arith.constant 0 : i32
    return %arg0, %c0_i32 : i32, i32
  }
}

</mosaic_0001>

<bundles_post_ra>
// kernel: tpu_custom_call.1
= control target key start
LH: loop header
LB: loop body
LE: loop exit
PB: predicated region body
PF: predicated region fallthrough
CT: control target
= control target key end

     0   :  { %s7678_s0 = inlined_call_operand.hbm [shape: bf16[1024,256], index: 0, kind: input, shape index: {}]   ;;  %s7679_s1 = inlined_call_operand.hbm [shape: bf16[1,256,128], index: 1, kind: input, shape index: {}]   ;;  %s7680_s2 = inlined_call_operand.vmem [shape: f32[1,1,128], index: 2, kind: input, shape index: {}]   ;;  %s7681_s3 = inlined_call_operand.hbm [shape: bf16[1,5,128,256], index: 3, kind: input, shape index: {}]   ;;  %s7682_s4 = inlined_call_operand.vmem [shape: f32[1,1,256], index: 4, kind: input, shape index: {}]   ;;  %s7683_s5 = inlined_call_operand.hbm [shape: bf16[1024,256], index: 5, kind: output, shape index: {}]  }
   0x1   :  { %7808 = sst [smem:[#allocation122_spill]] %s7679_s1 }
   0x2   :  { %10 = vsyncpa [#allocation4], 0 }
   0x3   :  { %12 = vsyncpa [#allocation4 + $0x1], 0 }
   0x4   :  { %13 = vsyncpa [#allocation7], 0 }
   0x5   :  { %14 = vsyncpa [#allocation5], 0 }
   0x6   :  { %16 = vsyncpa [#allocation5 + $0x1], 0  ;;  %s5450_s18 = smov 0   ;;  %s5452_s19 = smov 0  }
   0x7   :  { %s5454_s20 = smov 0   ;;  %s5456_s21 = smov 0  }
   0x8   :  { %s5458_s22 = smov 0   ;;  %s5460_s23 = smov 0  }
   0x9 LB: > { %s4570_s24 = sadd.s32 4294967295, %s5406_s23   ;;  %s4571_s25 = sadd.s32 4294967294, %s5406_s23   ;;  %s5406_s23 = sphi %s5460_s23, %s22_s23   ;;  %s5402_s22 = sphi %s5458_s22, %s8286_s22   ;;  %s5398_s21 = sphi %s5456_s21, %s8285_s21   ;;  %s5394_s20 = sphi %s5454_s20, %s8284_s20   ;;  %s5390_s19 = sphi %s5452_s19, %s8283_s19   ;;  %s5386_s18 = sphi %s5450_s18, %s8282_s18  }
   0xa   : > { %p54_p0 = scmp.ne.s32.totalorder %s5390_s19, %s5386_s18  ;;  %p5484_p1 = scmp.eq.s32.totalorder %s4570_s24, 0 }
   0xb   : > { %p5488_p2 = scmp.eq.s32.totalorder %s4570_s24, 3  ;;  %p188_p3 = scmp.eq.s32.totalorder %s4571_s25, 3 }
   0xc   : > { %s7809_s26 = scalar_select %p5484_p1, 1, 0 }
   0xd   : > { %p5494_p4 = por %p5484_p1, %p54_p0  ;;  %p4572_p5 = scmp.ge.s32.totalorder %s5406_s23, 1 }
   0xe   : > { %p5499_p6 = por %p188_p3, %p54_p0  ;;  %p195_p7 = scmp.lt.s32.totalorder %s5406_s23, 5 }
   0xf   : > { %s7811_s28 = scalar_select %p5494_p4, 1, 0 }
  0x10   : > { %s7812_s29 = scalar_select %p5499_p6, 1, 0 }
  0x11   : > { %p5504_p8 = pnand %p4572_p5, %p195_p7  ;;  %s5408_s6 = smov [#allocation6]  }
  0x12   : > { %s210_s7 = sshll.u32 %s5408_s6, 4  ;;  %s5409_s9 = smov [#allocation8]   ;;  %s211_s7 = int_to_ptr.vmem [resolvable:$true] %s210_s7 }
  0x13   : > { %p4962_p9 = pneg %p5504_p8  ;;  %s232_s10 = sshll.u32 %s5409_s9, 4  ;;  %s233_s10 = int_to_ptr.vmem [resolvable:$true] %s232_s10 }
  0x14   : > { %s5253_s11 = scalar_lea.vmem %s211_s7, 2048  ;;  %p5261_p3 = scmp.lt.s32.totalorder %s211_s7, %s211_s7 }
  0x15   : > { %p5512_p10 = pnand %p4962_p9, %p5484_p1  ;;  %p5254_p12 = scmp.ne.s32.totalorder %s211_s7, %s5253_s11 }
  0x16   : > { %p5262_p5 = scmp.lt.s32.totalorder %s5253_s11, %s5253_s11 }
  0x17   : > { %p5244_p11 = pneg %p5512_p10 }
  0x18   : > { %p5263_p7 = por %p5262_p5, %p5261_p3 }
  0x19   : > { %p5256_p13 = pnand %p5254_p12, %p5244_p11 }
  0x1b   : > { %p5257_p0 = pneg %p5256_p13 }
  0x1d   : > { %p5264_p9 = pnand %p5263_p7, %p5257_p0 }
  0x1f   : > { %5267 = shalt.err (!%p5264_p9)
}
  0x20   : > { %s5410_s12 = smov 64   ;;  %s5411_s13 = smov 4  }
  0x21   : > { %s7815_s1 = sld [smem:[#allocation122_spill]]  ;;  %s5279_s16 = scalar_lea.vmem %s233_s10, 10240 }
  0x22   : > { %p5280_p6 = scmp.ne.s32.totalorder %s233_s10, %s5279_s16  ;;  %p5287_p1 = scmp.lt.s32.totalorder %s233_s10, %s233_s10 }
  0x23   : > { %p5288_p4 = scmp.lt.s32.totalorder %s5279_s16, %s5279_s16 }
  0x24   : > { %p5282_p12 = pnand %p5280_p6, %p5244_p11 }
  0x25   : > { %p5289_p3 = por %p5288_p4, %p5287_p1 }
  0x26   : > { %p5283_p13 = pneg %p5282_p12 }
  0x27   : > { %4965 = dma.hbm_to_vmem [thread:$0]  (!%p5512_p10), %s7815_s1, 2048, %s211_s7, [#allocation7], %s5410_s12, %s5410_s12, %s5411_s13  }
  0x28   : > { %p5290_p0 = pnand %p5289_p3, %p5283_p13 }
  0x2a   : > { %5293 = shalt.err (!%p5290_p0)
}
  0x2b   : > { %s7687_s17 = smov 128   ;;  %s7688_s24 = smov 8  }
  0x2c   : > { %4968 = dma.hbm_to_vmem [thread:$0]  (!%p5512_p10), %s7681_s3, 10240, %s233_s10, [#allocation7], %s7687_s17, %s7687_s17, %s7688_s24  }
  0x2d   : > { %s34_s7 = sadd.s32 1, %s5402_s22  ;;  %s41_s9 = sadd.s32 1, %s5394_s20 }
  0x2e   : > { %p36_p1 = scmp.ge.s32.totalorder %s34_s7, 4  ;;  %p48_p4 = scmp.ne.s32.totalorder %s5394_s20, %s5390_s19 }
  0x2f   : > { %p49_p6 = scmp.eq.s32.totalorder %s5406_s23, 0  ;;  %p4979_p11 = scmp.lt.s32.totalorder %s5406_s23, 4 }
  0x30   : > { %s8288_s7 = smov (%p36_p1, %s34_s7), 0  ;;  %p5547_p7 = por %p5488_p2, %p48_p4 }
  0x31   : > { %p50_p5 = por %p49_p6, %p48_p4  ;;  %s38_s11 = ssub.s32 %s5402_s22, %s8288_s7 }
  0x32   : > { %s253_s12 = sand.u32 1, %s5394_s20   ;;  %p39_p9 = scmp.eq.s32.totalorder %s38_s11, 0 }
  0x33   : > { %s4578_s10 = sshll.u32 %s253_s12, 8  ;;  %s4771_s13 = sshll.u32 %s5402_s22, 12 }
  0x34   : > { %s5556_s14 = scalar_select %p39_p9, %s5394_s20, %s41_s9  }
  0x35   : > { %s264_s25 = scalar_lea.hbm %s7678_s0, %s4771_s13  ;;  %s257_s6 = scalar_lea.vmem [#allocation3], %s4578_s10 }
  0x36   : > { %s265_s17 = sshll.u32 %s257_s6, 4  ;;  %p5563_p10 = pnand %p4979_p11, %p50_p5  ;;  %s266_s17 = int_to_ptr.vmem [resolvable:$true] %s265_s17 }
  0x37   : > { %s254_s24 = scalar_lea.sflag [#allocation4], %s253_s12  ;;  %s5307_s11 = scalar_lea.vmem %s266_s17, 4096 }
  0x38   : > { %p5296_p2 = pneg %p5563_p10  ;;  %p5308_p12 = scmp.ne.s32.totalorder %s266_s17, %s5307_s11 }
  0x39   : > { %s5414_s9 = smov [#allocation3]  }
  0x3a   : > { %p5310_p13 = pnand %p5308_p12, %p5296_p2  ;;  %s5312_s1 = sshll.u32 %s5414_s9, 4  ;;  %s5313_s1 = int_to_ptr.vmem [resolvable:$false] %s5312_s1 }
  0x3b   : > { %s5314_s13 = scalar_lea.vmem %s5313_s1, 8192  ;;  %p5315_p0 = scmp.lt.s32.totalorder %s266_s17, %s5313_s1 }
  0x3c   : > { %p5311_p3 = pneg %p5310_p13  ;;  %p5316_p1 = scmp.lt.s32.totalorder %s5314_s13, %s5307_s11 }
  0x3e   : > { %p5317_p4 = por %p5316_p1, %p5315_p0 }
  0x40   : > { %p5318_p6 = pnand %p5317_p4, %p5311_p3 }
  0x42   : > { %5321 = shalt.err (!%p5318_p6)
}
  0x43   : > { %s7818_s10 = smov 8   ;;  %s7819_s15 = smov 128  }
  0x44   : > { %4972 = dma.hbm_to_vmem [thread:$0]  (!%p5563_p10), %s264_s25, 4096, %s266_s17, %s254_s24, %s7819_s15, %s7819_s15, %s7818_s10  }
  0x45   : > { %277 = sbr.rel (%p5504_p8) target bundleno = 1047 (0x417), region = 40 }
  0x4a   : > { %s5577_s12 = sand.u32 1, %s5390_s19   ;;  %p7820_p11 = scmp.ne.s32.totalorder %s7811_s28, 0 }
  0x4b   : > { %s4583_s1 = sshll.u32 %s5577_s12, 8  ;;  %s280_s16 = scalar_lea.sflag [#allocation4], %s5577_s12 }
  0x4c   : > { %s5583_s6 = scalar_lea.vmem [#allocation3], %s4583_s1 }
  0x4d   : > { %5373 = dma.done.wait (%p7820_p11), %s280_s16, 4096  }
  0x4e   : > { %5375 = vsyncadd (%p7820_p11), %s280_s16, 4294963200  ;;  %p7821_p5 = scmp.ne.s32.totalorder %s7809_s26, 0 }
  0x50   : > { %5377 = dma.done.wait (%p7821_p5), [#allocation7], 12288  }
  0x51   : > { %5379 = vsyncadd (%p7821_p5), [#allocation7], 4294955008  ;;  %v5041_v0 = vld [vmem:[#allocation6 + $0x78] sm:$0xff]   ;;  %v5043_v2 = vld [vmem:[#allocation6 + $0x70] sm:$0xff]   ;;  %vm5416_vm6 = vmmov 1   ;;  %s7354_s27 = scalar_lea.vmem [#allocation9], %s4583_s1 }
  0x52   : > { %v5042_v1 = vld [vmem:[#allocation6 + $0x38] sm:$0xff]   ;;  %4838 = vmatprep.subr.bf16.mxu0 %v5041_v0  ;;  %v5044_v3 = vld [vmem:[#allocation6 + $0x30] sm:$0xff]   ;;  %v5045_v4 = vld [vmem:[#allocation6 + $0x68] sm:$0xff]   ;;  %s4805_s11 = sshll.u32 %s5398_s21, 12  ;;  %s4439_s9 = sshll.u32 %s7354_s27, 4  ;;  %s7630_s9 = int_to_ptr.vmem [resolvable:$true] %s4439_s9 }
  0x53   : > { %4839 = vmatpush3.bf16.msra.mxu0 %v5042_v1  ;;  %v5046_v5 = vld [vmem:[#allocation6 + $0x28] sm:$0xff]   ;;  %v5047_v6 = vld [vmem:[#allocation6 + $0x60] sm:$0xff]   ;;  %v5049_v8 = vld [vmem:[#allocation6 + $0x58] sm:$0xff]   ;;  %s7628_s15 = scalar_lea.hbm %s7683_s5, %s4805_s11  ;;  %s4425_s1 = scalar_lea.sflag [#allocation5], %s5577_s12 }
  0x54   : > { %4840 = vmatprep.subr.bf16.mxu0 %v5043_v2  ;;  %v5048_v7 = vld [vmem:[#allocation6 + $0x20] sm:$0xff]   ;;  %v5050_v9 = vld [vmem:[#allocation6 + $0x18] sm:$0xff]   ;;  %v5051_v10 = vld [vmem:[#allocation6 + $0x50] sm:$0xff]   ;;  %s5322_s16 = scalar_lea.vmem %s7630_s9, 4096  ;;  %s5417_s21 = smov [#allocation9]  }
  0x55   : > { %v339_v11 = vld [vmem:[%s5583_s6] sm:$0xff]  ;;  %v340_v12 = vld [vmem:[%s5583_s6 + $0x8] sm:$0xff]  ;;  %v5052_v14 = vld [vmem:[#allocation6 + $0x10] sm:$0xff]   ;;  %p5323_p8 = scmp.ne.s32.totalorder %s7630_s9, %s5322_s16 }
  0x56   : > { %v4807_v13 = vcombine.high %v339_v11, %v340_v12  ;;  %v5053_v15 = vld [vmem:[#allocation6 + $0x48] sm:$0xff]   ;;  %v5055_v17 = vld [vmem:[#allocation6 + $0x40] sm:$0xff]   ;;  %v341_v19 = vld [vmem:[%s5583_s6 + $0x10] sm:$0xff]  ;;  %v4806_v21 = vcombine.low %v339_v11, %v340_v12 }
  0x57   : > { %4841 = vmatpush3.bf16.msra.mxu0 %v5044_v3  ;;  %v5054_v16 = vld [vmem:[#allocation6 + $0x8] sm:$0xff]   ;;  %v5056_v18 = vld [vmem:[#allocation6] sm:$0xff]   ;;  %v342_v20 = vld [vmem:[%s5583_s6 + $0x18] sm:$0xff]  ;;  %p5324_p9 = pnand %p5323_p8, %p5547_p7 }
  0x58   : > { %4842 = vmatprep.subr.bf16.mxu0 %v5045_v4  ;;  %762 = vmatprep.mubr.bf16.mxu0 %v4807_v13  ;;  %v4809_v22 = vcombine.high %v341_v19, %v342_v20  ;;  %v343_v23 = vld [vmem:[%s5583_s6 + $0x20] sm:$0xff]  ;;  %v344_v24 = vld [vmem:[%s5583_s6 + $0x28] sm:$0xff]  ;;  %v4808_v25 = vcombine.low %v341_v19, %v342_v20  ;;  %v345_v27 = vld [vmem:[%s5583_s6 + $0x30] sm:$0xff] }
  0x59   : > { %v4811_v26 = vcombine.high %v343_v23, %v344_v24  ;;  %v346_v28 = vld [vmem:[%s5583_s6 + $0x38] sm:$0xff]  ;;  %v4810_v29 = vcombine.low %v343_v23, %v344_v24  ;;  %v347_v31 = vld [vmem:[%s5583_s6 + $0x40] sm:$0xff]  ;;  %v348_v32 = vld [vmem:[%s5583_s6 + $0x48] sm:$0xff]  ;;  %p5325_p10 = pneg %p5324_p9 }
  0x5a   : > { %v4813_v30 = vcombine.high %v345_v27, %v346_v28  ;;  %v4812_v33 = vcombine.low %v345_v27, %v346_v28  ;;  %v4815_v34 = vcombine.high %v347_v31, %v348_v32  ;;  %v349_v35 = vld [vmem:[%s5583_s6 + $0x50] sm:$0xff]  ;;  %v350_v36 = vld [vmem:[%s5583_s6 + $0x58] sm:$0xff]  ;;  %v4814_v37 = vcombine.low %v347_v31, %v348_v32  ;;  %v351_v39 = vld [vmem:[%s5583_s6 + $0x60] sm:$0xff] }
  0x5b   : > { %4843 = vmatpush3.bf16.msra.mxu0 %v5046_v5  ;;  %v4817_v38 = vcombine.high %v349_v35, %v350_v36  ;;  %v352_v40 = vld [vmem:[%s5583_s6 + $0x68] sm:$0xff]  ;;  %v4816_v41 = vcombine.low %v349_v35, %v350_v36  ;;  %v353_v43 = vld [vmem:[%s5583_s6 + $0x70] sm:$0xff]  ;;  %v354_v44 = vld [vmem:[%s5583_s6 + $0x78] sm:$0xff] }
  0x5c   : > { %4844 = vmatprep.subr.bf16.mxu0 %v5047_v6  ;;  %v4819_v42 = vcombine.high %v351_v39, %v352_v40  ;;  %v4818_v45 = vcombine.low %v351_v39, %v352_v40  ;;  %v4821_v46 = vcombine.high %v353_v43, %v354_v44  ;;  %v355_v47 = vld [vmem:[%s5583_s6 + $0x80] sm:$0xff]  ;;  %v356_v48 = vld [vmem:[%s5583_s6 + $0x88] sm:$0xff]  ;;  %v4820_v49 = vcombine.low %v353_v43, %v354_v44  ;;  %v357_v51 = vld [vmem:[%s5583_s6 + $0x90] sm:$0xff] }
  0x5d   : > { %v4823_v50 = vcombine.high %v355_v47, %v356_v48  ;;  %v358_v52 = vld [vmem:[%s5583_s6 + $0x98] sm:$0xff]  ;;  %v4822_v53 = vcombine.low %v355_v47, %v356_v48  ;;  %v359_v55 = vld [vmem:[%s5583_s6 + $0xa0] sm:$0xff]  ;;  %v360_v56 = vld [vmem:[%s5583_s6 + $0xa8] sm:$0xff] }
  0x5e   : > { %v4825_v54 = vcombine.high %v357_v51, %v358_v52  ;;  %v4824_v57 = vcombine.low %v357_v51, %v358_v52  ;;  %v4827_v58 = vcombine.high %v359_v55, %v360_v56  ;;  %v361_v59 = vld [vmem:[%s5583_s6 + $0xb0] sm:$0xff]  ;;  %v362_v60 = vld [vmem:[%s5583_s6 + $0xb8] sm:$0xff]  ;;  %v4826_v61 = vcombine.low %v359_v55, %v360_v56  ;;  %v363_v63 = vld [vmem:[%s5583_s6 + $0xc0] sm:$0xff] }
  0x5f   : > { %4845 = vmatpush3.bf16.msra.mxu0 %v5048_v7  ;;  %v4829_v62 = vcombine.high %v361_v59, %v362_v60  ;;  %v364_v0 = vld [vmem:[%s5583_s6 + $0xc8] sm:$0xff]  ;;  %v4828_v1 = vcombine.low %v361_v59, %v362_v60  ;;  %v365_v3 = vld [vmem:[%s5583_s6 + $0xd0] sm:$0xff]  ;;  %v366_v4 = vld [vmem:[%s5583_s6 + $0xd8] sm:$0xff]  ;;  %v955_v51 = vlaneseq  ;;  %v7690_v60 = vmov 0  }
  0x60   : > { %4846 = vmatprep.subr.bf16.mxu0 %v5049_v8  ;;  %v4831_v2 = vcombine.high %v363_v63, %v364_v0  ;;  %v4830_v5 = vcombine.low %v363_v63, %v364_v0  ;;  %v4833_v6 = vcombine.high %v365_v3, %v366_v4  ;;  %v367_v7 = vld [vmem:[%s5583_s6 + $0xe0] sm:$0xff]  ;;  %v368_v8 = vld [vmem:[%s5583_s6 + $0xe8] sm:$0xff]  ;;  %v369_v11 = vld [vmem:[%s5583_s6 + $0xf0] sm:$0xff]  ;;  %1935 = vmatprep.mubr.bf16.mxu1 %v7690_v60 }
  0x61   : > { %v370_v12 = vld [vmem:[%s5583_s6 + $0xf8] sm:$0xff]  ;;  %v4834_v13 = vcombine.low %v367_v7, %v368_v8  ;;  %v5095_v20 = vld [vmem:[#allocation8 + $0xe4] ss:$8 sps:$4 sm:$0xff]   ;;  %v5098_v23 = vld [vmem:[#allocation8 + $0x60] ss:$8 sps:$4 sm:$0xff]   ;;  %v5633_v63 = vshrl.u32 %v955_v51, 7 }
  0x62   : > { %v5092_v19 = vld [vmem:[#allocation8 + $0x70] ss:$8 sps:$4 sm:$0xff]   ;;  %v5101_v24 = vld [vmem:[#allocation8 + $0xd4] ss:$8 sps:$4 sm:$0xff]   ;;  %v5107_v28 = vld [vmem:[#allocation8 + $0xc4] ss:$8 sps:$4 sm:$0xff]  }
  0x63   : > { %4847 = vmatpush3.bf16.msra.mxu0 %v5050_v9  ;;  %v4832_v9 = vcombine.low %v365_v3, %v366_v4  ;;  %v5104_v27 = vld [vmem:[#allocation8 + $0x50] ss:$8 sps:$4 sm:$0xff]   ;;  %v5110_v31 = vld [vmem:[#allocation8 + $0x40] ss:$8 sps:$4 sm:$0xff]   ;;  %v5113_v32 = vld [vmem:[#allocation8 + $0xb4] ss:$8 sps:$4 sm:$0xff]  }
  0x64   : > { %4848 = vmatprep.subr.bf16.mxu0 %v5051_v10  ;;  %v4835_v10 = vcombine.high %v367_v7, %v368_v8  ;;  %v5116_v35 = vld [vmem:[#allocation8 + $0x30] ss:$8 sps:$4 sm:$0xff]   ;;  %v5119_v36 = vld [vmem:[#allocation8 + $0xa4] ss:$8 sps:$4 sm:$0xff]   ;;  %v5121_v39 = vld [vmem:[#allocation8 + $0xa0] ss:$8 sps:$4 sm:$0xff]  }
  0x65   : > { %v5122_v40 = vld [vmem:[#allocation8 + $0x20] ss:$8 sps:$4 sm:$0xff]   ;;  %v5125_v44 = vld [vmem:[#allocation8 + $0x94] ss:$8 sps:$4 sm:$0xff]   ;;  %v5127_v47 = vld [vmem:[#allocation8 + $0x90] ss:$8 sps:$4 sm:$0xff]  }
  0x66   : > { %v5128_v48 = vld [vmem:[#allocation8 + $0x10] ss:$8 sps:$4 sm:$0xff]   ;;  %v5133_v55 = vld [vmem:[#allocation8 + $0x80] ss:$8 sps:$4 sm:$0xff]   ;;  %7822 = vst [vmem:[#allocation13_spill] sm:$0xff] %v5633_v63  ;;  %vm1404_vm0 = vcmp.lt.s32.totalorder %v5633_v63, 2 }
  0x67   : > { %4849 = vmatpush3.bf16.msra.mxu0 %v5052_v14  ;;  %v4837_v14 = vcombine.high %v369_v11, %v370_v12  ;;  %vm1629_vm1 = vcmp.lt.s32.totalorder %v5633_v63, 1  ;;  %vm2771_vm2 = vcmp.lt.s32.totalorder %v5633_v63, 7  ;;  %vm3334_vm3 = vcmp.lt.s32.totalorder %v5633_v63, 6 }
  0x68   : > { %4850 = vmatprep.subr.bf16.mxu0 %v5053_v15  ;;  %v4836_v15 = vcombine.low %v369_v11, %v370_v12 }
  0x6b   : > { %4851 = vmatpush3.bf16.msra.mxu0 %v5054_v16  ;;  %v5089_v16 = vld [vmem:[#allocation8 + $0xf4] ss:$8 sps:$4 sm:$0xff]  }
  0x6c   : > { %4852 = vmatprep.subr.bf16.mxu0 %v5055_v17  ;;  %v5094_v17 = vld [vmem:[#allocation8 + $0x74] ss:$8 sps:$4 sm:$0xff]   ;;  %1903 = vmatprep.subr.bf16.mxu1 %v5089_v16 }
  0x6f   : > { %4853 = vmatpush3.bf16.msra.mxu0 %v5056_v18  ;;  %v5091_v18 = vld [vmem:[#allocation8 + $0xf0] ss:$8 sps:$4 sm:$0xff]  }
  0x70   : > { %2176 = vmatprep.subr.bf16.mxu0 %v5094_v17  ;;  %1904 = vmatpush1.bf16.msra.mxu1 %v5091_v18 }
  0x71   : > { %1905 = vmatprep.subr.bf16.mxu1 %v5095_v20 }
  0x72   : > { %763 = vmatmul.mubr.bf16.vlgmr.msra.gmra.mxu0 %v4806_v21  ;;  %v5100_v21 = vld [vmem:[#allocation8 + $0x64] ss:$8 sps:$4 sm:$0xff]  }
  0x73   : > { %770 = vmatprep.mubr.bf16.mxu0 %v4809_v22  ;;  %2177 = vmatpush1.bf16.msra.mxu0 %v5092_v19  ;;  %v5097_v22 = vld [vmem:[#allocation8 + $0xe0] ss:$8 sps:$4 sm:$0xff]  }
  0x74   : > { %2178 = vmatprep.subr.bf16.mxu0 %v5100_v21  ;;  %1906 = vmatpush1.bf16.msra.mxu1 %v5097_v22 }
  0x75   : > { %1907 = vmatprep.subr.bf16.mxu1 %v5101_v24 }
  0x77   : > { %2179 = vmatpush1.bf16.msra.mxu0 %v5098_v23 }
  0x7a   : > { %771 = vmatmul.mubr.bf16.gmra.mxu0 %v4808_v25  ;;  %v5106_v25 = vld [vmem:[#allocation8 + $0x54] ss:$8 sps:$4 sm:$0xff]  }
  0x7b   : > { %778 = vmatprep.mubr.bf16.mxu0 %v4811_v26  ;;  %v5103_v26 = vld [vmem:[#allocation8 + $0xd0] ss:$8 sps:$4 sm:$0xff]   ;;  %2180 = vmatprep.subr.bf16.mxu0 %v5106_v25 }
  0x7c   : > { %1908 = vmatpush1.bf16.msra.mxu1 %v5103_v26  ;;  %2181 = vmatpush1.bf16.msra.mxu0 %v5104_v27 }
  0x7d   : > { %1909 = vmatprep.subr.bf16.mxu1 %v5107_v28 }
  0x82   : > { %779 = vmatmul.mubr.bf16.gmra.mxu0 %v4810_v29  ;;  %v5112_v29 = vld [vmem:[#allocation8 + $0x44] ss:$8 sps:$4 sm:$0xff]  }
  0x83   : > { %786 = vmatprep.mubr.bf16.mxu0 %v4813_v30  ;;  %v5109_v30 = vld [vmem:[#allocation8 + $0xc0] ss:$8 sps:$4 sm:$0xff]   ;;  %2182 = vmatprep.subr.bf16.mxu0 %v5112_v29 }
  0x84   : > { %1910 = vmatpush1.bf16.msra.mxu1 %v5109_v30  ;;  %2183 = vmatpush1.bf16.msra.mxu0 %v5110_v31 }
  0x85   : > { %1911 = vmatprep.subr.bf16.mxu1 %v5113_v32 }
  0x8a   : > { %787 = vmatmul.mubr.bf16.gmra.mxu0 %v4812_v33  ;;  %v5118_v33 = vld [vmem:[#allocation8 + $0x34] ss:$8 sps:$4 sm:$0xff]  }
  0x8b   : > { %794 = vmatprep.mubr.bf16.mxu0 %v4815_v34  ;;  %v5115_v34 = vld [vmem:[#allocation8 + $0xb0] ss:$8 sps:$4 sm:$0xff]   ;;  %2184 = vmatprep.subr.bf16.mxu0 %v5118_v33 }
  0x8c   : > { %1912 = vmatpush1.bf16.msra.mxu1 %v5115_v34  ;;  %2185 = vmatpush1.bf16.msra.mxu0 %v5116_v35 }
  0x8d   : > { %1913 = vmatprep.subr.bf16.mxu1 %v5119_v36 }
  0x90   : > { %1914 = vmatpush1.bf16.msra.mxu1 %v5121_v39 }
  0x91   : > { %1915 = vmatprep.subr.bf16.mxu1 %v5125_v44 }
  0x92   : > { %795 = vmatmul.mubr.bf16.gmra.mxu0 %v4814_v37  ;;  %v5124_v37 = vld [vmem:[#allocation8 + $0x24] ss:$8 sps:$4 sm:$0xff]  }
  0x93   : > { %802 = vmatprep.mubr.bf16.mxu0 %v4817_v38  ;;  %2186 = vmatprep.subr.bf16.mxu0 %v5124_v37 }
  0x94   : > { %2187 = vmatpush1.bf16.msra.mxu0 %v5122_v40  ;;  %1916 = vmatpush1.bf16.msra.mxu1 %v5127_v47 }
  0x9a   : > { %803 = vmatmul.mubr.bf16.gmra.mxu0 %v4816_v41  ;;  %v5628_v41 = vld [vmem:[%s7680_s2] ss:$0 sm:$0xff] }
  0x9b   : > { %810 = vmatprep.mubr.bf16.mxu0 %v4819_v42 }
  0xa2   : > { %811 = vmatmul.mubr.bf16.gmra.mxu0 %v4818_v45  ;;  %v5130_v45 = vld [vmem:[#allocation8 + $0x14] ss:$8 sps:$4 sm:$0xff]  }
  0xa3   : > { %818 = vmatprep.mubr.bf16.mxu0 %v4821_v46  ;;  %2188 = vmatprep.subr.bf16.mxu0 %v5130_v45 }
  0xa4   : > { %2189 = vmatpush1.bf16.msra.mxu0 %v5128_v48 }
  0xaa   : > { %819 = vmatmul.mubr.bf16.gmra.mxu0 %v4820_v49 }
  0xab   : > { %826 = vmatprep.mubr.bf16.mxu0 %v4823_v50 }
  0xb2   : > { %827 = vmatmul.mubr.bf16.gmra.mxu0 %v4822_v53 }
  0xb3   : > { %834 = vmatprep.mubr.bf16.mxu0 %v4825_v54  ;;  %v5131_v54 = vld [vmem:[#allocation8 + $0x84] ss:$8 sps:$4 sm:$0xff]  }
  0xb4   : > { %1917 = vmatprep.subr.bf16.mxu1 %v5131_v54 }
  0xb5   : > { %1918 = vmatpush1.bf16.msra.mxu1 %v5133_v55 }
  0xba   : > { %835 = vmatmul.mubr.bf16.gmra.mxu0 %v4824_v57  ;;  %v5134_v57 = vld [vmem:[#allocation8] ss:$8 sps:$4 sm:$0xff]  }
  0xbb   : > { %842 = vmatprep.mubr.bf16.mxu0 %v4827_v58  ;;  %v5136_v58 = vld [vmem:[#allocation8 + $0x4] ss:$8 sps:$4 sm:$0xff]  }
  0xbc   : > { %2190 = vmatprep.subr.bf16.mxu0 %v5136_v58 }
  0xbd   : > { %2191 = vmatpush1.bf16.msra.mxu0 %v5134_v57 }
  0xc2   : > { %843 = vmatmul.mubr.bf16.gmra.mxu0 %v4826_v61  ;;  %v5139_v61 = vld [vmem:[#allocation8 + $0x174] ss:$8 sps:$4 sm:$0xff]  }
  0xc3   : > { %850 = vmatprep.mubr.bf16.mxu0 %v4829_v62  ;;  %2482 = vmatprep.subr.bf16.mxu1 %v5139_v61 }
  0xca   : > { %851 = vmatmul.mubr.bf16.gmra.mxu0 %v4828_v1 }
  0xcb   : > { %858 = vmatprep.mubr.bf16.mxu0 %v4831_v2 }
  0xd2   : > { %859 = vmatmul.mubr.bf16.gmra.mxu0 %v4830_v5 }
  0xd3   : > { %866 = vmatprep.mubr.bf16.mxu0 %v4833_v6 }
  0xda   : > { %867 = vmatmul.mubr.bf16.gmra.mxu0 %v4832_v9 }
  0xdb   : > { %874 = vmatprep.mubr.bf16.mxu0 %v4835_v10 }
  0xe2   : > { %875 = vmatmul.mubr.bf16.gmra.mxu0 %v4834_v13 }
  0xe3   : > { %882 = vmatprep.mubr.bf16.mxu0 %v4837_v14 }
  0xea   : > { %883 = vmatmul.mubr.bf16.gmra.mxu0 %v4836_v15 }
  0xeb   : > { %2208 = vmatprep.mubr.bf16.mxu0 %v7690_v60 }
 0x132   : > { %v4854_v38 = vpop.f32.mrf.mxu0 }
 0x134   : > { %v4855_v42 = vpop.f32.mrf.mxu0 }
 0x135   : > { %v4856_v43 = vadd.f32 %v4855_v42, %v4854_v38 }
 0x136   : > { %v4857_v46 = vpop.f32.mrf.mxu0 }
 0x137   : > { %v765_v49 = vadd.f32 %v4856_v43, %v5628_v41 }
 0x138   : > { %v4858_v50 = vpop.f32.mrf.mxu0 }
 0x139   : > { %v891_v52 = vmul.f32 0.01, %v765_v49  ;;  %v4859_v53 = vadd.f32 %v4858_v50, %v4857_v46 }
 0x13a   : > { %v4860_v56 = vpop.f32.mrf.mxu0 }
 0x13b   : > { %v768_v59 = vadd.f32 %v4859_v53, %v5628_v41  ;;  %v5635_v0 = vmax.f32 %v765_v49, %v891_v52 }
 0x13c   : > { %v4861_v62 = vpop.f32.mrf.mxu0 }
 0x13d   : > { %v892_v1 = vmul.f32 0.01, %v768_v59  ;;  %v4862_v2 = vadd.f32 %v4861_v62, %v4860_v56  ;;  %v7693_v7 = vrot.slane %v5635_v0, 6  ;;  %v7694_v12 = vrot.slane %v5635_v0, 7 }
 0x13e   : > { %v4863_v3 = vpop.f32.mrf.mxu0  ;;  %v7692_v22 = vrot.slane %v5635_v0, 1  ;;  %v7689_v23 = vrot.slane %v5635_v0, 2 }
 0x13f   : > { %v5638_v4 = vmax.f32 %v768_v59, %v892_v1  ;;  %v773_v5 = vadd.f32 %v4862_v2, %v5628_v41 }
 0x140   : > { %v4864_v6 = vpop.f32.mrf.mxu0 }
 0x141   : > { %7823 = vst [vmem:[#allocation14_spill] sm:$0xff] %v5638_v4  ;;  %v1373_v8 = vrot.slane %v5638_v4, 6  ;;  %v4865_v9 = vadd.f32 %v4864_v6, %v4863_v3  ;;  %v893_v10 = vmul.f32 0.01, %v773_v5  ;;  %v1598_v13 = vrot.slane %v5638_v4, 7 }
 0x142   : > { %v4866_v11 = vpop.f32.mrf.mxu0  ;;  %v2740_v15 = vrot.slane %v5638_v4, 1  ;;  %v3303_v16 = vrot.slane %v5638_v4, 2 }
 0x143   : > { %v776_v17 = vadd.f32 %v4865_v9, %v5628_v41  ;;  %v5656_v18 = vsel %vm1404_vm0, %v7693_v7, %v1373_v8  ;;  %v5658_v19 = vmax.f32 %v773_v5, %v893_v10  ;;  %v5664_v21 = vsel %vm1629_vm1, %v7694_v12, %v1598_v13 }
 0x144   : > { %v4867_v20 = vpop.f32.mrf.mxu0  ;;  %v5681_v33 = vsel %vm2771_vm2, %v7692_v22, %v2740_v15  ;;  %v5687_v34 = vsel %vm3334_vm3, %v7689_v23, %v3303_v16 }
 0x145   : > { %7824 = vst [vmem:[#allocation15_spill] sm:$0xff] %v5658_v19  ;;  %v894_v24 = vmul.f32 0.01, %v776_v17  ;;  %v4868_v25 = vadd.f32 %v4867_v20, %v4866_v11  ;;  %v2741_v26 = vrot.slane %v5658_v19, 1  ;;  %v3304_v27 = vrot.slane %v5658_v19, 2  ;;  %7826 = vst [vmem:[#allocation17_spill] sm:$0xff] %v5681_v33 }
 0x146   : > { %v4869_v28 = vpop.f32.mrf.mxu0  ;;  %v1599_v29 = vrot.slane %v5658_v19, 7  ;;  %v1374_v30 = vrot.slane %v5658_v19, 6  ;;  %7827 = vst [vmem:[#allocation18_spill] sm:$0xff] %v5687_v34 }
 0x147   : > { %v5674_v31 = vmax.f32 %v776_v17, %v894_v24  ;;  %v781_v32 = vadd.f32 %v4868_v25, %v5628_v41  ;;  %v5699_v38 = vsel %vm2771_vm2, %v2740_v15, %v2741_v26  ;;  %v5703_v39 = vsel %vm3334_vm3, %v3303_v16, %v3304_v27 }
 0x148   : > { %v4870_v35 = vpop.f32.mrf.mxu0  ;;  %v5691_v36 = vsel %vm1629_vm1, %v1598_v13, %v1599_v29  ;;  %v5695_v37 = vsel %vm1404_vm0, %v1373_v8, %v1374_v30  ;;  %7828 = vst [vmem:[#allocation19_spill] sm:$0xff] %v5699_v38  ;;  %7829 = vst [vmem:[#allocation20_spill] sm:$0xff] %v5703_v39 }
 0x149   : > { %7825 = vst [vmem:[#allocation16_spill] sm:$0xff] %v5674_v31  ;;  %v895_v40 = vmul.f32 0.01, %v781_v32  ;;  %v4871_v42 = vadd.f32 %v4870_v35, %v4869_v28  ;;  %v1600_v43 = vrot.slane %v5674_v31, 7  ;;  %v1375_v44 = vrot.slane %v5674_v31, 6 }
 0x14a   : > { %v4872_v45 = vpop.f32.mrf.mxu0  ;;  %v2742_v48 = vrot.slane %v5674_v31, 1  ;;  %v3305_v58 = vrot.slane %v5674_v31, 2 }
 0x14b   : > { %v5714_v50 = vmax.f32 %v781_v32, %v895_v40  ;;  %v784_v51 = vadd.f32 %v4871_v42, %v5628_v41  ;;  %v5719_v52 = vsel %vm1629_vm1, %v1599_v29, %v1600_v43  ;;  %v5723_v53 = vsel %vm1404_vm0, %v1374_v30, %v1375_v44 }
 0x14c   : > { %v4873_v54 = vpop.f32.mrf.mxu0  ;;  %v5731_v57 = vsel %vm2771_vm2, %v2741_v26, %v2742_v48  ;;  %v5740_v6 = vsel %vm3334_vm3, %v3304_v27, %v3305_v58 }
 0x14d   : > { %7830 = vst [vmem:[#allocation21_spill] sm:$0xff] %v5714_v50  ;;  %7831 = vst [vmem:[#allocation22_spill] sm:$0xff] %v5731_v57  ;;  %v896_v59 = vmul.f32 0.01, %v784_v51  ;;  %v4874_v61 = vadd.f32 %v4873_v54, %v4872_v45  ;;  %v1601_v62 = vrot.slane %v5714_v50, 7  ;;  %v1376_v1 = vrot.slane %v5714_v50, 6 }
 0x14e   : > { %v4875_v2 = vpop.f32.mrf.mxu0  ;;  %v2743_v3 = vrot.slane %v5714_v50, 1  ;;  %v3306_v5 = vrot.slane %v5714_v50, 2  ;;  %7832 = vst [vmem:[#allocation23_spill] sm:$0xff] %v5740_v6 }
 0x14f   : > { %v5742_v8 = vmax.f32 %v784_v51, %v896_v59  ;;  %v789_v9 = vadd.f32 %v4874_v61, %v5628_v41  ;;  %v5747_v10 = vsel %vm1629_vm1, %v1600_v43, %v1601_v62  ;;  %v5751_v11 = vsel %vm1404_vm0, %v1375_v44, %v1376_v1 }
 0x150   : > { %v4876_v13 = vpop.f32.mrf.mxu0  ;;  %v5755_v15 = vsel %vm2771_vm2, %v2742_v48, %v2743_v3  ;;  %v5759_v16 = vsel %vm3334_vm3, %v3305_v58, %v3306_v5 }
 0x151   : > { %7833 = vst [vmem:[#allocation24_spill] sm:$0xff] %v5742_v8  ;;  %7834 = vst [vmem:[#allocation25_spill] sm:$0xff] %v5755_v15  ;;  %v897_v17 = vmul.f32 0.01, %v789_v9  ;;  %v4877_v20 = vadd.f32 %v4876_v13, %v4875_v2  ;;  %v1602_v24 = vrot.slane %v5742_v8, 7  ;;  %v1377_v25 = vrot.slane %v5742_v8, 6 }
 0x152   : > { %7835 = vst [vmem:[#allocation26_spill] sm:$0xff] %v5759_v16  ;;  %v4878_v26 = vpop.f32.mrf.mxu0  ;;  %v2744_v29 = vrot.slane %v5742_v8, 1  ;;  %v3307_v51 = vrot.slane %v5742_v8, 2 }
 0x153   : > { %v5770_v32 = vmax.f32 %v789_v9, %v897_v17  ;;  %v792_v35 = vadd.f32 %v4877_v20, %v5628_v41  ;;  %v5775_v40 = vsel %vm1629_vm1, %v1601_v62, %v1602_v24  ;;  %v5779_v42 = vsel %vm1404_vm0, %v1376_v1, %v1377_v25 }
 0x154   : > { %v4879_v43 = vpop.f32.mrf.mxu0  ;;  %v5787_v48 = vsel %vm2771_vm2, %v2743_v3, %v2744_v29  ;;  %v5796_v9 = vsel %vm3334_vm3, %v3306_v5, %v3307_v51 }
 0x155   : > { %7836 = vst [vmem:[#allocation27_spill] sm:$0xff] %v5770_v32  ;;  %7837 = vst [vmem:[#allocation28_spill] sm:$0xff] %v5787_v48  ;;  %v898_v54 = vmul.f32 0.01, %v792_v35  ;;  %v4880_v58 = vadd.f32 %v4879_v43, %v4878_v26  ;;  %v1603_v59 = vrot.slane %v5770_v32, 7  ;;  %v1378_v61 = vrot.slane %v5770_v32, 6 }
 0x156   : > { %v4881_v62 = vpop.f32.mrf.mxu0  ;;  %v2745_v1 = vrot.slane %v5770_v32, 1  ;;  %v3308_v2 = vrot.slane %v5770_v32, 2  ;;  %7838 = vst [vmem:[#allocation29_spill] sm:$0xff] %v5796_v9 }
 0x157   : > { %v5798_v13 = vmax.f32 %v792_v35, %v898_v54  ;;  %v797_v3 = vadd.f32 %v4880_v58, %v5628_v41  ;;  %v5803_v17 = vsel %vm1629_vm1, %v1602_v24, %v1603_v59  ;;  %v5807_v20 = vsel %vm1404_vm0, %v1377_v25, %v1378_v61 }
 0x158   : > { %v4882_v26 = vpop.f32.mrf.mxu0  ;;  %v5811_v43 = vsel %vm2771_vm2, %v2744_v29, %v2745_v1  ;;  %v5815_v5 = vsel %vm3334_vm3, %v3307_v51, %v3308_v2 }
 0x159   : > { %7839 = vst [vmem:[#allocation30_spill] sm:$0xff] %v5798_v13  ;;  %7840 = vst [vmem:[#allocation31_spill] sm:$0xff] %v5811_v43  ;;  %v899_v35 = vmul.f32 0.01, %v797_v3  ;;  %v4883_v54 = vadd.f32 %v4882_v26, %v4881_v62  ;;  %v1604_v58 = vrot.slane %v5798_v13, 7  ;;  %v1379_v24 = vrot.slane %v5798_v13, 6 }
 0x15a   : > { %7841 = vst [vmem:[#allocation32_spill] sm:$0xff] %v5815_v5  ;;  %v4884_v30 = vpop.f32.mrf.mxu0  ;;  %v2746_v29 = vrot.slane %v5798_v13, 1 }
 0x15b   : > { %v5824_v28 = vmax.f32 %v797_v3, %v899_v35  ;;  %v800_v51 = vadd.f32 %v4883_v54, %v5628_v41  ;;  %v5829_v62 = vsel %vm1629_vm1, %v1603_v59, %v1604_v58  ;;  %v5833_v26 = vsel %vm1404_vm0, %v1378_v61, %v1379_v24 }
 0x15c   : > { %v4885_v27 = vpop.f32.mrf.mxu0  ;;  %v5841_v3 = vsel %vm2771_vm2, %v2745_v1, %v2746_v29 }
 0x15d   : > { %7842 = vst [vmem:[#allocation33_spill] sm:$0xff] %v5824_v28  ;;  %7843 = vst [vmem:[#allocation34_spill] sm:$0xff] %v5841_v3  ;;  %v2747_v35 = vrot.slane %v5824_v28, 1  ;;  %v900_v54 = vmul.f32 0.01, %v800_v51  ;;  %v4886_v59 = vadd.f32 %v4885_v27, %v4884_v30  ;;  %v3310_v47 = vrot.slane %v5824_v28, 2 }
 0x15e   : > { %v4887_v46 = vpop.f32.mrf.mxu0  ;;  %v1605_v61 = vrot.slane %v5824_v28, 7  ;;  %v1380_v14 = vrot.slane %v5824_v28, 6  ;;  %v3309_v27 = vrot.slane %v5798_v13, 2 }
 0x15f   : > { %v5849_v45 = vmax.f32 %v800_v51, %v900_v54  ;;  %v805_v49 = vadd.f32 %v4886_v59, %v5628_v41  ;;  %v5854_v1 = vsel %vm2771_vm2, %v2746_v29, %v2747_v35 }
 0x160   : > { %7845 = vst [vmem:[#allocation36_spill] sm:$0xff] %v5854_v1  ;;  %v4888_v30 = vpop.f32.mrf.mxu0  ;;  %v5859_v44 = vsel %vm1629_vm1, %v1604_v58, %v1605_v61  ;;  %v5863_v56 = vsel %vm1404_vm0, %v1379_v24, %v1380_v14  ;;  %v5874_v60 = vsel %vm3334_vm3, %v3309_v27, %v3310_v47  ;;  %v5878_v24 = vsel %vm3334_vm3, %v3308_v2, %v3309_v27 }
 0x161   : > { %7844 = vst [vmem:[#allocation35_spill] sm:$0xff] %v5849_v45  ;;  %v901_v54 = vmul.f32 0.01, %v805_v49  ;;  %v4889_v59 = vadd.f32 %v4888_v30, %v4887_v46  ;;  %v1606_v25 = vrot.slane %v5849_v45, 7  ;;  %v1381_v29 = vrot.slane %v5849_v45, 6  ;;  %7846 = vst [vmem:[#allocation37_spill] sm:$0xff] %v5874_v60 }
 0x162   : > { %v4890_v55 = vpop.f32.mrf.mxu0  ;;  %v2748_v58 = vrot.slane %v5849_v45, 1  ;;  %7847 = vst [vmem:[#allocation38_spill] sm:$0xff] %v5878_v24  ;;  %v3311_v7 = vrot.slane %v5849_v45, 2 }
 0x163   : > { %v5880_v51 = vmax.f32 %v805_v49, %v901_v54  ;;  %v808_v46 = vadd.f32 %v4889_v59, %v5628_v41  ;;  %v5885_v30 = vsel %vm1629_vm1, %v1605_v61, %v1606_v25  ;;  %v5889_v23 = vsel %vm1404_vm0, %v1380_v14, %v1381_v29 }
 0x164   : > { %v4891_v22 = vpop.f32.mrf.mxu0  ;;  %v5897_v49 = vsel %vm2771_vm2, %v2747_v35, %v2748_v58 }
 0x165   : > { %7848 = vst [vmem:[#allocation39_spill] sm:$0xff] %v5880_v51  ;;  %7849 = vst [vmem:[#allocation40_spill] sm:$0xff] %v5897_v49  ;;  %v902_v61 = vmul.f32 0.01, %v808_v46  ;;  %v4892_v54 = vadd.f32 %v4891_v22, %v4890_v55  ;;  %v1607_v59 = vrot.slane %v5880_v51, 7  ;;  %v1382_v14 = vrot.slane %v5880_v51, 6 }
 0x166   : > { %v4893_v12 = vpop.f32.mrf.mxu0  ;;  %v2749_v9 = vrot.slane %v5880_v51, 1  ;;  %v3312_v2 = vrot.slane %v5880_v51, 2 }
 0x167   : > { %v5906_v5 = vmax.f32 %v808_v46, %v902_v61  ;;  %v813_v35 = vadd.f32 %v4892_v54, %v5628_v41  ;;  %v5911_v27 = vsel %vm1629_vm1, %v1606_v25, %v1607_v59  ;;  %v5915_v22 = vsel %vm1404_vm0, %v1381_v29, %v1382_v14 }
 0x168   : > { %v4894_v55 = vpop.f32.mrf.mxu0  ;;  %v5919_v24 = vsel %vm2771_vm2, %v2748_v58, %v2749_v9  ;;  %v5923_v60 = vsel %vm3334_vm3, %v3311_v7, %v3312_v2  ;;  %v5927_v46 = vsel %vm3334_vm3, %v3310_v47, %v3311_v7 }
 0x169   : > { %7850 = vst [vmem:[#allocation41_spill] sm:$0xff] %v5906_v5  ;;  %7851 = vst [vmem:[#allocation42_spill] sm:$0xff] %v5919_v24  ;;  %v903_v61 = vmul.f32 0.01, %v813_v35  ;;  %v4895_v25 = vadd.f32 %v4894_v55, %v4893_v12  ;;  %v1608_v54 = vrot.slane %v5906_v5, 7  ;;  %v1383_v29 = vrot.slane %v5906_v5, 6 }
 0x16a   : > { %7852 = vst [vmem:[#allocation43_spill] sm:$0xff] %v5923_v60  ;;  %7853 = vst [vmem:[#allocation44_spill] sm:$0xff] %v5927_v46  ;;  %v4896_v6 = vpop.f32.mrf.mxu0  ;;  %v2750_v34 = vrot.slane %v5906_v5, 1 }
 0x16b   : > { %v5938_v7 = vmax.f32 %v813_v35, %v903_v61  ;;  %v816_v12 = vadd.f32 %v4895_v25, %v5628_v41  ;;  %v5943_v47 = vsel %vm1629_vm1, %v1607_v59, %v1608_v54  ;;  %v5947_v55 = vsel %vm1404_vm0, %v1382_v14, %v1383_v29 }
 0x16c   : > { %v4897_v16 = vpop.f32.mrf.mxu0  ;;  %v5955_v35 = vsel %vm2771_vm2, %v2749_v9, %v2750_v34  ;;  %v3313_v61 = vrot.slane %v5906_v5, 2 }
 0x16d   : > { %7854 = vst [vmem:[#allocation45_spill] sm:$0xff] %v5938_v7  ;;  %7855 = vst [vmem:[#allocation46_spill] sm:$0xff] %v5955_v35  ;;  %v904_v25 = vmul.f32 0.01, %v816_v12  ;;  %v4898_v59 = vadd.f32 %v4897_v16, %v4896_v6  ;;  %v1609_v39 = vrot.slane %v5938_v7, 7  ;;  %v1384_v14 = vrot.slane %v5938_v7, 6 }
 0x16e   : > { %v4899_v46 = vpop.f32.mrf.mxu0  ;;  %v2751_v60 = vrot.slane %v5938_v7, 1  ;;  %v3314_v58 = vrot.slane %v5938_v7, 2  ;;  %v5964_v51 = vsel %vm3334_vm3, %v3312_v2, %v3313_v61 }
 0x16f   : > { %7856 = vst [vmem:[#allocation47_spill] sm:$0xff] %v5964_v51  ;;  %v5966_v49 = vmax.f32 %v816_v12, %v904_v25  ;;  %v821_v9 = vadd.f32 %v4898_v59, %v5628_v41  ;;  %v5971_v6 = vsel %vm1629_vm1, %v1608_v54, %v1609_v39  ;;  %v5975_v16 = vsel %vm1404_vm0, %v1383_v29, %v1384_v14 }
 0x170   : > { %v4900_v5 = vpop.f32.mrf.mxu0  ;;  %v5979_v24 = vsel %vm2771_vm2, %v2750_v34, %v2751_v60  ;;  %v5983_v2 = vsel %vm3334_vm3, %v3313_v61, %v3314_v58 }
 0x171   : > { %7857 = vst [vmem:[#allocation48_spill] sm:$0xff] %v5966_v49  ;;  %7858 = vst [vmem:[#allocation49_spill] sm:$0xff] %v5979_v24  ;;  %v905_v12 = vmul.f32 0.01, %v821_v9  ;;  %v4901_v25 = vadd.f32 %v4900_v5, %v4899_v46  ;;  %v1610_v59 = vrot.slane %v5966_v49, 7  ;;  %v1385_v54 = vrot.slane %v5966_v49, 6 }
 0x172   : > { %7859 = vst [vmem:[#allocation50_spill] sm:$0xff] %v5983_v2  ;;  %v4902_v28 = vpop.f32.mrf.mxu0  ;;  %v2752_v34 = vrot.slane %v5966_v49, 1 }
 0x173   : > { %v5994_v61 = vmax.f32 %v821_v9, %v905_v12  ;;  %v824_v5 = vadd.f32 %v4901_v25, %v5628_v41  ;;  %v5999_v46 = vsel %vm1629_vm1, %v1609_v39, %v1610_v59  ;;  %v6003_v1 = vsel %vm1404_vm0, %v1384_v14, %v1385_v54 }
 0x174   : > { %v4903_v29 = vpop.f32.mrf.mxu0  ;;  %v6011_v9 = vsel %vm2771_vm2, %v2751_v60, %v2752_v34  ;;  %v3315_v12 = vrot.slane %v5966_v49, 2 }
 0x175   : > { %7860 = vst [vmem:[#allocation51_spill] sm:$0xff] %v5994_v61  ;;  %7861 = vst [vmem:[#allocation52_spill] sm:$0xff] %v6011_v9  ;;  %v906_v25 = vmul.f32 0.01, %v824_v5  ;;  %v4904_v39 = vadd.f32 %v4903_v29, %v4902_v28  ;;  %v1611_v3 = vrot.slane %v5994_v61, 7  ;;  %v1386_v14 = vrot.slane %v5994_v61, 6 }
 0x176   : > { %v4905_v51 = vpop.f32.mrf.mxu0  ;;  %v2753_v2 = vrot.slane %v5994_v61, 1  ;;  %v3316_v45 = vrot.slane %v5994_v61, 2  ;;  %v6020_v7 = vsel %vm3334_vm3, %v3314_v58, %v3315_v12 }
 0x177   : > { %7862 = vst [vmem:[#allocation53_spill] sm:$0xff] %v6020_v7  ;;  %v6022_v35 = vmax.f32 %v824_v5, %v906_v25  ;;  %v829_v60 = vadd.f32 %v4904_v39, %v5628_v41  ;;  %v6027_v28 = vsel %vm1629_vm1, %v1610_v59, %v1611_v3  ;;  %v6031_v29 = vsel %vm1404_vm0, %v1385_v54, %v1386_v14 }
 0x178   : > { %v4906_v49 = vpop.f32.mrf.mxu0  ;;  %v6035_v24 = vsel %vm2771_vm2, %v2752_v34, %v2753_v2  ;;  %v6039_v58 = vsel %vm3334_vm3, %v3315_v12, %v3316_v45 }
 0x179   : > { %7863 = vst [vmem:[#allocation54_spill] sm:$0xff] %v6022_v35  ;;  %7864 = vst [vmem:[#allocation55_spill] sm:$0xff] %v6035_v24  ;;  %v907_v5 = vmul.f32 0.01, %v829_v60  ;;  %v4907_v25 = vadd.f32 %v4906_v49, %v4905_v51  ;;  %v1612_v39 = vrot.slane %v6022_v35, 7  ;;  %v1387_v59 = vrot.slane %v6022_v35, 6 }
 0x17a   : > { %7865 = vst [vmem:[#allocation56_spill] sm:$0xff] %v6039_v58  ;;  %v4908_v32 = vpop.f32.mrf.mxu0  ;;  %v2754_v34 = vrot.slane %v6022_v35, 1 }
 0x17b   : > { %v6048_v48 = vmax.f32 %v829_v60, %v907_v5  ;;  %v832_v12 = vadd.f32 %v4907_v25, %v5628_v41  ;;  %v6053_v51 = vsel %vm1629_vm1, %v1611_v3, %v1612_v39  ;;  %v6057_v49 = vsel %vm1404_vm0, %v1386_v14, %v1387_v59 }
 0x17c   : > { %v4909_v43 = vpop.f32.mrf.mxu0  ;;  %v6065_v60 = vsel %vm2771_vm2, %v2753_v2, %v2754_v34 }
 0x17d   : > { %7866 = vst [vmem:[#allocation57_spill] sm:$0xff] %v6048_v48  ;;  %7867 = vst [vmem:[#allocation58_spill] sm:$0xff] %v6065_v60  ;;  %v2755_v5 = vrot.slane %v6048_v48, 1  ;;  %v908_v25 = vmul.f32 0.01, %v832_v12  ;;  %v4910_v3 = vadd.f32 %v4909_v43, %v4908_v32  ;;  %v3318_v61 = vrot.slane %v6048_v48, 2 }
 0x17e   : > { %v4911_v9 = vpop.f32.mrf.mxu0  ;;  %v1613_v14 = vrot.slane %v6048_v48, 7  ;;  %v1388_v24 = vrot.slane %v6048_v48, 6  ;;  %v3317_v32 = vrot.slane %v6022_v35, 2 }
 0x17f   : > { %v6073_v50 = vmax.f32 %v832_v12, %v908_v25  ;;  %v837_v13 = vadd.f32 %v4910_v3, %v5628_v41  ;;  %v6078_v2 = vsel %vm2771_vm2, %v2754_v34, %v2755_v5 }
 0x180   : > { %7869 = vst [vmem:[#allocation60_spill] sm:$0xff] %v6078_v2  ;;  %v4912_v43 = vpop.f32.mrf.mxu0  ;;  %v6083_v8 = vsel %vm1629_vm1, %v1612_v39, %v1613_v14  ;;  %v6087_v57 = vsel %vm1404_vm0, %v1387_v59, %v1388_v24  ;;  %v6098_v35 = vsel %vm3334_vm3, %v3317_v32, %v3318_v61  ;;  %v6102_v59 = vsel %vm3334_vm3, %v3316_v45, %v3317_v32 }
 0x181   : > { %7868 = vst [vmem:[#allocation59_spill] sm:$0xff] %v6073_v50  ;;  %v909_v25 = vmul.f32 0.01, %v837_v13  ;;  %v4913_v3 = vadd.f32 %v4912_v43, %v4911_v9  ;;  %v1614_v54 = vrot.slane %v6073_v50, 7  ;;  %v1389_v34 = vrot.slane %v6073_v50, 6  ;;  %7870 = vst [vmem:[#allocation61_spill] sm:$0xff] %v6098_v35 }
 0x182   : > { %v4914_v7 = vpop.f32.mrf.mxu0  ;;  %v2756_v39 = vrot.slane %v6073_v50, 1  ;;  %7871 = vst [vmem:[#allocation62_spill] sm:$0xff] %v6102_v59  ;;  %v3319_v60 = vrot.slane %v6073_v50, 2 }
 0x183   : > { %v6104_v12 = vmax.f32 %v837_v13, %v909_v25  ;;  %v840_v9 = vadd.f32 %v4913_v3, %v5628_v41  ;;  %v6109_v43 = vsel %vm1629_vm1, %v1613_v14, %v1614_v54  ;;  %v6113_v58 = vsel %vm1404_vm0, %v1388_v24, %v1389_v34 }
 0x184   : > { %v4915_v48 = vpop.f32.mrf.mxu0  ;;  %v6121_v13 = vsel %vm2771_vm2, %v2755_v5, %v2756_v39 }
 0x185   : > { %7872 = vst [vmem:[#allocation63_spill] sm:$0xff] %v6104_v12  ;;  %7873 = vst [vmem:[#allocation64_spill] sm:$0xff] %v6121_v13  ;;  %v910_v14 = vmul.f32 0.01, %v840_v9  ;;  %v4916_v25 = vadd.f32 %v4915_v48, %v4914_v7  ;;  %v1615_v3 = vrot.slane %v6104_v12, 7  ;;  %v1390_v24 = vrot.slane %v6104_v12, 6 }
 0x186   : > { %v4917_v2 = vpop.f32.mrf.mxu0  ;;  %v2757_v15 = vrot.slane %v6104_v12, 1  ;;  %v3320_v45 = vrot.slane %v6104_v12, 2 }
 0x187   : > { %v6130_v19 = vmax.f32 %v840_v9, %v910_v14  ;;  %v845_v5 = vadd.f32 %v4916_v25, %v5628_v41  ;;  %v6135_v32 = vsel %vm1629_vm1, %v1614_v54, %v1615_v3  ;;  %v6139_v48 = vsel %vm1404_vm0, %v1389_v34, %v1390_v24 }
 0x188   : > { %7875 = vst [vmem:[#allocation66_spill] sm:$0xff] %v6135_v32  ;;  %7876 = vst [vmem:[#allocation67_spill] sm:$0xff] %v6139_v48  ;;  %v4918_v7 = vpop.f32.mrf.mxu0  ;;  %v6143_v59 = vsel %vm2771_vm2, %v2756_v39, %v2757_v15  ;;  %v6147_v35 = vsel %vm3334_vm3, %v3319_v60, %v3320_v45  ;;  %v6151_v9 = vsel %vm3334_vm3, %v3318_v61, %v3319_v60 }
 0x189   : > { %7874 = vst [vmem:[#allocation65_spill] sm:$0xff] %v6130_v19  ;;  %7877 = vst [vmem:[#allocation68_spill] sm:$0xff] %v6143_v59  ;;  %v911_v14 = vmul.f32 0.01, %v845_v5  ;;  %v4919_v54 = vadd.f32 %v4918_v7, %v4917_v2  ;;  %v1616_v25 = vrot.slane %v6130_v19, 7  ;;  %v1391_v34 = vrot.slane %v6130_v19, 6 }
 0x18a   : > { %7878 = vst [vmem:[#allocation69_spill] sm:$0xff] %v6147_v35  ;;  %7879 = vst [vmem:[#allocation70_spill] sm:$0xff] %v6151_v9  ;;  %v4920_v50 = vpop.f32.mrf.mxu0  ;;  %v2758_v33 = vrot.slane %v6130_v19, 1 }
 0x18b   : > { %v6162_v61 = vmax.f32 %v845_v5, %v911_v14  ;;  %v848_v60 = vadd.f32 %v4919_v54, %v5628_v41  ;;  %v6167_v2 = vsel %vm1629_vm1, %v1615_v3, %v1616_v25  ;;  %v6171_v7 = vsel %vm1404_vm0, %v1390_v24, %v1391_v34 }
 0x18c   : > { %7881 = vst [vmem:[#allocation72_spill] sm:$0xff] %v6167_v2  ;;  %7882 = vst [vmem:[#allocation73_spill] sm:$0xff] %v6171_v7  ;;  %v4921_v31 = vpop.f32.mrf.mxu0  ;;  %v6179_v5 = vsel %vm2771_vm2, %v2757_v15, %v2758_v33  ;;  %v3321_v14 = vrot.slane %v6130_v19, 2  ;;  %v5160_v2 = vld [vmem:[#allocation8 + $0x1f4] ss:$8 sps:$4 sm:$0xff]  }
 0x18d   : > { %7880 = vst [vmem:[#allocation71_spill] sm:$0xff] %v6162_v61  ;;  %7883 = vst [vmem:[#allocation74_spill] sm:$0xff] %v6179_v5  ;;  %v912_v54 = vmul.f32 0.01, %v848_v60  ;;  %v4922_v3 = vadd.f32 %v4921_v31, %v4920_v50  ;;  %v1617_v38 = vrot.slane %v6162_v61, 7  ;;  %v1392_v24 = vrot.slane %v6162_v61, 6  ;;  %3045 = vmatprep.subr.bf16.mxu0 %v5160_v2 }
 0x18e   : > { %v4923_v9 = vpop.f32.mrf.mxu0  ;;  %v2759_v35 = vrot.slane %v6162_v61, 1  ;;  %v3322_v39 = vrot.slane %v6162_v61, 2  ;;  %v6188_v12 = vsel %vm3334_vm3, %v3320_v45, %v3321_v14 }
 0x18f   : > { %7884 = vst [vmem:[#allocation75_spill] sm:$0xff] %v6188_v12  ;;  %v6190_v13 = vmax.f32 %v848_v60, %v912_v54  ;;  %v853_v15 = vadd.f32 %v4922_v3, %v5628_v41  ;;  %v6195_v31 = vsel %vm1629_vm1, %v1616_v25, %v1617_v38  ;;  %v6199_v50 = vsel %vm1404_vm0, %v1391_v34, %v1392_v24 }
 0x190   : > { %7886 = vst [vmem:[#allocation77_spill] sm:$0xff] %v6195_v31  ;;  %7887 = vst [vmem:[#allocation78_spill] sm:$0xff] %v6199_v50  ;;  %v4924_v19 = vpop.f32.mrf.mxu0  ;;  %v6203_v59 = vsel %vm2771_vm2, %v2758_v33, %v2759_v35  ;;  %v6207_v45 = vsel %vm3334_vm3, %v3321_v14, %v3322_v39 }
 0x191   : > { %7885 = vst [vmem:[#allocation76_spill] sm:$0xff] %v6190_v13  ;;  %7888 = vst [vmem:[#allocation79_spill] sm:$0xff] %v6203_v59  ;;  %v913_v60 = vmul.f32 0.01, %v853_v15  ;;  %v4925_v54 = vadd.f32 %v4924_v19, %v4923_v9  ;;  %v1618_v3 = vrot.slane %v6190_v13, 7  ;;  %v1393_v25 = vrot.slane %v6190_v13, 6 }
 0x192   : > { %7889 = vst [vmem:[#allocation80_spill] sm:$0xff] %v6207_v45  ;;  %v4926_v4 = vpop.f32.mrf.mxu0  ;;  %v2760_v33 = vrot.slane %v6190_v13, 1 }
 0x193   : > { %v6218_v14 = vmax.f32 %v853_v15, %v913_v60  ;;  %v856_v19 = vadd.f32 %v4925_v54, %v5628_v41  ;;  %v6223_v9 = vsel %vm1629_vm1, %v1617_v38, %v1618_v3  ;;  %v6227_v32 = vsel %vm1404_vm0, %v1392_v24, %v1393_v25 }
 0x194   : > { %7891 = vst [vmem:[#allocation82_spill] sm:$0xff] %v6223_v9  ;;  %7892 = vst [vmem:[#allocation83_spill] sm:$0xff] %v6227_v32  ;;  %v4927_v34 = vpop.f32.mrf.mxu0  ;;  %v6235_v15 = vsel %vm2771_vm2, %v2759_v35, %v2760_v33  ;;  %v3323_v60 = vrot.slane %v6190_v13, 2 }
 0x195   : > { %7890 = vst [vmem:[#allocation81_spill] sm:$0xff] %v6218_v14  ;;  %7893 = vst [vmem:[#allocation84_spill] sm:$0xff] %v6235_v15  ;;  %v914_v54 = vmul.f32 0.01, %v856_v19  ;;  %v4928_v38 = vadd.f32 %v4927_v34, %v4926_v4  ;;  %v1619_v7 = vrot.slane %v6218_v14, 7  ;;  %v1394_v24 = vrot.slane %v6218_v14, 6 }
 0x196   : > { %v4929_v12 = vpop.f32.mrf.mxu0  ;;  %v2761_v45 = vrot.slane %v6218_v14, 1  ;;  %v3324_v48 = vrot.slane %v6218_v14, 2  ;;  %v6244_v61 = vsel %vm3334_vm3, %v3322_v39, %v3323_v60 }
 0x197   : > { %7894 = vst [vmem:[#allocation85_spill] sm:$0xff] %v6244_v61  ;;  %v6246_v5 = vmax.f32 %v856_v19, %v914_v54  ;;  %v861_v35 = vadd.f32 %v4928_v38, %v5628_v41  ;;  %v6251_v4 = vsel %vm1629_vm1, %v1618_v3, %v1619_v7  ;;  %v6255_v34 = vsel %vm1404_vm0, %v1393_v25, %v1394_v24 }
 0x198   : > { %7896 = vst [vmem:[#allocation87_spill] sm:$0xff] %v6251_v4  ;;  %7897 = vst [vmem:[#allocation88_spill] sm:$0xff] %v6255_v34  ;;  %v4930_v13 = vpop.f32.mrf.mxu0  ;;  %v6259_v59 = vsel %vm2771_vm2, %v2760_v33, %v2761_v45  ;;  %v6263_v39 = vsel %vm3334_vm3, %v3323_v60, %v3324_v48 }
 0x199   : > { %7895 = vst [vmem:[#allocation86_spill] sm:$0xff] %v6246_v5  ;;  %7898 = vst [vmem:[#allocation89_spill] sm:$0xff] %v6259_v59  ;;  %v915_v19 = vmul.f32 0.01, %v861_v35  ;;  %v4931_v54 = vadd.f32 %v4930_v13, %v4929_v12  ;;  %v1620_v38 = vrot.slane %v6246_v5, 7  ;;  %v1395_v3 = vrot.slane %v6246_v5, 6 }
 0x19a   : > { %7899 = vst [vmem:[#allocation90_spill] sm:$0xff] %v6263_v39  ;;  %v4932_v50 = vpop.f32.mrf.mxu0  ;;  %v2762_v33 = vrot.slane %v6246_v5, 1 }
 0x19b   : > { %v6272_v31 = vmax.f32 %v861_v35, %v915_v19  ;;  %v864_v60 = vadd.f32 %v4931_v54, %v5628_v41  ;;  %v6277_v12 = vsel %vm1629_vm1, %v1619_v7, %v1620_v38  ;;  %v6281_v13 = vsel %vm1404_vm0, %v1394_v24, %v1395_v3 }
 0x19c   : > { %7901 = vst [vmem:[#allocation92_spill] sm:$0xff] %v6277_v12  ;;  %7902 = vst [vmem:[#allocation93_spill] sm:$0xff] %v6281_v13  ;;  %v4933_v9 = vpop.f32.mrf.mxu0  ;;  %v6289_v35 = vsel %vm2771_vm2, %v2761_v45, %v2762_v33  ;;  %v3325_v13 = vrot.slane %v6246_v5, 2 }
 0x19d   : > { %7900 = vst [vmem:[#allocation91_spill] sm:$0xff] %v6272_v31  ;;  %7903 = vst [vmem:[#allocation94_spill] sm:$0xff] %v6289_v35  ;;  %v1396_v19 = vrot.slane %v6272_v31, 6  ;;  %v2763_v7 = vrot.slane %v6272_v31, 1  ;;  %v916_v54 = vmul.f32 0.01, %v864_v60  ;;  %v4934_v24 = vadd.f32 %v4933_v9, %v4932_v50 }
 0x19e   : > { %v3326_v14 = vrot.slane %v6272_v31, 2  ;;  %v4935_v15 = vpop.f32.mrf.mxu0  ;;  %v1621_v59 = vrot.slane %v6272_v31, 7  ;;  %v6326_v2 = vsel %vm3334_vm3, %v3324_v48, %v3325_v13 }
 0x19f   : > { %v6297_v32 = vmax.f32 %v864_v60, %v916_v54  ;;  %v6301_v45 = vsel %vm1404_vm0, %v1395_v3, %v1396_v19  ;;  %v6305_v34 = vsel %vm2771_vm2, %v2762_v33, %v2763_v7  ;;  %v869_v50 = vadd.f32 %v4934_v24, %v5628_v41  ;;  %7909 = vst [vmem:[#allocation100_spill] sm:$0xff] %v6326_v2 }
 0x1a0   : > { %7905 = vst [vmem:[#allocation96_spill] sm:$0xff] %v6301_v45  ;;  %7906 = vst [vmem:[#allocation97_spill] sm:$0xff] %v6305_v34  ;;  %v4936_v9 = vpop.f32.mrf.mxu0  ;;  %v6311_v4 = vsel %vm1629_vm1, %v1620_v38, %v1621_v59  ;;  %v6322_v38 = vsel %vm3334_vm3, %v3325_v13, %v3326_v14 }
 0x1a1   : > { %7904 = vst [vmem:[#allocation95_spill] sm:$0xff] %v6297_v32  ;;  %7907 = vst [vmem:[#allocation98_spill] sm:$0xff] %v6311_v4  ;;  %v4937_v54 = vadd.f32 %v4936_v9, %v4935_v15  ;;  %v1622_v3 = vrot.slane %v6297_v32, 7  ;;  %v1397_v25 = vrot.slane %v6297_v32, 6  ;;  %v917_v61 = vmul.f32 0.01, %v869_v50 }
 0x1a2   : > { %v4938_v39 = vpop.f32.mrf.mxu0  ;;  %v2764_v24 = vrot.slane %v6297_v32, 1  ;;  %7908 = vst [vmem:[#allocation99_spill] sm:$0xff] %v6322_v38 }
 0x1a3   : > { %v872_v15 = vadd.f32 %v4937_v54, %v5628_v41  ;;  %v6331_v9 = vsel %vm1629_vm1, %v1621_v59, %v1622_v3  ;;  %v6335_v33 = vsel %vm1404_vm0, %v1396_v19, %v1397_v25  ;;  %v6339_v31 = vmax.f32 %v869_v50, %v917_v61 }
 0x1a4   : > { %7910 = vst [vmem:[#allocation101_spill] sm:$0xff] %v6331_v9  ;;  %7911 = vst [vmem:[#allocation102_spill] sm:$0xff] %v6335_v33  ;;  %v4939_v35 = vpop.f32.mrf.mxu0  ;;  %v6347_v59 = vsel %vm2771_vm2, %v2763_v7, %v2764_v24  ;;  %v3327_v19 = vrot.slane %v6297_v32, 2 }
 0x1a5   : > { %7912 = vst [vmem:[#allocation103_spill] sm:$0xff] %v6339_v31  ;;  %7913 = vst [vmem:[#allocation104_spill] sm:$0xff] %v6347_v59  ;;  %v918_v54 = vmul.f32 0.01, %v872_v15  ;;  %v4940_v34 = vadd.f32 %v4939_v35, %v4938_v39  ;;  %v1623_v60 = vrot.slane %v6339_v31, 7  ;;  %v1398_v61 = vrot.slane %v6339_v31, 6 }
 0x1a6   : > { %v4941_v5 = vpop.f32.mrf.mxu0  ;;  %v6357_v13 = vsel %vm3334_vm3, %v3326_v14, %v3327_v19  ;;  %v2765_v35 = vrot.slane %v6339_v31, 1 }
 0x1a7   : > { %v6352_v50 = vmax.f32 %v872_v15, %v918_v54  ;;  %v877_v48 = vadd.f32 %v4940_v34, %v5628_v41  ;;  %7915 = vst [vmem:[#allocation106_spill] sm:$0xff] %v6357_v13  ;;  %v6361_v7 = vsel %vm1629_vm1, %v1622_v3, %v1623_v60  ;;  %v6365_v39 = vsel %vm1404_vm0, %v1397_v25, %v1398_v61 }
 0x1a8   : > { %v4942_v2 = vpop.f32.mrf.mxu0  ;;  %7916 = vst [vmem:[#allocation107_spill] sm:$0xff] %v6361_v7  ;;  %7917 = vst [vmem:[#allocation108_spill] sm:$0xff] %v6365_v39  ;;  %v3328_v15 = vrot.slane %v6339_v31, 2  ;;  %v6373_v45 = vsel %vm2771_vm2, %v2764_v24, %v2765_v35 }
 0x1a9   : > { %7914 = vst [vmem:[#allocation105_spill] sm:$0xff] %v6352_v50  ;;  %v919_v54 = vmul.f32 0.01, %v877_v48  ;;  %v4943_v38 = vadd.f32 %v4942_v2, %v4941_v5  ;;  %v1624_v34 = vrot.slane %v6352_v50, 7  ;;  %v1399_v14 = vrot.slane %v6352_v50, 6  ;;  %7918 = vst [vmem:[#allocation109_spill] sm:$0xff] %v6373_v45 }
 0x1aa   : > { %v4944_v32 = vpop.f32.mrf.mxu0  ;;  %v2766_v25 = vrot.slane %v6352_v50, 1  ;;  %v6380_v33 = vsel %vm3334_vm3, %v3327_v19, %v3328_v15  ;;  %v3329_v45 = vrot.slane %v6352_v50, 2 }
 0x1ab   : > { %7919 = vst [vmem:[#allocation110_spill] sm:$0xff] %v6380_v33  ;;  %v6382_v4 = vmax.f32 %v877_v48, %v919_v54  ;;  %v880_v5 = vadd.f32 %v4943_v38, %v5628_v41  ;;  %v6387_v2 = vsel %vm1629_vm1, %v1623_v60, %v1624_v34  ;;  %v6391_v24 = vsel %vm1404_vm0, %v1398_v61, %v1399_v14 }
 0x1ac   : > { %v4945_v9 = vpop.f32.mrf.mxu0  ;;  %v6401_v38 = vsel %vm2771_vm2, %v2765_v35, %v2766_v25 }
 0x1ad   : > { %7920 = vst [vmem:[#allocation111_spill] sm:$0xff] %v6382_v4  ;;  %7921 = vst [vmem:[#allocation112_spill] sm:$0xff] %v6401_v38  ;;  %v920_v60 = vmul.f32 0.01, %v880_v5  ;;  %v4946_v54 = vadd.f32 %v4945_v9, %v4944_v32  ;;  %v1625_v31 = vrot.slane %v6382_v4, 7  ;;  %v1400_v61 = vrot.slane %v6382_v4, 6 }
 0x1ae   : > { %v4947_v12 = vpop.f32.mrf.mxu0  ;;  %v992_v9 = vand.u32 63, %v5633_v63  ;;  %v2767_v59 = vrot.slane %v6382_v4, 1 }
 0x1af   : > { %v6407_v7 = vmax.f32 %v880_v5, %v920_v60  ;;  %v885_v19 = vadd.f32 %v4946_v54, %v5628_v41  ;;  %v6412_v48 = vsel %vm1629_vm1, %v1624_v34, %v1625_v31  ;;  %v6416_v35 = vsel %vm1404_vm0, %v1399_v14, %v1400_v61 }
 0x1b0   : > { %7923 = vst [vmem:[#allocation114_spill] sm:$0xff] %v6416_v35  ;;  %v4948_v32 = vpop.f32.mrf.mxu0  ;;  %v3330_v5 = vrot.slane %v6382_v4, 2  ;;  %v6426_v54 = vsel %vm2771_vm2, %v2766_v25, %v2767_v59  ;;  %vm1662_vm4 = vcmp.ge.s32.totalorder %v992_v9, 1  ;;  %vm6477_vm5 = vcmp.ge.s32.totalorder %v992_v9, 2  ;;  %v5145_v9 = vld [vmem:[#allocation8 + $0x154] ss:$8 sps:$4 sm:$0xff]  }
 0x1b1   : > { %7922 = vst [vmem:[#allocation113_spill] sm:$0xff] %v6407_v7  ;;  %v921_v60 = vmul.f32 0.01, %v885_v19  ;;  %v4949_v3 = vadd.f32 %v4948_v32, %v4947_v12  ;;  %v1626_v41 = vrot.slane %v6407_v7, 7  ;;  %v1401_v34 = vrot.slane %v6407_v7, 6  ;;  %7924 = vst [vmem:[#allocation115_spill] sm:$0xff] %v6426_v54 }
 0x1b2   : > { %v2768_v13 = vrot.slane %v6407_v7, 1  ;;  %v6433_v33 = vsel %vm3334_vm3, %v3329_v45, %v3330_v5  ;;  %v5209_v12 = vld [vmem:[%s7680_s2] ss:$0 sm:$0xff]  ;;  %vm6492_vm7 = vmpackc.low %vm5416_vm6, %vm1662_vm4  ;;  %v7936_v35 = vrot.slane %v5635_v0, 6  ;;  %v5164_v54 = vld [vmem:[#allocation8 + $0x1d0] ss:$8 sps:$4 sm:$0xff]  }
 0x1b3   : > { %7925 = vst [vmem:[#allocation116_spill] sm:$0xff] %v6433_v33  ;;  %v6435_v50 = vmax.f32 %v885_v19, %v921_v60  ;;  %v888_v32 = vadd.f32 %v5209_v12, %v4949_v3  ;;  %v6442_v25 = vsel %vm1629_vm1, %v1625_v31, %v1626_v41  ;;  %v6446_v14 = vsel %vm1404_vm0, %v1400_v61, %v1401_v34  ;;  %vm4648_vm8 = vmpackc.low %vm5416_vm6, %vm6477_vm5 }
 0x1b4   : > { %7927 = vst [vmem:[#allocation118_spill] sm:$0xff] %v6446_v14  ;;  %v6456_v3 = vsel %vm2771_vm2, %v2767_v59, %v2768_v13  ;;  %v6462_v61 = vsel %vm3334_vm3, %v3328_v15, %v3329_v45  ;;  %v3331_v45 = vrot.slane %v6407_v7, 2  ;;  %v5158_v14 = vld [vmem:[#allocation8 + $0x1f0] ss:$8 sps:$4 sm:$0xff]  }
 0x1b5   : > { %7926 = vst [vmem:[#allocation117_spill] sm:$0xff] %v6435_v50  ;;  %7928 = vst [vmem:[#allocation119_spill] sm:$0xff] %v6456_v3  ;;  %v922_v12 = vmul.f32 0.01, %v888_v32  ;;  %v1627_v31 = vrot.slane %v6435_v50, 7  ;;  %v1402_v39 = vrot.slane %v6435_v50, 6 }
 0x1b6   : > { %7929 = vst [vmem:[#allocation120_spill] sm:$0xff] %v6462_v61  ;;  %v2769_v38 = vrot.slane %v6435_v50, 1  ;;  %v3332_v15 = vrot.slane %v6435_v50, 2  ;;  %v7935_v50 = vrot.slane %v5635_v0, 7 }
 0x1b7   : > { %v6466_v4 = vmax.f32 %v888_v32, %v922_v12  ;;  %v6470_v60 = vsel %vm1629_vm1, %v1626_v41, %v1627_v31  ;;  %v6474_v59 = vsel %vm1404_vm0, %v1401_v34, %v1402_v39  ;;  %v5137_v34 = vld [vmem:[#allocation8 + $0x170] ss:$8 sps:$4 sm:$0xff]  }
 0x1b8   : > { %v6487_v41 = vsel %vm2771_vm2, %v2768_v13, %v2769_v38  ;;  %v6501_v33 = vsel %vm3334_vm3, %v3331_v45, %v3332_v15  ;;  %v6505_v13 = vsel %vm3334_vm3, %v3330_v5, %v3331_v45 }
 0x1b9   : > { %v1403_v32 = vrot.slane %v6466_v4, 6  ;;  %v1628_v12 = vrot.slane %v6466_v4, 7  ;;  %7932 = vst [vmem:[#allocation121_spill] sm:$0xff] %v6487_v41  ;;  %v2770_v61 = vrot.slane %v6466_v4, 1  ;;  %v5142_v41 = vld [vmem:[#allocation8 + $0x164] ss:$8 sps:$4 sm:$0xff]  }
 0x1bb   : > { %v1661_v7 = vsel %vm1629_vm1, %v1628_v12, %v7935_v50  ;;  %v1436_v19 = vsel %vm1404_vm0, %v1403_v32, %v7936_v35  ;;  %v6520_v3 = vsel %vm1629_vm1, %v1627_v31, %v1628_v12  ;;  %v6524_v5 = vsel %vm1404_vm0, %v1402_v39, %v1403_v32  ;;  %v5140_v32 = vld [vmem:[#allocation8 + $0x160] ss:$8 sps:$4 sm:$0xff]  }
 0x1bc   : > { %v4621_v45 = vpack.c.bf16 %v5664_v21, %v1661_v7  ;;  %v4649_v50 = vpack.c.bf16 %v5656_v18, %v1436_v19  ;;  %v1805_v35 = vpack.c.bf16 %v6520_v3, %v6470_v60  ;;  %v6534_v31 = vsel %vm2771_vm2, %v2769_v38, %v2770_v61  ;;  %v5163_v7 = vld [vmem:[#allocation8 + $0x1e4] ss:$8 sps:$4 sm:$0xff]   ;;  %v5188_v60 = vld [vmem:[#allocation8 + $0x260] ss:$8 sps:$4 sm:$0xff]   ;;  %v5193_v3 = vld [vmem:[#allocation8 + $0x254] ss:$8 sps:$4 sm:$0xff]  }
 0x1bd   : > { %v7937_v12 = vrot.slane %v5635_v0, 1  ;;  %v3333_v21 = vrot.slane %v6466_v4, 2  ;;  %v7938_v19 = vmov 0   ;;  %v5148_v38 = vld [vmem:[#allocation8 + $0x144] ss:$8 sps:$4 sm:$0xff]  }
 0x1be   : > { %4622 = vmatmul.mubr.msk.bf16.vlgmr.msra.gmra.mxu1 %vm6492_vm7, %v4621_v45  ;;  %4650 = vmatmul.mubr.msk.bf16.vlgmr.msra.gmra.mxu0 %vm4648_vm8, %v4649_v50  ;;  %v5161_v45 = vld [vmem:[#allocation8 + $0x1e0] ss:$8 sps:$4 sm:$0xff]   ;;  %v5143_v50 = vld [vmem:[#allocation8 + $0x150] ss:$8 sps:$4 sm:$0xff]  }
 0x1bf   : > { %v6540_v39 = vsel %vm2771_vm2, %v2770_v61, %v7937_v12  ;;  %2483 = vmatpush1.bf16.msra.mxu1 %v5137_v34  ;;  %1945 = vmatprep.mubr.bf16.mxu1 %v7938_v19  ;;  %v6552_v61 = vsel %vm3334_vm3, %v3332_v15, %v3333_v21  ;;  %v7939_v12 = vrot.slane %v5635_v0, 2  ;;  %v5166_v15 = vld [vmem:[#allocation8 + $0x1d4] ss:$8 sps:$4 sm:$0xff]  }
 0x1c0   : > { %2218 = vmatprep.mubr.bf16.mxu0 %v7938_v19  ;;  %2484 = vmatprep.subr.bf16.mxu1 %v5142_v41  ;;  %v7941_v41 = vpack.c.bf16 %v5723_v53, %v5695_v37  ;;  %v5173_v37 = vld [vmem:[#allocation8 + $0x1b0] ss:$8 sps:$4 sm:$0xff]   ;;  %v7942_v53 = vpack.c.bf16 %v5775_v40, %v5747_v10 }
 0x1c1   : > { %v6558_v18 = vsel %vm3334_vm3, %v3333_v21, %v7939_v12  ;;  %3046 = vmatpush1.bf16.msra.mxu0 %v5158_v14  ;;  %v7940_v21 = vpack.c.bf16 %v5719_v52, %v5691_v36  ;;  %v5169_v12 = vld [vmem:[#allocation8 + $0x1c4] ss:$8 sps:$4 sm:$0xff]   ;;  %v5146_v14 = vld [vmem:[#allocation8 + $0x140] ss:$8 sps:$4 sm:$0xff]   ;;  %v5149_v36 = vld [vmem:[#allocation8 + $0x130] ss:$8 sps:$4 sm:$0xff]  }
 0x1c2   : > { %3047 = vmatprep.subr.bf16.mxu0 %v5163_v7  ;;  %v5151_v7 = vld [vmem:[#allocation8 + $0x134] ss:$8 sps:$4 sm:$0xff]   ;;  %v5155_v40 = vld [vmem:[#allocation8 + $0x110] ss:$8 sps:$4 sm:$0xff]  }
 0x1c3   : > { %2485 = vmatpush1.bf16.msra.mxu1 %v5140_v32  ;;  %v5167_v32 = vld [vmem:[#allocation8 + $0x1c0] ss:$8 sps:$4 sm:$0xff]   ;;  %v5175_v52 = vld [vmem:[#allocation8 + $0x1b4] ss:$8 sps:$4 sm:$0xff]  }
 0x1c4   : > { %2486 = vmatprep.subr.bf16.mxu1 %v5145_v9  ;;  %v5154_v9 = vld [vmem:[#allocation8 + $0x124] ss:$8 sps:$4 sm:$0xff]  }
 0x1c5   : > { %3048 = vmatpush1.bf16.msra.mxu0 %v5161_v45  ;;  %v7943_v45 = vpack.c.bf16 %v5779_v42, %v5751_v11  ;;  %v5181_v11 = vld [vmem:[#allocation8 + $0x194] ss:$8 sps:$4 sm:$0xff]   ;;  %v5172_v42 = vld [vmem:[#allocation8 + $0x104] ss:$8 sps:$4 sm:$0xff]  }
 0x1c6   : > { %1946 = vmatmul.mubr.bf16.gmra.mxu1 %v7940_v21  ;;  %2219 = vmatmul.mubr.bf16.gmra.mxu0 %v7941_v41  ;;  %v5176_v21 = vld [vmem:[#allocation8 + $0x1a0] ss:$8 sps:$4 sm:$0xff]   ;;  %v5179_v41 = vld [vmem:[#allocation8 + $0x190] ss:$8 sps:$4 sm:$0xff]  }
 0x1c7   : > { %1955 = vmatprep.mubr.bf16.mxu1 %v7938_v19  ;;  %2228 = vmatprep.mubr.bf16.mxu0 %v7938_v19 }
 0x1c8   : > { %2487 = vmatpush1.bf16.msra.mxu1 %v5143_v50  ;;  %3049 = vmatprep.subr.bf16.mxu0 %v5166_v15  ;;  %v5152_v50 = vld [vmem:[#allocation8 + $0x120] ss:$8 sps:$4 sm:$0xff]   ;;  %v5157_v15 = vld [vmem:[#allocation8 + $0x114] ss:$8 sps:$4 sm:$0xff]  }
 0x1c9   : > { %2488 = vmatprep.subr.bf16.mxu1 %v5148_v38  ;;  %3050 = vmatpush1.bf16.msra.mxu0 %v5164_v54  ;;  %v5178_v38 = vld [vmem:[#allocation8 + $0x1a4] ss:$8 sps:$4 sm:$0xff]   ;;  %v964_v54 = vadd.s32 64, %v5633_v63 }
 0x1ca   : > { %3051 = vmatprep.subr.bf16.mxu0 %v5169_v12  ;;  %v7944_v12 = vpack.c.bf16 %v5829_v62, %v5803_v17  ;;  %v7946_v17 = vpack.c.bf16 %v5885_v30, %v5859_v44  ;;  %v7948_v62 = vpack.c.bf16 %v5943_v47, %v5911_v27  ;;  %v972_v44 = vadd.s32 128, %v5633_v63 }
 0x1cb   : > { %v1048_v10 = vand.u32 63, %v964_v54  ;;  %v7952_v27 = vpack.c.bf16 %v6053_v51, %v6027_v28  ;;  %v7955_v47 = vpack.c.bf16 %v6113_v58, %v6087_v57  ;;  %v7960_v28 = vld [vmem:[#allocation67_spill] sm:$0xff]  ;;  %v7963_v51 = vld [vmem:[#allocation77_spill] sm:$0xff] }
 0x1cc   : > { %2489 = vmatpush1.bf16.msra.mxu1 %v5146_v14  ;;  %v7945_v14 = vpack.c.bf16 %v5833_v26, %v5807_v20  ;;  %v7947_v20 = vpack.c.bf16 %v5889_v23, %v5863_v56  ;;  %v7949_v26 = vpack.c.bf16 %v5947_v55, %v5915_v22  ;;  %v7950_v23 = vpack.c.bf16 %v5999_v46, %v5971_v6  ;;  %v7956_v55 = vld [vmem:[#allocation72_spill] sm:$0xff]  ;;  %v7957_v6 = vld [vmem:[#allocation66_spill] sm:$0xff]  ;;  %v7959_v46 = vld [vmem:[#allocation73_spill] sm:$0xff] }
 0x1cd   : > { %2490 = vmatprep.subr.bf16.mxu1 %v5151_v7  ;;  %3052 = vmatpush1.bf16.msra.mxu0 %v5167_v32  ;;  %v5184_v7 = vld [vmem:[#allocation8 + $0x184] ss:$8 sps:$4 sm:$0xff]   ;;  %vm1670_vm9 = vcmp.ge.s32.totalorder %v1048_v10, 1  ;;  %vm1445_vm10 = vcmp.ge.s32.totalorder %v1048_v10, 2  ;;  %v5170_v32 = vld [vmem:[#allocation8 + $0x100] ss:$8 sps:$4 sm:$0xff]   ;;  %v7951_v56 = vpack.c.bf16 %v6003_v1, %v5975_v16  ;;  %v7953_v22 = vpack.c.bf16 %v6057_v49, %v6031_v29 }
 0x1ce   : > { %1956 = vmatmul.mubr.bf16.gmra.mxu1 %v7942_v53  ;;  %2229 = vmatmul.mubr.bf16.gmra.mxu0 %v7943_v45  ;;  %vm4623_vm11 = vmpackc.low %vm5416_vm6, %vm1670_vm9  ;;  %v1104_v30 = vand.u32 63, %v972_v44  ;;  %v7954_v1 = vpack.c.bf16 %v6109_v43, %v6083_v8  ;;  %v7958_v16 = vpack.c.bf16 %v7956_v55, %v7957_v6  ;;  %v7961_v29 = vpack.c.bf16 %v7959_v46, %v7960_v28  ;;  %v7962_v8 = vld [vmem:[#allocation82_spill] sm:$0xff]  ;;  %v7965_v58 = vld [vmem:[#allocation83_spill] sm:$0xff] }
 0x1cf   : > { %1965 = vmatprep.mubr.bf16.mxu1 %v7938_v19  ;;  %2238 = vmatprep.mubr.bf16.mxu0 %v7938_v19  ;;  %vm4651_vm12 = vmpackc.low %vm5416_vm6, %vm1445_vm10  ;;  %v7964_v57 = vpack.c.bf16 %v7962_v8, %v7963_v51  ;;  %v7966_v49 = vld [vmem:[#allocation78_spill] sm:$0xff]  ;;  %v7968_v53 = vld [vmem:[#allocation92_spill] sm:$0xff] }
 0x1d0   : > { %2491 = vmatpush1.bf16.msra.mxu1 %v5149_v36  ;;  %3053 = vmatprep.subr.bf16.mxu0 %v5175_v52  ;;  %v5182_v36 = vld [vmem:[#allocation8 + $0x180] ss:$8 sps:$4 sm:$0xff]   ;;  %v5187_v52 = vld [vmem:[#allocation8 + $0x274] ss:$8 sps:$4 sm:$0xff]   ;;  %vm1678_vm13 = vcmp.ge.s32.totalorder %v1104_v30, 1  ;;  %vm1453_vm14 = vcmp.ge.s32.totalorder %v1104_v30, 2  ;;  %v7967_v43 = vpack.c.bf16 %v7965_v58, %v7966_v49 }
 0x1d1   : > { %2492 = vmatprep.subr.bf16.mxu1 %v5154_v9  ;;  %3054 = vmatpush1.bf16.msra.mxu0 %v5173_v37  ;;  %vm4626_vm15 = vmpackc.low %vm5416_vm6, %vm1678_vm13  ;;  %v980_v9 = vadd.s32 192, %v5633_v63  ;;  %v7969_v45 = vld [vmem:[#allocation87_spill] sm:$0xff]  ;;  %v7971_v54 = vld [vmem:[#allocation93_spill] sm:$0xff] }
 0x1d2   : > { %3055 = vmatprep.subr.bf16.mxu0 %v5178_v38  ;;  %vm4654_vm0 = vmpackc.low %vm5416_vm6, %vm1453_vm14  ;;  %v7970_v38 = vpack.c.bf16 %v7968_v53, %v7969_v45  ;;  %v7975_v10 = vld [vmem:[#allocation98_spill] sm:$0xff]  ;;  %v7995_v44 = vld [vmem:[#allocation15_spill] sm:$0xff] }
 0x1d3   : > { %v1160_v37 = vand.u32 63, %v980_v9  ;;  %v7997_v30 = vld [vmem:[#allocation25_spill] sm:$0xff]  ;;  %v5199_v55 = vld [vmem:[#allocation8 + $0x234] ss:$8 sps:$4 sm:$0xff]   ;;  %v5203_v9 = vld [vmem:[#allocation8 + $0x210] ss:$8 sps:$4 sm:$0xff]  }
 0x1d4   : > { %2493 = vmatpush1.bf16.msra.mxu1 %v5152_v50  ;;  %v7972_v50 = vld [vmem:[#allocation88_spill] sm:$0xff]  ;;  %v5202_v46 = vld [vmem:[#allocation8 + $0x224] ss:$8 sps:$4 sm:$0xff]   ;;  %v8003_v51 = vld [vmem:[#allocation31_spill] sm:$0xff] }
 0x1d5   : > { %2494 = vmatprep.subr.bf16.mxu1 %v5157_v15  ;;  %3056 = vmatpush1.bf16.msra.mxu0 %v5176_v21  ;;  %v7973_v15 = vpack.c.bf16 %v7971_v54, %v7972_v50  ;;  %vm1686_vm1 = vcmp.ge.s32.totalorder %v1160_v37, 1  ;;  %vm1461_vm2 = vcmp.ge.s32.totalorder %v1160_v37, 2  ;;  %v7974_v21 = vld [vmem:[#allocation101_spill] sm:$0xff]  ;;  %v8000_v28 = vld [vmem:[#allocation24_spill] sm:$0xff]  ;;  %v8006_v53 = vld [vmem:[#allocation30_spill] sm:$0xff] }
 0x1d6   : > { %1966 = vmatmul.mubr.bf16.gmra.mxu1 %v7944_v12  ;;  %2239 = vmatmul.mubr.bf16.gmra.mxu0 %v7945_v14  ;;  %vm4629_vm3 = vmpackc.low %vm5416_vm6, %vm1686_vm1  ;;  %v7980_v12 = vld [vmem:[#allocation107_spill] sm:$0xff]  ;;  %v5200_v49 = vld [vmem:[#allocation8 + $0x220] ss:$8 sps:$4 sm:$0xff]  }
 0x1d7   : > { %1975 = vmatprep.mubr.bf16.mxu1 %v7938_v19  ;;  %2248 = vmatprep.mubr.bf16.mxu0 %v7938_v19  ;;  %vm4657_vm4 = vmpackc.low %vm5416_vm6, %vm1461_vm2  ;;  %v7981_v14 = vpack.c.bf16 %v6387_v2, %v7980_v12  ;;  %v7988_v2 = vpack.c.bf16 %v6524_v5, %v6474_v59  ;;  %v5191_v59 = vld [vmem:[#allocation8 + $0x250] ss:$8 sps:$4 sm:$0xff]   ;;  %v5196_v5 = vld [vmem:[#allocation8 + $0x244] ss:$8 sps:$4 sm:$0xff]  }
 0x1d8   : > { %2495 = vmatpush1.bf16.msra.mxu1 %v5155_v40  ;;  %3057 = vmatprep.subr.bf16.mxu0 %v5181_v11  ;;  %v7976_v40 = vpack.c.bf16 %v7974_v21, %v7975_v10  ;;  %v7977_v11 = vld [vmem:[#allocation102_spill] sm:$0xff]  ;;  %v8007_v45 = vld [vmem:[#allocation27_spill] sm:$0xff]  ;;  %v8009_v54 = vld [vmem:[#allocation36_spill] sm:$0xff] }
 0x1d9   : > { %2496 = vmatprep.subr.bf16.mxu1 %v5172_v42  ;;  %3058 = vmatpush1.bf16.msra.mxu0 %v5179_v41  ;;  %v7978_v42 = vld [vmem:[#allocation96_spill] sm:$0xff]  ;;  %v5208_v37 = vld [vmem:[#allocation8 + $0x204] ss:$8 sps:$4 sm:$0xff]   ;;  %v5206_v21 = vld [vmem:[#allocation8 + $0x200] ss:$8 sps:$4 sm:$0xff]  }
 0x1da   : > { %3059 = vmatprep.subr.bf16.mxu0 %v5184_v7  ;;  %v7979_v41 = vpack.c.bf16 %v7977_v11, %v7978_v42  ;;  %v7982_v7 = vld [vmem:[#allocation108_spill] sm:$0xff]  ;;  %v8010_v50 = vld [vmem:[#allocation34_spill] sm:$0xff]  ;;  %v8012_v10 = vld [vmem:[#allocation35_spill] sm:$0xff] }
 0x1db   : > { %v8015_v42 = vld [vmem:[#allocation42_spill] sm:$0xff] }
 0x1dc   : > { %2497 = vmatpush1.bf16.msra.mxu1 %v5170_v32  ;;  %v7983_v32 = vpack.c.bf16 %v6391_v24, %v7982_v7  ;;  %v5185_v24 = vld [vmem:[#allocation8 + $0x270] ss:$8 sps:$4 sm:$0xff]  }
 0x1dd   : > { %3060 = vmatpush1.bf16.msra.mxu0 %v5182_v36  ;;  %3608 = vmatprep.subr.bf16.mxu1 %v5187_v52  ;;  %v7984_v36 = vpack.c.bf16 %v6442_v25, %v6412_v48  ;;  %v7985_v52 = vld [vmem:[#allocation118_spill] sm:$0xff]  ;;  %v8019_v7 = vld [vmem:[#allocation39_spill] sm:$0xff] }
 0x1de   : > { %4625 = vmatmul.mubr.msk.bf16.gmra.mxu1 %vm4623_vm11, %v7946_v17  ;;  %4653 = vmatmul.mubr.msk.bf16.gmra.mxu0 %vm4651_vm12, %v7947_v20  ;;  %v7986_v17 = vld [vmem:[#allocation114_spill] sm:$0xff] }
 0x1df   : > { %1985 = vmatprep.mubr.bf16.mxu1 %v7938_v19  ;;  %2258 = vmatprep.mubr.bf16.mxu0 %v7938_v19  ;;  %v7987_v20 = vpack.c.bf16 %v7985_v52, %v7986_v17  ;;  %v5190_v48 = vld [vmem:[#allocation8 + $0x264] ss:$8 sps:$4 sm:$0xff]  }
 0x1e0   : > { %v7989_v25 = vld [vmem:[#allocation14_spill] sm:$0xff] }
 0x1e1   : > { %v8022_v52 = vld [vmem:[#allocation46_spill] sm:$0xff] }
 0x1e6   : > { %1986 = vmatmul.mubr.bf16.gmra.mxu1 %v7948_v62  ;;  %2259 = vmatmul.mubr.bf16.gmra.mxu0 %v7949_v26  ;;  %v7990_v62 = vpack.c.bf16 %v7989_v25, %v5635_v0  ;;  %v7991_v26 = vld [vmem:[#allocation19_spill] sm:$0xff] }
 0x1e7   : > { %1995 = vmatprep.mubr.bf16.mxu1 %v7938_v19  ;;  %2268 = vmatprep.mubr.bf16.mxu0 %v7938_v19 }
 0x1ee   : > { %1996 = vmatmul.mubr.bf16.gmra.mxu1 %v7950_v23  ;;  %2269 = vmatmul.mubr.bf16.gmra.mxu0 %v7951_v56  ;;  %v7992_v23 = vld [vmem:[#allocation17_spill] sm:$0xff] }
 0x1ef   : > { %2005 = vmatprep.mubr.bf16.mxu1 %v7938_v19  ;;  %2278 = vmatprep.mubr.bf16.mxu0 %v7938_v19  ;;  %v7993_v56 = vpack.c.bf16 %v7991_v26, %v7992_v23  ;;  %v8028_v26 = vld [vmem:[#allocation52_spill] sm:$0xff] }
 0x1f6   : > { %2006 = vmatmul.mubr.bf16.gmra.mxu1 %v7952_v27  ;;  %2279 = vmatmul.mubr.bf16.gmra.mxu0 %v7953_v22  ;;  %v7998_v27 = vld [vmem:[#allocation22_spill] sm:$0xff] }
 0x1f7   : > { %2015 = vmatprep.mubr.bf16.mxu1 %v7938_v19  ;;  %2288 = vmatprep.mubr.bf16.mxu0 %v7938_v19  ;;  %v7999_v22 = vpack.c.bf16 %v7997_v30, %v7998_v27  ;;  %v8036_v30 = vld [vmem:[#allocation59_spill] sm:$0xff]  ;;  %v8037_v27 = vld [vmem:[#allocation57_spill] sm:$0xff] }
 0x1fe   : > { %4628 = vmatmul.mubr.msk.bf16.gmra.mxu1 %vm4626_vm15, %v7954_v1  ;;  %4656 = vmatmul.mubr.msk.bf16.gmra.mxu0 %vm4654_vm0, %v7955_v47  ;;  %v6709_v1 = vadd.s32 56, %v5633_v63  ;;  %v5194_v47 = vld [vmem:[#allocation8 + $0x240] ss:$8 sps:$4 sm:$0xff]  }
 0x1ff   : > { %2025 = vmatprep.mubr.bf16.mxu1 %v7938_v19  ;;  %2298 = vmatprep.mubr.bf16.mxu0 %v7938_v19 }
 0x200   : > { %v1041_v6 = vand.u32 63, %v6709_v1 }
 0x202   : > { %vm2811_vm5 = vcmp.lt.s32.totalorder %v1041_v6, 63  ;;  %vm3374_vm14 = vcmp.lt.s32.totalorder %v1041_v6, 62 }
 0x203   : > { %vm4692_vm7 = vmpackc.low %vm2811_vm5, %vm5416_vm6 }
 0x204   : > { %vm4720_vm15 = vmpackc.low %vm3374_vm14, %vm5416_vm6 }
 0x206   : > { %2026 = vmatmul.mubr.bf16.gmra.mxu1 %v7958_v16  ;;  %2299 = vmatmul.mubr.bf16.gmra.mxu0 %v7961_v29  ;;  %v5197_v16 = vld [vmem:[#allocation8 + $0x230] ss:$8 sps:$4 sm:$0xff]   ;;  %v8001_v29 = vld [vmem:[#allocation21_spill] sm:$0xff] }
 0x207   : > { %2035 = vmatprep.mubr.bf16.mxu1 %v7938_v19  ;;  %2308 = vmatprep.mubr.bf16.mxu0 %v7938_v19  ;;  %v8002_v8 = vpack.c.bf16 %v8000_v28, %v8001_v29 }
 0x20e   : > { %2036 = vmatmul.mubr.bf16.gmra.mxu1 %v7964_v57  ;;  %2309 = vmatmul.mubr.bf16.gmra.mxu0 %v7967_v43  ;;  %v8004_v57 = vld [vmem:[#allocation28_spill] sm:$0xff] }
 0x20f   : > { %2045 = vmatprep.mubr.bf16.mxu1 %v7938_v19  ;;  %2318 = vmatprep.mubr.bf16.mxu0 %v7938_v19  ;;  %v8005_v58 = vpack.c.bf16 %v8003_v51, %v8004_v57  ;;  %v5205_v43 = vld [vmem:[#allocation8 + $0x214] ss:$8 sps:$4 sm:$0xff]  }
 0x216   : > { %2046 = vmatmul.mubr.bf16.gmra.mxu1 %v7970_v38  ;;  %2319 = vmatmul.mubr.bf16.gmra.mxu0 %v7973_v15  ;;  %v8008_v38 = vpack.c.bf16 %v8006_v53, %v8007_v45  ;;  %v8011_v15 = vpack.c.bf16 %v8009_v54, %v8010_v50  ;;  %v8042_v45 = vld [vmem:[#allocation65_spill] sm:$0xff]  ;;  %v8045_v50 = vld [vmem:[#allocation79_spill] sm:$0xff] }
 0x217   : > { %2055 = vmatprep.mubr.bf16.mxu1 %v7938_v19  ;;  %2328 = vmatprep.mubr.bf16.mxu0 %v7938_v19 }
 0x21e   : > { %4631 = vmatmul.mubr.msk.bf16.gmra.mxu1 %vm4629_vm3, %v7976_v40  ;;  %4659 = vmatmul.mubr.msk.bf16.gmra.mxu0 %vm4657_vm4, %v7979_v41  ;;  %v8013_v40 = vld [vmem:[#allocation33_spill] sm:$0xff]  ;;  %v8016_v41 = vld [vmem:[#allocation40_spill] sm:$0xff] }
 0x21f   : > { %2065 = vmatprep.mubr.bf16.mxu1 %v7938_v19  ;;  %2338 = vmatprep.mubr.bf16.mxu0 %v7938_v19  ;;  %v8014_v11 = vpack.c.bf16 %v8012_v10, %v8013_v40  ;;  %v8017_v12 = vpack.c.bf16 %v8015_v42, %v8016_v41  ;;  %v6797_v42 = vadd.s32 184, %v5633_v63 }
 0x226   : > { %2066 = vmatmul.mubr.bf16.gmra.mxu1 %v7981_v14  ;;  %2339 = vmatmul.mubr.bf16.gmra.mxu0 %v7983_v32  ;;  %v8018_v14 = vld [vmem:[#allocation41_spill] sm:$0xff] }
 0x227   : > { %2075 = vmatprep.mubr.bf16.mxu1 %v7938_v19  ;;  %2348 = vmatprep.mubr.bf16.mxu0 %v7938_v19  ;;  %v8020_v32 = vpack.c.bf16 %v8018_v14, %v8019_v7 }
 0x22e   : > { %2076 = vmatmul.mubr.bf16.gmra.mxu1 %v7984_v36  ;;  %2349 = vmatmul.mubr.bf16.gmra.mxu0 %v7987_v20  ;;  %v8021_v36 = vld [vmem:[#allocation49_spill] sm:$0xff]  ;;  %v6748_v20 = vadd.s32 120, %v5633_v63 }
 0x22f   : > { %2085 = vmatprep.mubr.bf16.mxu1 %v7938_v19  ;;  %2358 = vmatprep.mubr.bf16.mxu0 %v7938_v19  ;;  %v8023_v17 = vpack.c.bf16 %v8021_v36, %v8022_v52  ;;  %v7804_v52 = vand.u32 63, %v6797_v42 }
 0x231   : > { %vm2827_vm10 = vcmp.lt.s32.totalorder %v7804_v52, 63 }
 0x232   : > { %vm4698_vm11 = vmpackc.low %vm2827_vm10, %vm5416_vm6 }
 0x236   : > { %2086 = vmatmul.mubr.bf16.gmra.mxu1 %v1805_v35  ;;  %2359 = vmatmul.mubr.bf16.gmra.mxu0 %v7988_v2  ;;  %v7994_v35 = vld [vmem:[#allocation16_spill] sm:$0xff]  ;;  %v7805_v2 = vand.u32 63, %v6748_v20 }
 0x237   : > { %2514 = vmatprep.mubr.bf16.mxu1 %v7938_v19  ;;  %3077 = vmatprep.mubr.bf16.mxu0 %v7938_v19  ;;  %v7996_v0 = vpack.c.bf16 %v7994_v35, %v7995_v44 }
 0x238   : > { %vm2819_vm8 = vcmp.lt.s32.totalorder %v7805_v2, 63 }
 0x239   : > { %vm4695_vm9 = vmpackc.low %vm2819_vm8, %vm5416_vm6 }
 0x23e   : > { %2515 = vmatmul.mubr.bf16.vlgmr.msra.gmra.mxu1 %v7990_v62  ;;  %3078 = vmatmul.mubr.bf16.vlgmr.msra.gmra.mxu0 %v7993_v56  ;;  %v8027_v62 = vld [vmem:[#allocation55_spill] sm:$0xff]  ;;  %v8030_v56 = vld [vmem:[#allocation54_spill] sm:$0xff] }
 0x23f   : > { %3609 = vmatpush1.bf16.msra.mxu1 %v5185_v24  ;;  %2524 = vmatprep.mubr.bf16.mxu1 %v7938_v19  ;;  %v8024_v24 = vld [vmem:[#allocation48_spill] sm:$0xff]  ;;  %v8029_v23 = vpack.c.bf16 %v8027_v62, %v8028_v26  ;;  %v8049_v62 = vld [vmem:[#allocation71_spill] sm:$0xff] }
 0x240   : > { %3087 = vmatprep.mubr.bf16.mxu0 %v7938_v19  ;;  %3610 = vmatprep.subr.bf16.mxu1 %v5190_v48  ;;  %v8025_v48 = vld [vmem:[#allocation45_spill] sm:$0xff] }
 0x241   : > { %v8026_v25 = vpack.c.bf16 %v8024_v24, %v8025_v48 }
 0x243   : > { %3611 = vmatpush1.bf16.msra.mxu1 %v5188_v60  ;;  %v8031_v60 = vld [vmem:[#allocation51_spill] sm:$0xff] }
 0x244   : > { %3612 = vmatprep.subr.bf16.mxu1 %v5193_v3  ;;  %v8032_v3 = vpack.c.bf16 %v8030_v56, %v8031_v60  ;;  %v8052_v56 = vld [vmem:[#allocation84_spill] sm:$0xff] }
 0x246   : > { %2525 = vmatmul.mubr.bf16.gmra.mxu1 %v7996_v0  ;;  %3088 = vmatmul.mubr.bf16.gmra.mxu0 %v7999_v22  ;;  %v8038_v22 = vpack.c.bf16 %v8036_v30, %v8037_v27 }
 0x247   : > { %2534 = vmatprep.mubr.bf16.mxu1 %v7938_v19  ;;  %3097 = vmatprep.mubr.bf16.mxu0 %v7938_v19 }
 0x248   : > { %3613 = vmatpush1.bf16.msra.mxu1 %v5191_v59  ;;  %v8033_v59 = vld [vmem:[#allocation60_spill] sm:$0xff] }
 0x249   : > { %3614 = vmatprep.subr.bf16.mxu1 %v5196_v5  ;;  %v8034_v5 = vld [vmem:[#allocation58_spill] sm:$0xff] }
 0x24a   : > { %v8035_v35 = vpack.c.bf16 %v8033_v59, %v8034_v5 }
 0x24c   : > { %3615 = vmatpush1.bf16.msra.mxu1 %v5194_v47  ;;  %v8039_v47 = vld [vmem:[#allocation68_spill] sm:$0xff] }
 0x24d   : > { %3616 = vmatprep.subr.bf16.mxu1 %v5199_v55  ;;  %v8040_v55 = vld [vmem:[#allocation64_spill] sm:$0xff] }
 0x24e   : > { %2535 = vmatmul.mubr.bf16.gmra.mxu1 %v8002_v8  ;;  %3098 = vmatmul.mubr.bf16.gmra.mxu0 %v8005_v58 }
 0x24f   : > { %2544 = vmatprep.mubr.bf16.mxu1 %v7938_v19  ;;  %3107 = vmatprep.mubr.bf16.mxu0 %v7938_v19 }
 0x250   : > { %3617 = vmatpush1.bf16.msra.mxu1 %v5197_v16  ;;  %v8041_v16 = vpack.c.bf16 %v8039_v47, %v8040_v55 }
 0x251   : > { %3618 = vmatprep.subr.bf16.mxu1 %v5202_v46 }
 0x254   : > { %3619 = vmatpush1.bf16.msra.mxu1 %v5200_v49 }
 0x255   : > { %3620 = vmatprep.subr.bf16.mxu1 %v5205_v43 }
 0x256   : > { %2545 = vmatmul.mubr.bf16.gmra.mxu1 %v8008_v38  ;;  %4694 = vmatmul.mubr.msk.bf16.gmra.mxu0 %vm4692_vm7, %v8011_v15  ;;  %v8043_v38 = vld [vmem:[#allocation63_spill] sm:$0xff]  ;;  %v8046_v15 = vld [vmem:[#allocation74_spill] sm:$0xff] }
 0x257   : > { %2554 = vmatprep.mubr.bf16.mxu1 %v7938_v19  ;;  %3117 = vmatprep.mubr.bf16.mxu0 %v7938_v19  ;;  %v8044_v54 = vpack.c.bf16 %v8042_v45, %v8043_v38 }
 0x258   : > { %3621 = vmatpush1.bf16.msra.mxu1 %v5203_v9 }
 0x259   : > { %3622 = vmatprep.subr.bf16.mxu1 %v5208_v37 }
 0x25c   : > { %3623 = vmatpush1.bf16.msra.mxu1 %v5206_v21  ;;  %v8047_v21 = vpack.c.bf16 %v8045_v50, %v8046_v15 }
 0x25e   : > { %2555 = vmatmul.mubr.bf16.gmra.mxu1 %v8014_v11  ;;  %3118 = vmatmul.mubr.bf16.gmra.mxu0 %v8017_v12 }
 0x25f   : > { %2564 = vmatprep.mubr.bf16.mxu1 %v7938_v19  ;;  %3127 = vmatprep.mubr.bf16.mxu0 %v7938_v19 }
 0x266   : > { %2565 = vmatmul.mubr.bf16.gmra.mxu1 %v8020_v32  ;;  %3128 = vmatmul.mubr.bf16.gmra.mxu0 %v8023_v17 }
 0x267   : > { %2574 = vmatprep.mubr.bf16.mxu1 %v7938_v19  ;;  %3137 = vmatprep.mubr.bf16.mxu0 %v7938_v19 }
 0x26e   : > { %2575 = vmatmul.mubr.bf16.gmra.mxu1 %v8026_v25  ;;  %3138 = vmatmul.mubr.bf16.gmra.mxu0 %v8029_v23  ;;  %v8048_v25 = vld [vmem:[#allocation76_spill] sm:$0xff]  ;;  %v8051_v23 = vld [vmem:[#allocation89_spill] sm:$0xff] }
 0x26f   : > { %2584 = vmatprep.mubr.bf16.mxu1 %v7938_v19  ;;  %3147 = vmatprep.mubr.bf16.mxu0 %v7938_v19  ;;  %v8050_v26 = vpack.c.bf16 %v8048_v25, %v8049_v62  ;;  %v8053_v60 = vpack.c.bf16 %v8051_v23, %v8052_v56  ;;  %v8064_v25 = vld [vmem:[#allocation104_spill] sm:$0xff] }
 0x276   : > { %2585 = vmatmul.mubr.bf16.gmra.mxu1 %v8032_v3  ;;  %4697 = vmatmul.mubr.msk.bf16.gmra.mxu0 %vm4695_vm9, %v8035_v35 }
 0x277   : > { %2594 = vmatprep.mubr.bf16.mxu1 %v7938_v19  ;;  %3157 = vmatprep.mubr.bf16.mxu0 %v7938_v19 }
 0x27e   : > { %v1937_v44 = vpop.f32.mrf.mxu1  ;;  %v2210_v0 = vpop.f32.mrf.mxu0  ;;  %2595 = vmatmul.mubr.bf16.gmra.mxu1 %v8038_v22  ;;  %3158 = vmatmul.mubr.bf16.gmra.mxu0 %v8041_v16 }
 0x27f   : > { %v6776_v46 = vadd.f32 %v2210_v0, %v1937_v44  ;;  %2604 = vmatprep.mubr.bf16.mxu1 %v7938_v19  ;;  %3167 = vmatprep.mubr.bf16.mxu0 %v7938_v19 }
 0x280   : > { %v1939_v28 = vpop.f32.mrf.mxu1  ;;  %v2212_v29 = vpop.f32.mrf.mxu0 }
 0x281   : > { %v6780_v8 = vadd.f32 %v2212_v29, %v1939_v28  ;;  %v8054_v28 = vld [vmem:[#allocation86_spill] sm:$0xff]  ;;  %v8055_v29 = vld [vmem:[#allocation81_spill] sm:$0xff] }
 0x282   : > { %v1941_v51 = vpop.f32.mrf.mxu1  ;;  %v2214_v57 = vpop.f32.mrf.mxu0 }
 0x283   : > { %v6782_v58 = vadd.f32 %v2214_v57, %v1941_v51  ;;  %v8056_v51 = vpack.c.bf16 %v8054_v28, %v8055_v29  ;;  %v8057_v57 = vld [vmem:[#allocation97_spill] sm:$0xff]  ;;  %v8067_v29 = vld [vmem:[#allocation103_spill] sm:$0xff] }
 0x284   : > { %v1943_v49 = vpop.f32.mrf.mxu1  ;;  %v2216_v43 = vpop.f32.mrf.mxu0  ;;  %v8066_v28 = vld [vmem:[#allocation105_spill] sm:$0xff] }
 0x285   : > { %v6784_v9 = vadd.f32 %v2216_v43, %v1943_v49  ;;  %v8058_v49 = vld [vmem:[#allocation94_spill] sm:$0xff] }
 0x286   : > { %v1947_v37 = vpop.f32.mrf.mxu1  ;;  %v2220_v53 = vpop.f32.mrf.mxu0  ;;  %2605 = vmatmul.mubr.bf16.gmra.mxu1 %v8044_v54  ;;  %3168 = vmatmul.mubr.bf16.gmra.mxu0 %v8047_v21  ;;  %v8059_v43 = vpack.c.bf16 %v8057_v57, %v8058_v49  ;;  %v8069_v57 = vld [vmem:[#allocation115_spill] sm:$0xff]  ;;  %v8070_v49 = vld [vmem:[#allocation112_spill] sm:$0xff] }
 0x287   : > { %v6792_v10 = vadd.f32 %v2220_v53, %v1947_v37  ;;  %2614 = vmatprep.mubr.bf16.mxu1 %v7938_v19  ;;  %3177 = vmatprep.mubr.bf16.mxu0 %v7938_v19 }
 0x288   : > { %v1949_v40 = vpop.f32.mrf.mxu1  ;;  %v2222_v11 = vpop.f32.mrf.mxu0 }
 0x289   : > { %v6799_v41 = vadd.f32 %v2222_v11, %v1949_v40 }
 0x28a   : > { %v1951_v12 = vpop.f32.mrf.mxu1  ;;  %v2224_v14 = vpop.f32.mrf.mxu0 }
 0x28b   : > { %v6801_v7 = vadd.f32 %v2224_v14, %v1951_v12 }
 0x28c   : > { %v1953_v32 = vpop.f32.mrf.mxu1  ;;  %v2226_v36 = vpop.f32.mrf.mxu0 }
 0x28d   : > { %v6804_v17 = vadd.f32 %v2226_v36, %v1953_v32  ;;  %v8060_v32 = vld [vmem:[#allocation95_spill] sm:$0xff] }
 0x28e   : > { %v1957_v24 = vpop.f32.mrf.mxu1  ;;  %v2230_v48 = vpop.f32.mrf.mxu0  ;;  %2615 = vmatmul.mubr.bf16.gmra.mxu1 %v8050_v26  ;;  %3178 = vmatmul.mubr.bf16.gmra.mxu0 %v8053_v60  ;;  %v8061_v36 = vld [vmem:[#allocation91_spill] sm:$0xff] }
 0x28f   : > { %v6812_v3 = vadd.f32 %v2230_v48, %v1957_v24  ;;  %2624 = vmatprep.mubr.bf16.mxu1 %v7938_v19  ;;  %3187 = vmatprep.mubr.bf16.mxu0 %v7938_v19  ;;  %v8062_v24 = vpack.c.bf16 %v8060_v32, %v8061_v36  ;;  %v8063_v48 = vld [vmem:[#allocation109_spill] sm:$0xff] }
 0x290   : > { %v1959_v59 = vpop.f32.mrf.mxu1  ;;  %v2232_v5 = vpop.f32.mrf.mxu0  ;;  %v8065_v62 = vpack.c.bf16 %v8063_v48, %v8064_v25 }
 0x291   : > { %v6818_v35 = vadd.f32 %v2232_v5, %v1959_v59 }
 0x292   : > { %v1961_v44 = vpop.f32.mrf.mxu1  ;;  %v2234_v0 = vpop.f32.mrf.mxu0 }
 0x293   : > { %v6820_v30 = vadd.f32 %v2234_v0, %v1961_v44 }
 0x294   : > { %v1963_v27 = vpop.f32.mrf.mxu1  ;;  %v2236_v22 = vpop.f32.mrf.mxu0 }
 0x295   : > { %v6823_v47 = vadd.f32 %v2236_v22, %v1963_v27 }
 0x296   : > { %v1967_v55 = vpop.f32.mrf.mxu1  ;;  %v2240_v16 = vpop.f32.mrf.mxu0  ;;  %2625 = vmatmul.mubr.bf16.gmra.mxu1 %v8056_v51  ;;  %4700 = vmatmul.mubr.msk.bf16.gmra.mxu0 %vm4698_vm11, %v8059_v43  ;;  %v8068_v51 = vpack.c.bf16 %v8066_v28, %v8067_v29  ;;  %v8071_v43 = vpack.c.bf16 %v8069_v57, %v8070_v49 }
 0x297   : > { %v6831_v37 = vadd.f32 %v2240_v16, %v1967_v55  ;;  %2634 = vmatprep.mubr.bf16.mxu1 %v7938_v19  ;;  %3197 = vmatprep.mubr.bf16.mxu0 %v7938_v19 }
 0x298   : > { %v1969_v53 = vpop.f32.mrf.mxu1  ;;  %v2242_v45 = vpop.f32.mrf.mxu0 }
 0x299   : > { %v6835_v38 = vadd.f32 %v2242_v45, %v1969_v53 }
 0x29a   : > { %v1971_v54 = vpop.f32.mrf.mxu1  ;;  %v2244_v50 = vpop.f32.mrf.mxu0 }
 0x29b   : > { %v6837_v15 = vadd.f32 %v2244_v50, %v1971_v54  ;;  %v6868_v50 = vadd.s32 248, %v5633_v63  ;;  %v8096_v63 = vld [vmem:[#allocation38_spill] sm:$0xff] }
 0x29c   : > { %v1973_v21 = vpop.f32.mrf.mxu1  ;;  %v2246_v40 = vpop.f32.mrf.mxu0 }
 0x29d   : > { %v6839_v11 = vadd.f32 %v2246_v40, %v1973_v21 }
 0x29e   : > { %v1977_v12 = vpop.f32.mrf.mxu1  ;;  %v2250_v14 = vpop.f32.mrf.mxu0  ;;  %2635 = vmatmul.mubr.bf16.gmra.mxu1 %v8062_v24  ;;  %3198 = vmatmul.mubr.bf16.gmra.mxu0 %v8065_v62  ;;  %v7803_v24 = vand.u32 63, %v6868_v50 }
 0x29f   : > { %v6847_v26 = vadd.f32 %v2250_v14, %v1977_v12  ;;  %2644 = vmatprep.mubr.bf16.mxu1 %v7938_v19  ;;  %3207 = vmatprep.mubr.bf16.mxu0 %v7938_v19 }
 0x2a0   : > { %v1979_v23 = vpop.f32.mrf.mxu1  ;;  %v2252_v56 = vpop.f32.mrf.mxu0  ;;  %vm2835_vm12 = vcmp.lt.s32.totalorder %v7803_v24, 63 }
 0x2a1   : > { %v6851_v60 = vadd.f32 %v2252_v56, %v1979_v23  ;;  %v8072_v23 = vld [vmem:[#allocation113_spill] sm:$0xff]  ;;  %v8073_v56 = vld [vmem:[#allocation111_spill] sm:$0xff]  ;;  %vm4701_vm13 = vmpackc.low %vm2835_vm12, %vm5416_vm6 }
 0x2a2   : > { %v1981_v59 = vpop.f32.mrf.mxu1  ;;  %v2254_v5 = vpop.f32.mrf.mxu0 }
 0x2a3   : > { %v6853_v44 = vadd.f32 %v2254_v5, %v1981_v59  ;;  %v8074_v59 = vpack.c.bf16 %v8072_v23, %v8073_v56  ;;  %v8075_v5 = vld [vmem:[#allocation121_spill] sm:$0xff] }
 0x2a4   : > { %v1983_v0 = vpop.f32.mrf.mxu1  ;;  %v2256_v27 = vpop.f32.mrf.mxu0 }
 0x2a5   : > { %v6855_v22 = vadd.f32 %v2256_v27, %v1983_v0  ;;  %v8076_v0 = vld [vmem:[#allocation119_spill] sm:$0xff] }
 0x2a6   : > { %v1987_v55 = vpop.f32.mrf.mxu1  ;;  %v2260_v16 = vpop.f32.mrf.mxu0  ;;  %2645 = vmatmul.mubr.bf16.gmra.mxu1 %v8068_v51  ;;  %3208 = vmatmul.mubr.bf16.gmra.mxu0 %v8071_v43  ;;  %v8077_v27 = vpack.c.bf16 %v8075_v5, %v8076_v0 }
 0x2a7   : > { %v6863_v53 = vadd.f32 %v2260_v16, %v1987_v55  ;;  %2654 = vmatprep.mubr.bf16.mxu1 %v7938_v19  ;;  %3217 = vmatprep.mubr.bf16.mxu0 %v7938_v19 }
 0x2a8   : > { %v1989_v45 = vpop.f32.mrf.mxu1  ;;  %v2262_v54 = vpop.f32.mrf.mxu0 }
 0x2a9   : > { %v6870_v21 = vadd.f32 %v2262_v54, %v1989_v45 }
 0x2aa   : > { %v1991_v40 = vpop.f32.mrf.mxu1  ;;  %v2264_v12 = vpop.f32.mrf.mxu0 }
 0x2ab   : > { %v6872_v14 = vadd.f32 %v2264_v12, %v1991_v40 }
 0x2ac   : > { %v1993_v32 = vpop.f32.mrf.mxu1  ;;  %v2266_v36 = vpop.f32.mrf.mxu0 }
 0x2ad   : > { %v6875_v48 = vadd.f32 %v2266_v36, %v1993_v32  ;;  %v8078_v32 = vld [vmem:[#allocation117_spill] sm:$0xff] }
 0x2ae   : > { %v1997_v25 = vpop.f32.mrf.mxu1  ;;  %v2270_v62 = vpop.f32.mrf.mxu0  ;;  %2655 = vmatmul.mubr.bf16.gmra.mxu1 %v8074_v59  ;;  %3218 = vmatmul.mubr.bf16.gmra.mxu0 %v8077_v27  ;;  %v8079_v36 = vpack.c.bf16 %v6466_v4, %v8078_v32 }
 0x2af   : > { %v6883_v55 = vadd.f32 %v2270_v62, %v1997_v25  ;;  %2664 = vmatprep.mubr.bf16.mxu1 %v7938_v19  ;;  %3227 = vmatprep.mubr.bf16.mxu0 %v7938_v19  ;;  %v8080_v25 = vpack.c.bf16 %v6540_v39, %v6534_v31  ;;  %v8081_v31 = vld [vmem:[#allocation20_spill] sm:$0xff]  ;;  %v8082_v39 = vld [vmem:[#allocation18_spill] sm:$0xff] }
 0x2b0   : > { %v1999_v16 = vpop.f32.mrf.mxu1  ;;  %v2272_v28 = vpop.f32.mrf.mxu0 }
 0x2b1   : > { %v6889_v29 = vadd.f32 %v2272_v28, %v1999_v16 }
 0x2b2   : > { %v2001_v51 = vpop.f32.mrf.mxu1  ;;  %v2274_v57 = vpop.f32.mrf.mxu0 }
 0x2b3   : > { %v6891_v49 = vadd.f32 %v2274_v57, %v2001_v51 }
 0x2b4   : > { %v2003_v43 = vpop.f32.mrf.mxu1  ;;  %v2276_v45 = vpop.f32.mrf.mxu0 }
 0x2b5   : > { %v6894_v54 = vadd.f32 %v2276_v45, %v2003_v43  ;;  %v8083_v43 = vpack.c.bf16 %v8081_v31, %v8082_v39  ;;  %v8084_v31 = vld [vmem:[#allocation26_spill] sm:$0xff]  ;;  %v8085_v39 = vld [vmem:[#allocation23_spill] sm:$0xff] }
 0x2b6   : > { %v2007_v40 = vpop.f32.mrf.mxu1  ;;  %v2280_v12 = vpop.f32.mrf.mxu0  ;;  %2665 = vmatmul.mubr.bf16.gmra.mxu1 %v8079_v36  ;;  %4703 = vmatmul.mubr.msk.bf16.gmra.mxu0 %vm4701_vm13, %v8080_v25 }
 0x2b7   : > { %v6902_v62 = vadd.f32 %v2280_v12, %v2007_v40  ;;  %3640 = vmatprep.mubr.bf16.mxu1 %v7938_v19 }
 0x2b8   : > { %v2009_v23 = vpop.f32.mrf.mxu1  ;;  %v2282_v56 = vpop.f32.mrf.mxu0 }
 0x2b9   : > { %v6905_v59 = vadd.f32 %v2282_v56, %v2009_v23 }
 0x2ba   : > { %v2011_v5 = vpop.f32.mrf.mxu1  ;;  %v2284_v0 = vpop.f32.mrf.mxu0 }
 0x2bb   : > { %v6907_v27 = vadd.f32 %v2284_v0, %v2011_v5 }
 0x2bc   : > { %v2013_v16 = vpop.f32.mrf.mxu1  ;;  %v2286_v28 = vpop.f32.mrf.mxu0 }
 0x2bd   : > { %v6909_v4 = vadd.f32 %v2286_v28, %v2013_v16 }
 0x2be   : > { %v2017_v51 = vpop.f32.mrf.mxu1  ;;  %v2290_v57 = vpop.f32.mrf.mxu0  ;;  %3641 = vmatmul.mubr.bf16.vlgmr.msra.gmra.mxu1 %v8083_v43 }
 0x2bf   : > { %v6914_v45 = vadd.f32 %v2290_v57, %v2017_v51  ;;  %3650 = vmatprep.mubr.bf16.mxu1 %v7938_v19  ;;  %v8086_v51 = vpack.c.bf16 %v8084_v31, %v8085_v39  ;;  %v8088_v31 = vld [vmem:[#allocation32_spill] sm:$0xff]  ;;  %v8089_v39 = vld [vmem:[#allocation29_spill] sm:$0xff] }
 0x2c0   : > { %v2019_v40 = vpop.f32.mrf.mxu1  ;;  %v2292_v12 = vpop.f32.mrf.mxu0 }
 0x2c1   : > { %v6917_v32 = vadd.f32 %v2292_v12, %v2019_v40 }
 0x2c2   : > { %v2021_v36 = vpop.f32.mrf.mxu1  ;;  %v2294_v25 = vpop.f32.mrf.mxu0 }
 0x2c3   : > { %v6919_v23 = vadd.f32 %v2294_v25, %v2021_v36 }
 0x2c4   : > { %v2023_v56 = vpop.f32.mrf.mxu1  ;;  %v2296_v5 = vpop.f32.mrf.mxu0 }
 0x2c5   : > { %v6921_v0 = vadd.f32 %v2296_v5, %v2023_v56 }
 0x2c6   : > { %v2027_v16 = vpop.f32.mrf.mxu1  ;;  %v2300_v28 = vpop.f32.mrf.mxu0  ;;  %3651 = vmatmul.mubr.bf16.gmra.mxu1 %v8086_v51 }
 0x2c7   : > { %v6926_v57 = vadd.f32 %v2300_v28, %v2027_v16  ;;  %3660 = vmatprep.mubr.bf16.mxu1 %v7938_v19  ;;  %v8090_v16 = vpack.c.bf16 %v8088_v31, %v8089_v39 }
 0x2c8   : > { %v2029_v43 = vpop.f32.mrf.mxu1  ;;  %v2302_v40 = vpop.f32.mrf.mxu0 }
 0x2c9   : > { %v6929_v12 = vadd.f32 %v2302_v40, %v2029_v43 }
 0x2ca   : > { %v2031_v36 = vpop.f32.mrf.mxu1  ;;  %v2304_v25 = vpop.f32.mrf.mxu0 }
 0x2cb   : > { %v6931_v34 = vadd.f32 %v2304_v25, %v2031_v36 }
 0x2cc   : > { %v2033_v56 = vpop.f32.mrf.mxu1  ;;  %v2306_v5 = vpop.f32.mrf.mxu0 }
 0x2cd   : > { %v6933_v24 = vadd.f32 %v2306_v5, %v2033_v56 }
 0x2ce   : > { %v2037_v52 = vpop.f32.mrf.mxu1  ;;  %v2310_v2 = vpop.f32.mrf.mxu0  ;;  %3661 = vmatmul.mubr.bf16.gmra.mxu1 %v8090_v16  ;;  %v8095_v16 = vld [vmem:[#allocation37_spill] sm:$0xff] }
 0x2cf   : > { %8087 = vst [vmem:[#allocation72_spill] sm:$0xff] %v6933_v24  ;;  %v6938_v28 = vadd.f32 %v2310_v2, %v2037_v52  ;;  %3670 = vmatprep.mubr.bf16.mxu1 %v7938_v19 }
 0x2d0   : > { %v2039_v51 = vpop.f32.mrf.mxu1  ;;  %v2312_v43 = vpop.f32.mrf.mxu0 }
 0x2d1   : > { %8091 = vst [vmem:[#allocation66_spill] sm:$0xff] %v6938_v28  ;;  %v6943_v40 = vadd.f32 %v2312_v43, %v2039_v51  ;;  %v8097_v28 = vpack.c.bf16 %v8095_v16, %v8096_v63  ;;  %v8102_v63 = vld [vmem:[#allocation43_spill] sm:$0xff] }
 0x2d2   : > { %v2041_v36 = vpop.f32.mrf.mxu1  ;;  %v2314_v25 = vpop.f32.mrf.mxu0 }
 0x2d3   : > { %8092 = vst [vmem:[#allocation73_spill] sm:$0xff] %v6943_v40  ;;  %v6945_v56 = vadd.f32 %v2314_v25, %v2041_v36 }
 0x2d4   : > { %v2043_v5 = vpop.f32.mrf.mxu1  ;;  %v2316_v31 = vpop.f32.mrf.mxu0 }
 0x2d5   : > { %8093 = vst [vmem:[#allocation67_spill] sm:$0xff] %v6945_v56  ;;  %v6948_v39 = vadd.f32 %v2316_v31, %v2043_v5 }
 0x2d6   : > { %v2047_v2 = vpop.f32.mrf.mxu1  ;;  %v2320_v52 = vpop.f32.mrf.mxu0  ;;  %4722 = vmatmul.mubr.msk.bf16.gmra.mxu1 %vm4720_vm15, %v8097_v28  ;;  %v8103_v28 = vld [vmem:[#allocation44_spill] sm:$0xff] }
 0x2d7   : > { %8094 = vst [vmem:[#allocation82_spill] sm:$0xff] %v6948_v39  ;;  %v6953_v1 = vadd.f32 %v2320_v52, %v2047_v2  ;;  %3680 = vmatprep.mubr.bf16.mxu1 %v7938_v19  ;;  %v8104_v2 = vpack.c.bf16 %v8102_v63, %v8103_v28  ;;  %v8109_v63 = vld [vmem:[#allocation50_spill] sm:$0xff]  ;;  %v8110_v28 = vld [vmem:[#allocation47_spill] sm:$0xff] }
 0x2d8   : > { %v2049_v6 = vpop.f32.mrf.mxu1  ;;  %v2322_v51 = vpop.f32.mrf.mxu0 }
 0x2d9   : > { %8098 = vst [vmem:[#allocation77_spill] sm:$0xff] %v6953_v1  ;;  %v6956_v43 = vadd.f32 %v2322_v51, %v2049_v6 }
 0x2da   : > { %v2051_v36 = vpop.f32.mrf.mxu1  ;;  %v2324_v25 = vpop.f32.mrf.mxu0 }
 0x2db   : > { %8099 = vst [vmem:[#allocation83_spill] sm:$0xff] %v6956_v43  ;;  %v6958_v56 = vadd.f32 %v2324_v25, %v2051_v36 }
 0x2dc   : > { %v2053_v5 = vpop.f32.mrf.mxu1  ;;  %v2326_v31 = vpop.f32.mrf.mxu0 }
 0x2dd   : > { %8100 = vst [vmem:[#allocation78_spill] sm:$0xff] %v6958_v56  ;;  %v6960_v39 = vadd.f32 %v2326_v31, %v2053_v5 }
 0x2de   : > { %v2057_v40 = vpop.f32.mrf.mxu1  ;;  %v2330_v24 = vpop.f32.mrf.mxu0  ;;  %3681 = vmatmul.mubr.bf16.gmra.mxu1 %v8104_v2 }
 0x2df   : > { %8101 = vst [vmem:[#allocation92_spill] sm:$0xff] %v6960_v39  ;;  %v6965_v52 = vadd.f32 %v2330_v24, %v2057_v40  ;;  %3690 = vmatprep.mubr.bf16.mxu1 %v7938_v19  ;;  %v8111_v24 = vpack.c.bf16 %v8109_v63, %v8110_v28  ;;  %v8115_v63 = vld [vmem:[#allocation56_spill] sm:$0xff]  ;;  %v8116_v28 = vld [vmem:[#allocation53_spill] sm:$0xff] }
 0x2e0   : > { %v2059_v16 = vpop.f32.mrf.mxu1  ;;  %v2332_v6 = vpop.f32.mrf.mxu0 }
 0x2e1   : > { %8105 = vst [vmem:[#allocation87_spill] sm:$0xff] %v6965_v52  ;;  %v6968_v51 = vadd.f32 %v2332_v6, %v2059_v16 }
 0x2e2   : > { %v2061_v36 = vpop.f32.mrf.mxu1  ;;  %v2334_v25 = vpop.f32.mrf.mxu0 }
 0x2e3   : > { %8106 = vst [vmem:[#allocation93_spill] sm:$0xff] %v6968_v51  ;;  %v6970_v56 = vadd.f32 %v2334_v25, %v2061_v36 }
 0x2e4   : > { %v2063_v5 = vpop.f32.mrf.mxu1  ;;  %v2336_v31 = vpop.f32.mrf.mxu0 }
 0x2e5   : > { %8107 = vst [vmem:[#allocation88_spill] sm:$0xff] %v6970_v56  ;;  %v6972_v39 = vadd.f32 %v2336_v31, %v2063_v5 }
 0x2e6   : > { %v2067_v43 = vpop.f32.mrf.mxu1  ;;  %v2340_v1 = vpop.f32.mrf.mxu0  ;;  %3691 = vmatmul.mubr.bf16.gmra.mxu1 %v8111_v24 }
 0x2e7   : > { %8108 = vst [vmem:[#allocation101_spill] sm:$0xff] %v6972_v39  ;;  %v6977_v40 = vadd.f32 %v2340_v1, %v2067_v43  ;;  %3700 = vmatprep.mubr.bf16.mxu1 %v7938_v19  ;;  %v8117_v1 = vpack.c.bf16 %v8115_v63, %v8116_v28 }
 0x2e8   : > { %v2069_v2 = vpop.f32.mrf.mxu1  ;;  %v2342_v16 = vpop.f32.mrf.mxu0 }
 0x2e9   : > { %v6980_v6 = vadd.f32 %v2342_v16, %v2069_v2  ;;  %v8119_v16 = vand.u32 63, %v6748_v20 }
 0x2ea   : > { %v2071_v36 = vpop.f32.mrf.mxu1  ;;  %v2344_v25 = vpop.f32.mrf.mxu0 }
 0x2eb   : > { %8112 = vst [vmem:[#allocation98_spill] sm:$0xff] %v6980_v6  ;;  %v6982_v56 = vadd.f32 %v2344_v25, %v2071_v36  ;;  %vm3382_vm0 = vcmp.lt.s32.totalorder %v8119_v16, 62 }
 0x2ec   : > { %v2073_v5 = vpop.f32.mrf.mxu1  ;;  %v2346_v31 = vpop.f32.mrf.mxu0  ;;  %vm4723_vm1 = vmpackc.low %vm3382_vm0, %vm5416_vm6 }
 0x2ed   : > { %8113 = vst [vmem:[#allocation102_spill] sm:$0xff] %v6982_v56  ;;  %v6984_v39 = vadd.f32 %v2346_v31, %v2073_v5 }
 0x2ee   : > { %v2077_v51 = vpop.f32.mrf.mxu1  ;;  %v2350_v52 = vpop.f32.mrf.mxu0  ;;  %3701 = vmatmul.mubr.bf16.gmra.mxu1 %v8117_v1  ;;  %v8123_v1 = vld [vmem:[#allocation61_spill] sm:$0xff] }
 0x2ef   : > { %8114 = vst [vmem:[#allocation96_spill] sm:$0xff] %v6984_v39  ;;  %v6989_v43 = vadd.f32 %v2350_v52, %v2077_v51  ;;  %3710 = vmatprep.mubr.bf16.mxu1 %v7938_v19 }
 0x2f0   : > { %v2079_v24 = vpop.f32.mrf.mxu1  ;;  %v2352_v2 = vpop.f32.mrf.mxu0 }
 0x2f1   : > { %8118 = vst [vmem:[#allocation107_spill] sm:$0xff] %v6989_v43  ;;  %v6994_v36 = vadd.f32 %v2352_v2, %v2079_v24  ;;  %v8124_v43 = vld [vmem:[#allocation62_spill] sm:$0xff] }
 0x2f2   : > { %v2081_v25 = vpop.f32.mrf.mxu1  ;;  %v2354_v5 = vpop.f32.mrf.mxu0  ;;  %v8125_v56 = vpack.c.bf16 %v8123_v1, %v8124_v43  ;;  %v8127_v43 = vld [vmem:[#allocation70_spill] sm:$0xff] }
 0x2f3   : > { %8120 = vst [vmem:[#allocation108_spill] sm:$0xff] %v6994_v36  ;;  %v6996_v31 = vadd.f32 %v2354_v5, %v2081_v25 }
 0x2f4   : > { %v2083_v39 = vpop.f32.mrf.mxu1  ;;  %v2356_v63 = vpop.f32.mrf.mxu0 }
 0x2f5   : > { %8121 = vst [vmem:[#allocation118_spill] sm:$0xff] %v6996_v31  ;;  %v6999_v28 = vadd.f32 %v2356_v63, %v2083_v39 }
 0x2f6   : > { %v2087_v52 = vpop.f32.mrf.mxu1  ;;  %v2360_v51 = vpop.f32.mrf.mxu0  ;;  %4725 = vmatmul.mubr.msk.bf16.gmra.mxu1 %vm4723_vm1, %v8125_v56  ;;  %v8126_v56 = vld [vmem:[#allocation69_spill] sm:$0xff] }
 0x2f7   : > { %8122 = vst [vmem:[#allocation114_spill] sm:$0xff] %v6999_v28  ;;  %v7004_v20 = vadd.f32 %v2360_v51, %v2087_v52  ;;  %3720 = vmatprep.mubr.bf16.mxu1 %v7938_v19  ;;  %v8128_v52 = vpack.c.bf16 %v8126_v56, %v8127_v43  ;;  %v8132_v43 = vld [vmem:[#allocation75_spill] sm:$0xff] }
 0x2f8   : > { %v2089_v24 = vpop.f32.mrf.mxu1  ;;  %v2362_v2 = vpop.f32.mrf.mxu0 }
 0x2f9   : > { %v7007_v16 = vadd.f32 %v2362_v2, %v2089_v24 }
 0x2fa   : > { %v2091_v25 = vpop.f32.mrf.mxu1  ;;  %v2364_v5 = vpop.f32.mrf.mxu0 }
 0x2fb   : > { %v7009_v31 = vadd.f32 %v2364_v5, %v2091_v25 }
 0x2fc   : > { %v2093_v39 = vpop.f32.mrf.mxu1  ;;  %v2366_v63 = vpop.f32.mrf.mxu0 }
 0x2fd   : > { %v7011_v28 = vadd.f32 %v2366_v63, %v2093_v39 }
 0x2fe   : > { %v2516_v36 = vpop.f32.mrf.mxu1  ;;  %v7013_v6 = vpop.f32.mrf.mxu0  ;;  %3721 = vmatmul.mubr.bf16.gmra.mxu1 %v8128_v52 }
 0x2ff   : > { %v7019_v51 = vadd.f32 %v2516_v36, %v6776_v46  ;;  %3730 = vmatprep.mubr.bf16.mxu1 %v7938_v19  ;;  %v8131_v36 = vld [vmem:[#allocation80_spill] sm:$0xff] }
 0x300   : > { %v2518_v1 = vpop.f32.mrf.mxu1  ;;  %v7025_v2 = vpop.f32.mrf.mxu0  ;;  %v8133_v52 = vpack.c.bf16 %v8131_v36, %v8132_v43  ;;  %v8136_v43 = vld [vmem:[#allocation85_spill] sm:$0xff] }
 0x301   : > { %v7023_v24 = vadd.f32 %v2518_v1, %v6780_v8  ;;  %8129 = vst [vmem:[#allocation14_spill] sm:$0xff] %v7025_v2 }
 0x302   : > { %v2520_v25 = vpop.f32.mrf.mxu1  ;;  %v7030_v63 = vpop.f32.mrf.mxu0 }
 0x303   : > { %v7028_v5 = vadd.f32 %v2520_v25, %v6782_v58 }
 0x304   : > { %v2522_v39 = vpop.f32.mrf.mxu1  ;;  %v7042_v2 = vpop.f32.mrf.mxu0 }
 0x305   : > { %v7033_v56 = vadd.f32 %v2522_v39, %v6784_v9 }
 0x306   : > { %v2526_v46 = vpop.f32.mrf.mxu1  ;;  %3731 = vmatmul.mubr.bf16.gmra.mxu1 %v8133_v52 }
 0x307   : > { %8130 = vst [vmem:[#allocation19_spill] sm:$0xff] %v7033_v56  ;;  %v7039_v8 = vadd.f32 %v2526_v46, %v6792_v10  ;;  %3740 = vmatprep.mubr.bf16.mxu1 %v7938_v19  ;;  %v7050_v56 = vpop.f32.mrf.mxu0  ;;  %v8135_v46 = vld [vmem:[#allocation90_spill] sm:$0xff] }
 0x308   : > { %v2528_v1 = vpop.f32.mrf.mxu1  ;;  %v8137_v52 = vpack.c.bf16 %v8135_v46, %v8136_v43 }
 0x309   : > { %8134 = vst [vmem:[#allocation17_spill] sm:$0xff] %v7039_v8  ;;  %v7045_v58 = vadd.f32 %v2528_v1, %v6799_v41  ;;  %v7064_v1 = vpop.f32.mrf.mxu0 }
 0x30a   : > { %v2530_v25 = vpop.f32.mrf.mxu1 }
 0x30b   : > { %v7048_v9 = vadd.f32 %v2530_v25, %v6801_v7  ;;  %v8138_v7 = vand.u32 63, %v6797_v42  ;;  %v8141_v42 = vld [vmem:[#allocation99_spill] sm:$0xff] }
 0x30c   : > { %v2532_v39 = vpop.f32.mrf.mxu1 }
 0x30d   : > { %v7053_v36 = vadd.f32 %v2532_v39, %v6804_v17  ;;  %vm3390_vm2 = vcmp.lt.s32.totalorder %v8138_v7, 62 }
 0x30e   : > { %v2536_v10 = vpop.f32.mrf.mxu1  ;;  %3741 = vmatmul.mubr.bf16.gmra.mxu1 %v8137_v52  ;;  %vm4726_vm3 = vmpackc.low %vm3390_vm2, %vm5416_vm6  ;;  %v8142_v52 = vld [vmem:[#allocation100_spill] sm:$0xff] }
 0x30f   : > { %v7059_v8 = vadd.f32 %v2536_v10, %v6812_v3  ;;  %3750 = vmatprep.mubr.bf16.mxu1 %v7938_v19  ;;  %v7073_v3 = vpop.f32.mrf.mxu0  ;;  %v8143_v7 = vpack.c.bf16 %v8141_v42, %v8142_v52  ;;  %v8147_v52 = vld [vmem:[#allocation106_spill] sm:$0xff] }
 0x310   : > { %v2538_v41 = vpop.f32.mrf.mxu1 }
 0x311   : > { %v7067_v25 = vadd.f32 %v2538_v41, %v6818_v35  ;;  %v7085_v41 = vpop.f32.mrf.mxu0 }
 0x312   : > { %v2540_v17 = vpop.f32.mrf.mxu1 }
 0x313   : > { %v7070_v39 = vadd.f32 %v2540_v17, %v6820_v30 }
 0x314   : > { %v2542_v46 = vpop.f32.mrf.mxu1 }
 0x315   : > { %8139 = vst [vmem:[#allocation16_spill] sm:$0xff] %v7070_v39  ;;  %v7076_v10 = vadd.f32 %v2542_v46, %v6823_v47 }
 0x316   : > { %v2546_v43 = vpop.f32.mrf.mxu1  ;;  %4728 = vmatmul.mubr.msk.bf16.gmra.mxu1 %vm4726_vm3, %v8143_v7 }
 0x317   : > { %8140 = vst [vmem:[#allocation15_spill] sm:$0xff] %v7076_v10  ;;  %v7082_v35 = vadd.f32 %v2546_v43, %v6831_v37  ;;  %3760 = vmatprep.mubr.bf16.mxu1 %v7938_v19  ;;  %v7093_v10 = vpop.f32.mrf.mxu0  ;;  %v8146_v43 = vld [vmem:[#allocation110_spill] sm:$0xff] }
 0x318   : > { %v2548_v30 = vpop.f32.mrf.mxu1  ;;  %v8148_v7 = vpack.c.bf16 %v8146_v43, %v8147_v52  ;;  %v8152_v52 = vld [vmem:[#allocation120_spill] sm:$0xff] }
 0x319   : > { %8144 = vst [vmem:[#allocation25_spill] sm:$0xff] %v7082_v35  ;;  %v7088_v17 = vadd.f32 %v2548_v30, %v6835_v38  ;;  %v7105_v30 = vpop.f32.mrf.mxu0 }
 0x31a   : > { %v2550_v39 = vpop.f32.mrf.mxu1 }
 0x31b   : > { %v7091_v47 = vadd.f32 %v2550_v39, %v6837_v15 }
 0x31c   : > { %v2552_v46 = vpop.f32.mrf.mxu1 }
 0x31d   : > { %v7096_v42 = vadd.f32 %v2552_v46, %v6839_v11 }
 0x31e   : > { %v2556_v37 = vpop.f32.mrf.mxu1  ;;  %3761 = vmatmul.mubr.bf16.gmra.mxu1 %v8148_v7 }
 0x31f   : > { %8145 = vst [vmem:[#allocation22_spill] sm:$0xff] %v7096_v42  ;;  %v7102_v35 = vadd.f32 %v2556_v37, %v6847_v26  ;;  %3770 = vmatprep.mubr.bf16.mxu1 %v7938_v19  ;;  %v7113_v42 = vpop.f32.mrf.mxu0  ;;  %v8151_v37 = vld [vmem:[#allocation116_spill] sm:$0xff] }
 0x320   : > { %v2558_v38 = vpop.f32.mrf.mxu1  ;;  %v8153_v7 = vpack.c.bf16 %v8151_v37, %v8152_v52 }
 0x321   : > { %8149 = vst [vmem:[#allocation24_spill] sm:$0xff] %v7102_v35  ;;  %v7108_v15 = vadd.f32 %v2558_v38, %v6851_v60  ;;  %v7125_v38 = vpop.f32.mrf.mxu0 }
 0x322   : > { %v2560_v39 = vpop.f32.mrf.mxu1 }
 0x323   : > { %v7111_v11 = vadd.f32 %v2560_v39, %v6853_v44 }
 0x324   : > { %v2562_v46 = vpop.f32.mrf.mxu1 }
 0x325   : > { %v7116_v43 = vadd.f32 %v2562_v46, %v6855_v22 }
 0x326   : > { %v2566_v26 = vpop.f32.mrf.mxu1  ;;  %3771 = vmatmul.mubr.bf16.gmra.mxu1 %v8153_v7 }
 0x327   : > { %8150 = vst [vmem:[#allocation21_spill] sm:$0xff] %v7116_v43  ;;  %v7122_v35 = vadd.f32 %v2566_v26, %v6863_v53  ;;  %3780 = vmatprep.mubr.bf16.mxu1 %v7938_v19  ;;  %v7133_v43 = vpop.f32.mrf.mxu0  ;;  %v8154_v26 = vpack.c.bf16 %v6501_v33, %v6505_v13 }
 0x328   : > { %v2568_v60 = vpop.f32.mrf.mxu1 }
 0x329   : > { %v7128_v44 = vadd.f32 %v2568_v60, %v6870_v21  ;;  %v7147_v7 = vpop.f32.mrf.mxu0 }
 0x32a   : > { %v2570_v39 = vpop.f32.mrf.mxu1 }
 0x32b   : > { %v7131_v22 = vadd.f32 %v2570_v39, %v6872_v14  ;;  %v8155_v14 = vand.u32 63, %v6868_v50  ;;  %v7156_v13 = vpop.f32.mrf.mxu0  ;;  %v8158_v50 = vpack.c.bf16 %v6558_v18, %v6552_v61 }
 0x32c   : > { %v2572_v46 = vpop.f32.mrf.mxu1 }
 0x32d   : > { %v7136_v37 = vadd.f32 %v2572_v46, %v6875_v48  ;;  %vm3398_vm4 = vcmp.lt.s32.totalorder %v8155_v14, 62 }
 0x32e   : > { %v2576_v53 = vpop.f32.mrf.mxu1  ;;  %3781 = vmatmul.mubr.bf16.gmra.mxu1 %v8154_v26  ;;  %vm4729_vm5 = vmpackc.low %vm3398_vm4, %vm5416_vm6 }
 0x32f   : > { %v7142_v52 = vadd.f32 %v2576_v53, %v6883_v55  ;;  %3790 = vmatprep.mubr.bf16.mxu1 %v7938_v19  ;;  %v7167_v53 = vpop.f32.mrf.mxu0 }
 0x330   : > { %v2578_v21 = vpop.f32.mrf.mxu1 }
 0x331   : > { %v7150_v60 = vadd.f32 %v2578_v21, %v6889_v29  ;;  %v7175_v14 = vpop.f32.mrf.mxu0 }
 0x332   : > { %v2580_v48 = vpop.f32.mrf.mxu1 }
 0x333   : > { %v7153_v39 = vadd.f32 %v2580_v48, %v6891_v49 }
 0x334   : > { %v2582_v33 = vpop.f32.mrf.mxu1 }
 0x335   : > { %8156 = vst [vmem:[#allocation31_spill] sm:$0xff] %v7153_v39  ;;  %v7159_v19 = vadd.f32 %v2582_v33, %v6894_v54  ;;  %v7183_v33 = vpop.f32.mrf.mxu0 }
 0x336   : > { %v2586_v55 = vpop.f32.mrf.mxu1  ;;  %4731 = vmatmul.mubr.msk.bf16.gmra.mxu1 %vm4729_vm5, %v8158_v50 }
 0x337   : > { %8157 = vst [vmem:[#allocation28_spill] sm:$0xff] %v7159_v19  ;;  %v7165_v29 = vadd.f32 %v2586_v55, %v6902_v62  ;;  %v8195_v19 = vld [vmem:[#allocation101_spill] sm:$0xff] }
 0x338   : > { %v2588_v46 = vpop.f32.mrf.mxu1 }
 0x339   : > { %8159 = vst [vmem:[#allocation30_spill] sm:$0xff] %v7165_v29  ;;  %v7170_v49 = vadd.f32 %v2588_v46, %v6905_v59  ;;  %v7191_v46 = vpop.f32.mrf.mxu0  ;;  %v8190_v29 = vld [vmem:[#allocation93_spill] sm:$0xff] }
 0x33a   : > { %v2590_v26 = vpop.f32.mrf.mxu1 }
 0x33b   : > { %8160 = vst [vmem:[#allocation27_spill] sm:$0xff] %v7170_v49  ;;  %v7173_v21 = vadd.f32 %v2590_v26, %v6907_v27  ;;  %v8186_v49 = vld [vmem:[#allocation92_spill] sm:$0xff] }
 0x33c   : > { %v2592_v54 = vpop.f32.mrf.mxu1 }
 0x33d   : > { %8161 = vst [vmem:[#allocation36_spill] sm:$0xff] %v7173_v21  ;;  %v7178_v48 = vadd.f32 %v2592_v54, %v6909_v4  ;;  %v8182_v21 = vld [vmem:[#allocation83_spill] sm:$0xff] }
 0x33e   : > { %v2596_v18 = vpop.f32.mrf.mxu1 }
 0x33f   : > { %8162 = vst [vmem:[#allocation34_spill] sm:$0xff] %v7178_v48  ;;  %v7181_v61 = vadd.f32 %v2596_v18, %v6914_v45  ;;  %v7199_v18 = vpop.f32.mrf.mxu0  ;;  %v8178_v48 = vld [vmem:[#allocation82_spill] sm:$0xff] }
 0x340   : > { %v2598_v62 = vpop.f32.mrf.mxu1 }
 0x341   : > { %8163 = vst [vmem:[#allocation35_spill] sm:$0xff] %v7181_v61  ;;  %v7186_v59 = vadd.f32 %v2598_v62, %v6917_v32  ;;  %v8174_v61 = vld [vmem:[#allocation73_spill] sm:$0xff] }
 0x342   : > { %v2600_v55 = vpop.f32.mrf.mxu1 }
 0x343   : > { %8164 = vst [vmem:[#allocation33_spill] sm:$0xff] %v7186_v59  ;;  %v7189_v27 = vadd.f32 %v2600_v55, %v6919_v23  ;;  %v8170_v59 = vld [vmem:[#allocation72_spill] sm:$0xff] }
 0x344   : > { %v2602_v50 = vpop.f32.mrf.mxu1 }
 0x345   : > { %8165 = vst [vmem:[#allocation42_spill] sm:$0xff] %v7189_v27  ;;  %v7194_v4 = vadd.f32 %v2602_v50, %v6921_v0  ;;  %v7207_v27 = vpop.f32.mrf.mxu0 }
 0x346   : > { %v2606_v26 = vpop.f32.mrf.mxu1 }
 0x347   : > { %8166 = vst [vmem:[#allocation40_spill] sm:$0xff] %v7194_v4  ;;  %v7197_v45 = vadd.f32 %v2606_v26, %v6926_v57  ;;  %v8172_v4 = vld [vmem:[#allocation66_spill] sm:$0xff] }
 0x348   : > { %v2608_v54 = vpop.f32.mrf.mxu1 }
 0x349   : > { %8167 = vst [vmem:[#allocation41_spill] sm:$0xff] %v7197_v45  ;;  %v7202_v32 = vadd.f32 %v2608_v54, %v6929_v12  ;;  %v7215_v45 = vpop.f32.mrf.mxu0 }
 0x34a   : > { %v2610_v62 = vpop.f32.mrf.mxu1 }
 0x34b   : > { %8168 = vst [vmem:[#allocation39_spill] sm:$0xff] %v7202_v32  ;;  %v7205_v23 = vadd.f32 %v2610_v62, %v6931_v34  ;;  %v8176_v32 = vld [vmem:[#allocation67_spill] sm:$0xff] }
 0x34c   : > { %v2612_v55 = vpop.f32.mrf.mxu1 }
 0x34d   : > { %8169 = vst [vmem:[#allocation49_spill] sm:$0xff] %v7205_v23  ;;  %v7210_v0 = vadd.f32 %v2612_v55, %v8170_v59  ;;  %v7223_v23 = vpop.f32.mrf.mxu0 }
 0x34e   : > { %v2616_v50 = vpop.f32.mrf.mxu1 }
 0x34f   : > { %8171 = vst [vmem:[#allocation46_spill] sm:$0xff] %v7210_v0  ;;  %v7213_v57 = vadd.f32 %v2616_v50, %v8172_v4  ;;  %v8180_v0 = vld [vmem:[#allocation77_spill] sm:$0xff] }
 0x350   : > { %v2618_v26 = vpop.f32.mrf.mxu1 }
 0x351   : > { %8173 = vst [vmem:[#allocation48_spill] sm:$0xff] %v7213_v57  ;;  %v7218_v12 = vadd.f32 %v2618_v26, %v8174_v61  ;;  %v7231_v57 = vpop.f32.mrf.mxu0 }
 0x352   : > { %v2620_v54 = vpop.f32.mrf.mxu1 }
 0x353   : > { %8175 = vst [vmem:[#allocation45_spill] sm:$0xff] %v7218_v12  ;;  %v7221_v34 = vadd.f32 %v2620_v54, %v8176_v32  ;;  %v8184_v12 = vld [vmem:[#allocation78_spill] sm:$0xff] }
 0x354   : > { %v2622_v62 = vpop.f32.mrf.mxu1 }
 0x355   : > { %8177 = vst [vmem:[#allocation55_spill] sm:$0xff] %v7221_v34  ;;  %v7226_v59 = vadd.f32 %v2622_v62, %v8178_v48  ;;  %v7239_v34 = vpop.f32.mrf.mxu0 }
 0x356   : > { %v2626_v55 = vpop.f32.mrf.mxu1 }
 0x357   : > { %8179 = vst [vmem:[#allocation52_spill] sm:$0xff] %v7226_v59  ;;  %v7229_v4 = vadd.f32 %v2626_v55, %v8180_v0  ;;  %v8188_v59 = vld [vmem:[#allocation87_spill] sm:$0xff] }
 0x358   : > { %v2628_v50 = vpop.f32.mrf.mxu1 }
 0x359   : > { %8181 = vst [vmem:[#allocation54_spill] sm:$0xff] %v7229_v4  ;;  %v7234_v61 = vadd.f32 %v2628_v50, %v8182_v21  ;;  %v7247_v4 = vpop.f32.mrf.mxu0 }
 0x35a   : > { %v2630_v26 = vpop.f32.mrf.mxu1 }
 0x35b   : > { %8183 = vst [vmem:[#allocation51_spill] sm:$0xff] %v7234_v61  ;;  %v7237_v32 = vadd.f32 %v2630_v26, %v8184_v12  ;;  %v8192_v61 = vld [vmem:[#allocation88_spill] sm:$0xff] }
 0x35c   : > { %v2632_v54 = vpop.f32.mrf.mxu1 }
 0x35d   : > { %8185 = vst [vmem:[#allocation60_spill] sm:$0xff] %v7237_v32  ;;  %v7242_v48 = vadd.f32 %v2632_v54, %v8186_v49  ;;  %v7255_v32 = vpop.f32.mrf.mxu0 }
 0x35e   : > { %v2636_v62 = vpop.f32.mrf.mxu1  ;;  %8194 = vst [vmem:[#allocation64_spill] sm:$0xff] %v7255_v32  ;;  %v8204_v32 = vld [vmem:[#allocation96_spill] sm:$0xff] }
 0x35f   : > { %8187 = vst [vmem:[#allocation58_spill] sm:$0xff] %v7242_v48  ;;  %v7245_v0 = vadd.f32 %v2636_v62, %v8188_v59  ;;  %v8199_v48 = vld [vmem:[#allocation98_spill] sm:$0xff] }
 0x360   : > { %v2638_v55 = vpop.f32.mrf.mxu1 }
 0x361   : > { %8189 = vst [vmem:[#allocation59_spill] sm:$0xff] %v7245_v0  ;;  %v7250_v21 = vadd.f32 %v2638_v55, %v8190_v29  ;;  %v7263_v0 = vpop.f32.mrf.mxu0 }
 0x362   : > { %v2640_v50 = vpop.f32.mrf.mxu1  ;;  %8198 = vst [vmem:[#allocation79_spill] sm:$0xff] %v7263_v0  ;;  %v8209_v0 = vld [vmem:[#allocation108_spill] sm:$0xff] }
 0x363   : > { %8191 = vst [vmem:[#allocation57_spill] sm:$0xff] %v7250_v21  ;;  %v7253_v12 = vadd.f32 %v2640_v50, %v8192_v61  ;;  %v8201_v21 = vld [vmem:[#allocation102_spill] sm:$0xff] }
 0x364   : > { %v2642_v26 = vpop.f32.mrf.mxu1 }
 0x365   : > { %8193 = vst [vmem:[#allocation68_spill] sm:$0xff] %v7253_v12  ;;  %v7258_v49 = vadd.f32 %v2642_v26, %v8195_v19  ;;  %v7271_v12 = vpop.f32.mrf.mxu0 }
 0x366   : > { %v2646_v54 = vpop.f32.mrf.mxu1  ;;  %8203 = vst [vmem:[#allocation71_spill] sm:$0xff] %v7271_v12  ;;  %v8214_v12 = vld [vmem:[#allocation114_spill] sm:$0xff] }
 0x367   : > { %8196 = vst [vmem:[#allocation65_spill] sm:$0xff] %v7258_v49  ;;  %v7261_v59 = vadd.f32 %v2646_v54, %v6977_v40  ;;  %v8206_v49 = vld [vmem:[#allocation107_spill] sm:$0xff] }
 0x368   : > { %v2648_v62 = vpop.f32.mrf.mxu1 }
 0x369   : > { %8197 = vst [vmem:[#allocation63_spill] sm:$0xff] %v7261_v59  ;;  %v7266_v29 = vadd.f32 %v2648_v62, %v8199_v48  ;;  %v7279_v59 = vpop.f32.mrf.mxu0 }
 0x36a   : > { %v2650_v55 = vpop.f32.mrf.mxu1  ;;  %8208 = vst [vmem:[#allocation86_spill] sm:$0xff] %v7279_v59 }
 0x36b   : > { %8200 = vst [vmem:[#allocation74_spill] sm:$0xff] %v7266_v29  ;;  %v7269_v61 = vadd.f32 %v2650_v55, %v8201_v21  ;;  %v8211_v29 = vld [vmem:[#allocation118_spill] sm:$0xff] }
 0x36c   : > { %v2652_v50 = vpop.f32.mrf.mxu1 }
 0x36d   : > { %8202 = vst [vmem:[#allocation76_spill] sm:$0xff] %v7269_v61  ;;  %v7274_v19 = vadd.f32 %v2652_v50, %v8204_v32  ;;  %v7287_v61 = vpop.f32.mrf.mxu0 }
 0x36e   : > { %v2656_v26 = vpop.f32.mrf.mxu1  ;;  %8213 = vst [vmem:[#allocation94_spill] sm:$0xff] %v7287_v61 }
 0x36f   : > { %8205 = vst [vmem:[#allocation89_spill] sm:$0xff] %v7274_v19  ;;  %v7277_v40 = vadd.f32 %v2656_v26, %v8206_v49  ;;  %v7296_v59 = vpop.f32.mrf.mxu0 }
 0x370   : > { %v2658_v54 = vpop.f32.mrf.mxu1  ;;  %8218 = vst [vmem:[#allocation109_spill] sm:$0xff] %v7296_v59 }
 0x371   : > { %8207 = vst [vmem:[#allocation84_spill] sm:$0xff] %v7277_v40  ;;  %v7282_v48 = vadd.f32 %v2658_v54, %v8209_v0  ;;  %v8217_v40 = vld [vmem:[#allocation13_spill] sm:$0xff] }
 0x372   : > { %v2660_v62 = vpop.f32.mrf.mxu1  ;;  %v3869_v19 = vsub.s32 0, %v8217_v40 }
 0x373   : > { %8210 = vst [vmem:[#allocation81_spill] sm:$0xff] %v7282_v48  ;;  %v7285_v21 = vadd.f32 %v2660_v62, %v8211_v29  ;;  %v3865_v29 = vld [vmem:[%s7682_s4] sm:$0x3] }
 0x374   : > { %v2662_v55 = vpop.f32.mrf.mxu1 }
 0x375   : > { %8212 = vst [vmem:[#allocation97_spill] sm:$0xff] %v7285_v21  ;;  %v7290_v32 = vadd.f32 %v2662_v55, %v8214_v12  ;;  %v3873_v12 = vsub.s32 1, %v8217_v40  ;;  %v7308_v55 = vrot.slane %v3865_v29, %v3869_v19  ;;  %v8223_v40 = vld [vmem:[#allocation14_spill] sm:$0xff]  ;;  %v3240_v19 = vadd.f32 %v7030_v63, %v7028_v5 }
 0x376   : > { %v2666_v50 = vpop.f32.mrf.mxu1 }
 0x377   : > { %8215 = vst [vmem:[#allocation95_spill] sm:$0xff] %v7290_v32  ;;  %v7293_v49 = vadd.f32 %v2666_v50, %v7004_v20  ;;  %v3238_v50 = vadd.f32 %v7013_v6, %v7019_v51  ;;  %v3239_v32 = vadd.f32 %v8223_v40, %v7023_v24 }
 0x378   : > { %v2668_v26 = vpop.f32.mrf.mxu1 }
 0x379   : > { %8216 = vst [vmem:[#allocation91_spill] sm:$0xff] %v7293_v49  ;;  %v7299_v0 = vadd.f32 %v2668_v26, %v7007_v16  ;;  %v7312_v49 = vpop.f32.mrf.mxu0 }
 0x37a   : > { %v2670_v54 = vpop.f32.mrf.mxu1  ;;  %8221 = vst [vmem:[#allocation103_spill] sm:$0xff] %v7312_v49  ;;  %v8227_v49 = vld [vmem:[#allocation17_spill] sm:$0xff] }
 0x37b   : > { %8219 = vst [vmem:[#allocation104_spill] sm:$0xff] %v7299_v0  ;;  %v7306_v62 = vadd.f32 %v2670_v54, %v7009_v31  ;;  %v7317_v0 = vrot.slane %v3865_v29, %v3873_v12  ;;  %v7323_v54 = vpop.f32.mrf.mxu0  ;;  %v3242_v59 = vadd.f32 %v7050_v56, %v8227_v49  ;;  %v3244_v56 = vadd.f32 %v7073_v3, %v7048_v9 }
 0x37c   : > { %v2672_v20 = vpop.f32.mrf.mxu1  ;;  %8224 = vst [vmem:[#allocation112_spill] sm:$0xff] %v7323_v54 }
 0x37d   : > { %8220 = vst [vmem:[#allocation105_spill] sm:$0xff] %v7306_v62  ;;  %v7315_v16 = vadd.f32 %v2672_v20, %v7011_v28  ;;  %v5210_v62 = vld [vmem:[%s5583_s6] sm:$0xff]  ;;  %v7330_v48 = vpop.f32.mrf.mxu0 }
 0x37e   : > { %v3642_v26 = vpop.f32.mrf.mxu1  ;;  %v371_v28 = vunpack.c.l.bf16 %v5210_v62  ;;  %8226 = vst [vmem:[#allocation113_spill] sm:$0xff] %v7330_v48 }
 0x37f   : > { %8222 = vst [vmem:[#allocation115_spill] sm:$0xff] %v7315_v16  ;;  %v3801_v21 = vadd.f32 %v3642_v26, %v3238_v50  ;;  %v8225_v16 = vld [vmem:[#allocation19_spill] sm:$0xff]  ;;  %v372_v26 = vunpack.c.h.bf16 %v5210_v62 }
 0x380   : > { %v3644_v31 = vpop.f32.mrf.mxu1  ;;  %v3241_v29 = vadd.f32 %v7042_v2, %v8225_v16  ;;  %v3243_v2 = vadd.f32 %v7064_v1, %v7045_v58  ;;  %v3245_v58 = vadd.f32 %v7085_v41, %v7053_v36 }
 0x381   : > { %v3877_v6 = vadd.f32 %v7308_v55, %v3801_v21  ;;  %v3802_v51 = vadd.f32 %v3644_v31, %v3239_v32  ;;  %v5211_v32 = vld [vmem:[%s5583_s6 + $0x8] sm:$0xff] }
 0x382   : > { %v3646_v20 = vpop.f32.mrf.mxu1  ;;  %v373_v31 = vunpack.c.l.bf16 %v5211_v32  ;;  %v374_v48 = vunpack.c.h.bf16 %v5211_v32 }
 0x383   : > { %v3941_v12 = vmul.f32 0.01, %v3877_v6  ;;  %v3878_v24 = vadd.f32 %v7317_v0, %v3802_v51  ;;  %v3803_v50 = vadd.f32 %v3646_v20, %v3240_v19 }
 0x384   : > { %v3648_v40 = vpop.f32.mrf.mxu1 }
 0x385   : > { %v4005_v5 = vmax.f32 %v3877_v6, %v3941_v12  ;;  %v3942_v63 = vmul.f32 0.01, %v3878_v24  ;;  %v3879_v21 = vadd.f32 %v7308_v55, %v3803_v50  ;;  %v3804_v54 = vadd.f32 %v3648_v40, %v3241_v29  ;;  %v7339_v50 = vpop.f32.mrf.mxu0 }
 0x386   : > { %v3652_v16 = vpop.f32.mrf.mxu1 }
 0x387   : > { %v4069_v51 = vadd.f32 %v4005_v5, %v371_v28  ;;  %v4006_v19 = vmax.f32 %v3878_v24, %v3942_v63  ;;  %v3943_v62 = vmul.f32 0.01, %v3879_v21  ;;  %v3880_v20 = vadd.f32 %v7317_v0, %v3804_v54  ;;  %v5212_v5 = vld [vmem:[%s5583_s6 + $0x10] sm:$0xff]  ;;  %v7350_v9 = vpop.f32.mrf.mxu0 }
 0x388   : > { %v3805_v6 = vadd.f32 %v3652_v16, %v3242_v59  ;;  %v3654_v12 = vpop.f32.mrf.mxu1  ;;  %v375_v63 = vunpack.c.l.bf16 %v5212_v5  ;;  %v376_v3 = vunpack.c.h.bf16 %v5212_v5 }
 0x389   : > { %v4070_v29 = vadd.f32 %v4006_v19, %v372_v26  ;;  %v4007_v40 = vmax.f32 %v3879_v21, %v3943_v62  ;;  %v3944_v61 = vmul.f32 0.01, %v3880_v20  ;;  %v3806_v39 = vadd.f32 %v3654_v12, %v3243_v2 }
 0x38a   : > { %v3881_v1 = vadd.f32 %v7308_v55, %v3805_v6  ;;  %v3656_v49 = vpop.f32.mrf.mxu1  ;;  %v3246_v26 = vadd.f32 %v7093_v10, %v7059_v8  ;;  %v3247_v8 = vadd.f32 %v7105_v30, %v7067_v25  ;;  %v5213_v6 = vld [vmem:[%s5583_s6 + $0x18] sm:$0xff] }
 0x38b   : > { %v4772_v54 = vpack.c.bf16 %v4070_v29, %v4069_v51  ;;  %v4071_v59 = vadd.f32 %v4007_v40, %v373_v31  ;;  %v4008_v28 = vmax.f32 %v3880_v20, %v3944_v61  ;;  %v3882_v24 = vadd.f32 %v7317_v0, %v3806_v39 }
 0x38c   : > { %v3945_v21 = vmul.f32 0.01, %v3881_v1  ;;  %v3807_v32 = vadd.f32 %v3656_v49, %v3244_v56  ;;  %v3658_v2 = vpop.f32.mrf.mxu1  ;;  %v377_v12 = vunpack.c.l.bf16 %v5213_v6  ;;  %v378_v29 = vunpack.c.h.bf16 %v5213_v6  ;;  %v7362_v56 = vpop.f32.mrf.mxu0  ;;  %v8228_v49 = vld [vmem:[#allocation16_spill] sm:$0xff] }
 0x38d   : > { %4392 = vst [vmem:[%s7354_s27] sm:$0xff] %v4772_v54  ;;  %v4072_v36 = vadd.f32 %v4008_v28, %v374_v48  ;;  %v3946_v41 = vmul.f32 0.01, %v3882_v24  ;;  %v3808_v39 = vadd.f32 %v3658_v2, %v3245_v58  ;;  %v3248_v54 = vadd.f32 %v7113_v42, %v8228_v49 }
 0x38e   : > { %v4009_v10 = vmax.f32 %v3881_v1, %v3945_v21  ;;  %v3883_v61 = vadd.f32 %v7308_v55, %v3807_v32  ;;  %v3662_v31 = vpop.f32.mrf.mxu1  ;;  %v3252_v6 = vadd.f32 %v7156_v13, %v7091_v47 }
 0x38f   : > { %v4773_v16 = vpack.c.bf16 %v4072_v36, %v4071_v59  ;;  %v4010_v51 = vmax.f32 %v3882_v24, %v3946_v41  ;;  %v3884_v19 = vadd.f32 %v7317_v0, %v3808_v39  ;;  %v3809_v62 = vadd.f32 %v3662_v31, %v3246_v26  ;;  %v8229_v59 = vld [vmem:[#allocation15_spill] sm:$0xff]  ;;  %v5214_v36 = vld [vmem:[%s5583_s6 + $0x20] sm:$0xff] }
 0x390   : > { %v4073_v20 = vadd.f32 %v4009_v10, %v375_v63  ;;  %v3947_v48 = vmul.f32 0.01, %v3883_v61  ;;  %v3664_v40 = vpop.f32.mrf.mxu1  ;;  %v3249_v28 = vadd.f32 %v7125_v38, %v8229_v59  ;;  %v380_v41 = vunpack.c.h.bf16 %v5214_v36  ;;  %v7372_v10 = vpop.f32.mrf.mxu0 }
 0x391   : > { %4393 = vst [vmem:[%s7354_s27 + $0x8] sm:$0xff] %v4773_v16  ;;  %v4074_v25 = vadd.f32 %v4010_v51, %v376_v3  ;;  %v3948_v30 = vmul.f32 0.01, %v3884_v19  ;;  %v3885_v58 = vadd.f32 %v7308_v55, %v3809_v62  ;;  %v3810_v1 = vadd.f32 %v3664_v40, %v3247_v8  ;;  %v8230_v16 = vld [vmem:[#allocation25_spill] sm:$0xff]  ;;  %v5215_v40 = vld [vmem:[%s5583_s6 + $0x28] sm:$0xff] }
 0x392   : > { %v4011_v24 = vmax.f32 %v3883_v61, %v3947_v48  ;;  %v3666_v26 = vpop.f32.mrf.mxu1  ;;  %v379_v3 = vunpack.c.l.bf16 %v5214_v36  ;;  %v3250_v51 = vadd.f32 %v7133_v43, %v8230_v16  ;;  %v7384_v43 = vpop.f32.mrf.mxu0  ;;  %v5216_v36 = vld [vmem:[%s5583_s6 + $0x30] sm:$0xff]  ;;  %v8232_v16 = vld [vmem:[#allocation24_spill] sm:$0xff] }
 0x393   : > { %v4774_v5 = vpack.c.bf16 %v4074_v25, %v4073_v20  ;;  %v4012_v63 = vmax.f32 %v3884_v19, %v3948_v30  ;;  %v3949_v21 = vmul.f32 0.01, %v3885_v58  ;;  %v3886_v32 = vadd.f32 %v7317_v0, %v3810_v1 }
 0x394   : > { %v4075_v2 = vadd.f32 %v4011_v24, %v377_v12  ;;  %v3811_v39 = vadd.f32 %v3666_v26, %v3248_v54  ;;  %v3668_v8 = vpop.f32.mrf.mxu1  ;;  %v3251_v19 = vadd.f32 %v7147_v7, %v7088_v17  ;;  %v381_v25 = vunpack.c.l.bf16 %v5215_v40 }
 0x395   : > { %4394 = vst [vmem:[%s7354_s27 + $0x10] sm:$0xff] %v4774_v5  ;;  %v4076_v42 = vadd.f32 %v4012_v63, %v378_v29  ;;  %v4013_v31 = vmax.f32 %v3885_v58, %v3949_v21  ;;  %v3950_v38 = vmul.f32 0.01, %v3886_v32  ;;  %v3812_v61 = vadd.f32 %v3668_v8, %v3249_v28  ;;  %v8231_v28 = vld [vmem:[#allocation22_spill] sm:$0xff] }
 0x396   : > { %v3887_v62 = vadd.f32 %v7308_v55, %v3811_v39  ;;  %v3672_v20 = vpop.f32.mrf.mxu1  ;;  %v382_v58 = vunpack.c.h.bf16 %v5215_v40  ;;  %v3253_v47 = vadd.f32 %v7167_v53, %v8231_v28  ;;  %v383_v39 = vunpack.c.l.bf16 %v5216_v36 }
 0x397   : > { %v4775_v12 = vpack.c.bf16 %v4076_v42, %v4075_v2  ;;  %v4014_v48 = vmax.f32 %v3886_v32, %v3950_v38  ;;  %v3888_v29 = vadd.f32 %v7317_v0, %v3812_v61  ;;  %v3813_v1 = vadd.f32 %v3672_v20, %v3250_v51  ;;  %v7392_v42 = vpop.f32.mrf.mxu0 }
 0x398   : > { %v3951_v30 = vmul.f32 0.01, %v3887_v62  ;;  %v3674_v49 = vpop.f32.mrf.mxu1  ;;  %v4077_v17 = vadd.f32 %v4013_v31, %v379_v3  ;;  %v3254_v51 = vadd.f32 %v7175_v14, %v8232_v16 }
 0x399   : > { %4395 = vst [vmem:[%s7354_s27 + $0x18] sm:$0xff] %v4775_v12  ;;  %v4078_v7 = vadd.f32 %v4014_v48, %v380_v41  ;;  %v3952_v54 = vmul.f32 0.01, %v3888_v29  ;;  %v3814_v59 = vadd.f32 %v3674_v49, %v3251_v19  ;;  %v3889_v24 = vadd.f32 %v7308_v55, %v3813_v1 }
 0x39a   : > { %v4015_v13 = vmax.f32 %v3887_v62, %v3951_v30  ;;  %v3676_v26 = vpop.f32.mrf.mxu1  ;;  %v384_v41 = vunpack.c.h.bf16 %v5216_v36  ;;  %v3255_v19 = vadd.f32 %v7183_v33, %v7108_v15 }
 0x39b   : > { %v4776_v5 = vpack.c.bf16 %v4078_v7, %v4077_v17  ;;  %v4016_v63 = vmax.f32 %v3888_v29, %v3952_v54  ;;  %v3890_v21 = vadd.f32 %v7317_v0, %v3814_v59  ;;  %v3815_v32 = vadd.f32 %v3676_v26, %v3252_v6  ;;  %v7402_v17 = vpop.f32.mrf.mxu0  ;;  %v8233_v59 = vld [vmem:[#allocation21_spill] sm:$0xff] }
 0x39c   : > { %v4079_v2 = vadd.f32 %v4015_v13, %v381_v25  ;;  %v3953_v3 = vmul.f32 0.01, %v3889_v24  ;;  %v3678_v8 = vpop.f32.mrf.mxu1  ;;  %v5217_v25 = vld [vmem:[%s5583_s6 + $0x38] sm:$0xff]  ;;  %v3256_v54 = vadd.f32 %v7191_v46, %v7111_v11  ;;  %v3257_v28 = vadd.f32 %v7199_v18, %v8233_v59  ;;  %v5220_v59 = vld [vmem:[%s5583_s6 + $0x50] sm:$0xff] }
 0x39d   : > { %4396 = vst [vmem:[%s7354_s27 + $0x20] sm:$0xff] %v4776_v5  ;;  %v4080_v53 = vadd.f32 %v4016_v63, %v382_v58  ;;  %v3954_v31 = vmul.f32 0.01, %v3890_v21  ;;  %v3891_v38 = vadd.f32 %v7308_v55, %v3815_v32  ;;  %v3816_v61 = vadd.f32 %v3678_v8, %v3253_v47  ;;  %v7414_v11 = vpop.f32.mrf.mxu0 }
 0x39e   : > { %v4017_v62 = vmax.f32 %v3889_v24, %v3953_v3  ;;  %v3682_v20 = vpop.f32.mrf.mxu1  ;;  %v385_v30 = vunpack.c.l.bf16 %v5217_v25  ;;  %v386_v58 = vunpack.c.h.bf16 %v5217_v25  ;;  %v3258_v24 = vadd.f32 %v7207_v27, %v7122_v35 }
 0x39f   : > { %v4777_v6 = vpack.c.bf16 %v4080_v53, %v4079_v2  ;;  %v4018_v12 = vmax.f32 %v3890_v21, %v3954_v31  ;;  %v3955_v48 = vmul.f32 0.01, %v3891_v38  ;;  %v3892_v29 = vadd.f32 %v7317_v0, %v3816_v61  ;;  %v5218_v21 = vld [vmem:[%s5583_s6 + $0x40] sm:$0xff] }
 0x3a0   : > { %v4081_v40 = vadd.f32 %v4017_v62, %v383_v39  ;;  %v3817_v1 = vadd.f32 %v3682_v20, %v3254_v51  ;;  %v3684_v49 = vpop.f32.mrf.mxu1  ;;  %v387_v32 = vunpack.c.l.bf16 %v5218_v21  ;;  %v388_v36 = vunpack.c.h.bf16 %v5218_v21  ;;  %v5219_v62 = vld [vmem:[%s5583_s6 + $0x48] sm:$0xff] }
 0x3a1   : > { %4397 = vst [vmem:[%s7354_s27 + $0x28] sm:$0xff] %v4777_v6  ;;  %v4082_v14 = vadd.f32 %v4018_v12, %v384_v41  ;;  %v4019_v7 = vmax.f32 %v3891_v38, %v3955_v48  ;;  %v3956_v15 = vmul.f32 0.01, %v3892_v29  ;;  %v3818_v33 = vadd.f32 %v3684_v49, %v3255_v19 }
 0x3a2   : > { %v3893_v47 = vadd.f32 %v7308_v55, %v3817_v1  ;;  %v3686_v13 = vpop.f32.mrf.mxu1  ;;  %v3259_v35 = vadd.f32 %v7215_v45, %v7128_v44  ;;  %v389_v20 = vunpack.c.l.bf16 %v5219_v62  ;;  %v390_v12 = vunpack.c.h.bf16 %v5219_v62 }
 0x3a3   : > { %v4778_v26 = vpack.c.bf16 %v4082_v14, %v4081_v40  ;;  %v4020_v5 = vmax.f32 %v3892_v29, %v3956_v15  ;;  %v3894_v63 = vadd.f32 %v7317_v0, %v3818_v33  ;;  %v3819_v39 = vadd.f32 %v3686_v13, %v3256_v54  ;;  %v7422_v29 = vpop.f32.mrf.mxu0 }
 0x3a4   : > { %v3957_v2 = vmul.f32 0.01, %v3893_v47  ;;  %v3688_v3 = vpop.f32.mrf.mxu1  ;;  %v4083_v46 = vadd.f32 %v4019_v7, %v385_v30  ;;  %v3260_v30 = vadd.f32 %v7223_v23, %v7131_v22 }
 0x3a5   : > { %4398 = vst [vmem:[%s7354_s27 + $0x30] sm:$0xff] %v4778_v26  ;;  %v4084_v18 = vadd.f32 %v4020_v5, %v386_v58  ;;  %v3958_v41 = vmul.f32 0.01, %v3894_v63  ;;  %v3820_v8 = vadd.f32 %v3688_v3, %v3257_v28  ;;  %v3895_v53 = vadd.f32 %v7308_v55, %v3819_v39  ;;  %v7432_v26 = vpop.f32.mrf.mxu0 }
 0x3a6   : > { %v4021_v27 = vmax.f32 %v3893_v47, %v3957_v2  ;;  %v3692_v31 = vpop.f32.mrf.mxu1  ;;  %v3261_v58 = vadd.f32 %v7231_v57, %v7136_v37  ;;  %v391_v28 = vunpack.c.l.bf16 %v5220_v59  ;;  %v392_v47 = vunpack.c.h.bf16 %v5220_v59  ;;  %v8234_v2 = vld [vmem:[#allocation31_spill] sm:$0xff] }
 0x3a7   : > { %v4779_v38 = vpack.c.bf16 %v4084_v18, %v4083_v46  ;;  %v4022_v61 = vmax.f32 %v3894_v63, %v3958_v41  ;;  %v3896_v16 = vadd.f32 %v7317_v0, %v3820_v8  ;;  %v3821_v51 = vadd.f32 %v3692_v31, %v3258_v24  ;;  %v5221_v41 = vld [vmem:[%s5583_s6 + $0x58] sm:$0xff]  ;;  %v8239_v59 = vld [vmem:[#allocation71_spill] sm:$0xff] }
 0x3a8   : > { %v4085_v19 = vadd.f32 %v4021_v27, %v387_v32  ;;  %v3959_v6 = vmul.f32 0.01, %v3895_v53  ;;  %v3694_v48 = vpop.f32.mrf.mxu1  ;;  %v3262_v5 = vadd.f32 %v7239_v34, %v7142_v52  ;;  %v3263_v63 = vadd.f32 %v7247_v4, %v7150_v60  ;;  %v7444_v52 = vpop.f32.mrf.mxu0 }
 0x3a9   : > { %4399 = vst [vmem:[%s7354_s27 + $0x38] sm:$0xff] %v4779_v38  ;;  %v4086_v44 = vadd.f32 %v4022_v61, %v388_v36  ;;  %v3960_v45 = vmul.f32 0.01, %v3896_v16  ;;  %v3897_v40 = vadd.f32 %v7308_v55, %v3821_v51  ;;  %v3822_v25 = vadd.f32 %v3694_v48, %v3259_v35  ;;  %v8235_v36 = vld [vmem:[#allocation64_spill] sm:$0xff] }
 0x3aa   : > { %v4023_v1 = vmax.f32 %v3895_v53, %v3959_v6  ;;  %v3696_v49 = vpop.f32.mrf.mxu1  ;;  %v3264_v39 = vadd.f32 %v8235_v36, %v8234_v2  ;;  %v393_v8 = vunpack.c.l.bf16 %v5221_v41  ;;  %v394_v27 = vunpack.c.h.bf16 %v5221_v41  ;;  %v8236_v61 = vld [vmem:[#allocation28_spill] sm:$0xff] }
 0x3ab   : > { %v4780_v14 = vpack.c.bf16 %v4086_v44, %v4085_v19  ;;  %v4024_v7 = vmax.f32 %v3896_v16, %v3960_v45  ;;  %v3961_v15 = vmul.f32 0.01, %v3897_v40  ;;  %v3898_v33 = vadd.f32 %v7317_v0, %v3822_v25  ;;  %v8237_v16 = vld [vmem:[#allocation79_spill] sm:$0xff] }
 0x3ac   : > { %v4087_v54 = vadd.f32 %v4023_v1, %v389_v20  ;;  %v3823_v13 = vadd.f32 %v3696_v49, %v3260_v30  ;;  %v3698_v24 = vpop.f32.mrf.mxu1  ;;  %v3265_v51 = vadd.f32 %v8237_v16, %v8236_v61  ;;  %v7452_v49 = vpop.f32.mrf.mxu0  ;;  %v8246_v16 = vld [vmem:[#allocation35_spill] sm:$0xff] }
 0x3ad   : > { %4400 = vst [vmem:[%s7354_s27 + $0x40] sm:$0xff] %v4780_v14  ;;  %v4088_v22 = vadd.f32 %v4024_v7, %v390_v12  ;;  %v4025_v23 = vmax.f32 %v3897_v40, %v3961_v15  ;;  %v3962_v37 = vmul.f32 0.01, %v3898_v33  ;;  %v3824_v57 = vadd.f32 %v3698_v24, %v3261_v58  ;;  %v5222_v40 = vld [vmem:[%s5583_s6 + $0x60] sm:$0xff] }
 0x3ae   : > { %v3899_v21 = vadd.f32 %v7308_v55, %v3823_v13  ;;  %v3702_v32 = vpop.f32.mrf.mxu1  ;;  %v395_v25 = vunpack.c.l.bf16 %v5222_v40  ;;  %v396_v58 = vunpack.c.h.bf16 %v5222_v40  ;;  %v8241_v13 = vld [vmem:[#allocation86_spill] sm:$0xff] }
 0x3af   : > { %v4781_v3 = vpack.c.bf16 %v4088_v22, %v4087_v54  ;;  %v4026_v46 = vmax.f32 %v3898_v33, %v3962_v37  ;;  %v3900_v18 = vadd.f32 %v7317_v0, %v3824_v57  ;;  %v3825_v53 = vadd.f32 %v3702_v32, %v3262_v5  ;;  %v8238_v54 = vld [vmem:[#allocation30_spill] sm:$0xff] }
 0x3b0   : > { %v3963_v35 = vmul.f32 0.01, %v3899_v21  ;;  %v3704_v31 = vpop.f32.mrf.mxu1  ;;  %v4089_v60 = vadd.f32 %v4025_v23, %v391_v28  ;;  %v3266_v28 = vadd.f32 %v8239_v59, %v8238_v54  ;;  %v5223_v32 = vld [vmem:[%s5583_s6 + $0x68] sm:$0xff] }
 0x3b1   : > { %4401 = vst [vmem:[%s7354_s27 + $0x48] sm:$0xff] %v4781_v3  ;;  %v4090_v34 = vadd.f32 %v4026_v46, %v392_v47  ;;  %v3964_v4 = vmul.f32 0.01, %v3900_v18  ;;  %v3826_v38 = vadd.f32 %v3704_v31, %v3263_v63  ;;  %v3901_v62 = vadd.f32 %v7308_v55, %v3825_v53  ;;  %v8240_v47 = vld [vmem:[#allocation27_spill] sm:$0xff]  ;;  %v7462_v46 = vpop.f32.mrf.mxu0  ;;  %v8243_v53 = vld [vmem:[#allocation94_spill] sm:$0xff] }
 0x3b2   : > { %v4027_v19 = vmax.f32 %v3899_v21, %v3963_v35  ;;  %v3706_v20 = vpop.f32.mrf.mxu1  ;;  %v3267_v24 = vadd.f32 %v8241_v13, %v8240_v47  ;;  %v397_v2 = vunpack.c.l.bf16 %v5223_v32  ;;  %v398_v36 = vunpack.c.h.bf16 %v5223_v32 }
 0x3b3   : > { %v4782_v6 = vpack.c.bf16 %v4090_v34, %v4089_v60  ;;  %v4028_v12 = vmax.f32 %v3900_v18, %v3964_v4  ;;  %v3902_v48 = vadd.f32 %v7317_v0, %v3826_v38  ;;  %v3827_v44 = vadd.f32 %v3706_v20, %v3264_v39  ;;  %v8244_v60 = vld [vmem:[#allocation34_spill] sm:$0xff]  ;;  %v8245_v34 = vld [vmem:[#allocation109_spill] sm:$0xff] }
 0x3b4   : > { %v4091_v45 = vadd.f32 %v4027_v19, %v393_v8  ;;  %v3965_v30 = vmul.f32 0.01, %v3901_v62  ;;  %v3708_v1 = vpop.f32.mrf.mxu1  ;;  %v3269_v4 = vadd.f32 %v8245_v34, %v8244_v60 }
 0x3b5   : > { %4402 = vst [vmem:[%s7354_s27 + $0x50] sm:$0xff] %v4782_v6  ;;  %v4092_v14 = vadd.f32 %v4028_v12, %v394_v27  ;;  %v3966_v7 = vmul.f32 0.01, %v3902_v48  ;;  %v3903_v15 = vadd.f32 %v7308_v55, %v3827_v44  ;;  %v3828_v33 = vadd.f32 %v3708_v1, %v3265_v51  ;;  %v8242_v27 = vld [vmem:[#allocation36_spill] sm:$0xff]  ;;  %v8247_v51 = vld [vmem:[#allocation103_spill] sm:$0xff] }
 0x3b6   : > { %v4029_v22 = vmax.f32 %v3901_v62, %v3965_v30  ;;  %v3712_v23 = vpop.f32.mrf.mxu1  ;;  %v3268_v31 = vadd.f32 %v8243_v53, %v8242_v27  ;;  %v3270_v19 = vadd.f32 %v8247_v51, %v8246_v16  ;;  %v5224_v12 = vld [vmem:[%s5583_s6 + $0x70] sm:$0xff]  ;;  %v7474_v30 = vpop.f32.mrf.mxu0  ;;  %v8252_v27 = vld [vmem:[#allocation40_spill] sm:$0xff]  ;;  %v5226_v51 = vld [vmem:[%s5583_s6 + $0x80] sm:$0xff] }
 0x3b7   : > { %v4783_v37 = vpack.c.bf16 %v4092_v14, %v4091_v45  ;;  %v4030_v57 = vmax.f32 %v3902_v48, %v3966_v7  ;;  %v3967_v5 = vmul.f32 0.01, %v3903_v15  ;;  %v3904_v63 = vadd.f32 %v7317_v0, %v3828_v33  ;;  %v8249_v33 = vld [vmem:[#allocation112_spill] sm:$0xff] }
 0x3b8   : > { %v4093_v21 = vadd.f32 %v4029_v22, %v395_v25  ;;  %v3829_v39 = vadd.f32 %v3712_v23, %v3266_v28  ;;  %v3714_v3 = vpop.f32.mrf.mxu1  ;;  %v399_v48 = vunpack.c.l.bf16 %v5224_v12  ;;  %v400_v45 = vunpack.c.h.bf16 %v5224_v12 }
 0x3b9   : > { %4403 = vst [vmem:[%s7354_s27 + $0x58] sm:$0xff] %v4783_v37  ;;  %v4094_v18 = vadd.f32 %v4030_v57, %v396_v58  ;;  %v4031_v41 = vmax.f32 %v3903_v15, %v3967_v5  ;;  %v3968_v8 = vmul.f32 0.01, %v3904_v63  ;;  %v3830_v35 = vadd.f32 %v3714_v3, %v3267_v24  ;;  %v8248_v15 = vld [vmem:[#allocation33_spill] sm:$0xff]  ;;  %v5225_v57 = vld [vmem:[%s5583_s6 + $0x78] sm:$0xff] }
 0x3ba   : > { %v3905_v38 = vadd.f32 %v7308_v55, %v3829_v39  ;;  %v3716_v61 = vpop.f32.mrf.mxu1  ;;  %v3271_v54 = vadd.f32 %v8249_v33, %v8248_v15  ;;  %v401_v5 = vunpack.c.l.bf16 %v5225_v57  ;;  %v3273_v53 = vadd.f32 %v7339_v50, %v8252_v27  ;;  %v8255_v15 = vld [vmem:[#allocation49_spill] sm:$0xff]  ;;  %v5228_v27 = vld [vmem:[%s5583_s6 + $0x90] sm:$0xff] }
 0x3bb   : > { %v4784_v62 = vpack.c.bf16 %v4094_v18, %v4093_v21  ;;  %v4032_v20 = vmax.f32 %v3904_v63, %v3968_v8  ;;  %v3906_v6 = vadd.f32 %v7317_v0, %v3830_v35  ;;  %v3831_v40 = vadd.f32 %v3716_v61, %v3268_v31  ;;  %v8251_v8 = vld [vmem:[#allocation113_spill] sm:$0xff] }
 0x3bc   : > { %v3969_v44 = vmul.f32 0.01, %v3905_v38  ;;  %v3718_v25 = vpop.f32.mrf.mxu1  ;;  %v4095_v58 = vadd.f32 %v4031_v41, %v397_v2  ;;  %v402_v21 = vunpack.c.h.bf16 %v5225_v57  ;;  %v7482_v2 = vpop.f32.mrf.mxu0  ;;  %v8250_v41 = vld [vmem:[#allocation42_spill] sm:$0xff]  ;;  %v3276_v33 = vadd.f32 %v7372_v10, %v8255_v15 }
 0x3bd   : > { %4404 = vst [vmem:[%s7354_s27 + $0x60] sm:$0xff] %v4784_v62  ;;  %v4096_v1 = vadd.f32 %v4032_v20, %v398_v36  ;;  %v3970_v14 = vmul.f32 0.01, %v3906_v6  ;;  %v3832_v7 = vadd.f32 %v3718_v25, %v3269_v4  ;;  %v3907_v28 = vadd.f32 %v7308_v55, %v3831_v40  ;;  %v8253_v40 = vld [vmem:[#allocation41_spill] sm:$0xff] }
 0x3be   : > { %v4033_v59 = vmax.f32 %v3905_v38, %v3969_v44  ;;  %v3722_v47 = vpop.f32.mrf.mxu1  ;;  %v3272_v35 = vadd.f32 %v8251_v8, %v8250_v41  ;;  %v404_v62 = vunpack.c.h.bf16 %v5226_v51  ;;  %v7492_v12 = vpop.f32.mrf.mxu0  ;;  %v3274_v25 = vadd.f32 %v7350_v9, %v8253_v40 }
 0x3bf   : > { %v4785_v13 = vpack.c.bf16 %v4096_v1, %v4095_v58  ;;  %v4034_v24 = vmax.f32 %v3906_v6, %v3970_v14  ;;  %v3908_v22 = vadd.f32 %v7317_v0, %v3832_v7  ;;  %v3833_v23 = vadd.f32 %v3722_v47, %v3270_v19  ;;  %v8254_v58 = vld [vmem:[#allocation39_spill] sm:$0xff]  ;;  %v5227_v47 = vld [vmem:[%s5583_s6 + $0x88] sm:$0xff] }
 0x3c0   : > { %v4097_v37 = vadd.f32 %v4033_v59, %v399_v48  ;;  %v3971_v63 = vmul.f32 0.01, %v3907_v28  ;;  %v3724_v32 = vpop.f32.mrf.mxu1  ;;  %v403_v19 = vunpack.c.l.bf16 %v5226_v51  ;;  %v3275_v1 = vadd.f32 %v7362_v56, %v8254_v58  ;;  %v7504_v9 = vpop.f32.mrf.mxu0  ;;  %v8257_v51 = vld [vmem:[#allocation48_spill] sm:$0xff] }
 0x3c1   : > { %4405 = vst [vmem:[%s7354_s27 + $0x68] sm:$0xff] %v4785_v13  ;;  %v4098_v36 = vadd.f32 %v4034_v24, %v400_v45  ;;  %v3972_v39 = vmul.f32 0.01, %v3908_v22  ;;  %v3909_v3 = vadd.f32 %v7308_v55, %v3833_v23  ;;  %v3834_v18 = vadd.f32 %v3724_v32, %v3271_v54  ;;  %v5229_v58 = vld [vmem:[%s5583_s6 + $0x98] sm:$0xff] }
 0x3c2   : > { %v4035_v31 = vmax.f32 %v3907_v28, %v3971_v63  ;;  %v3726_v60 = vpop.f32.mrf.mxu1  ;;  %v405_v13 = vunpack.c.l.bf16 %v5227_v47 }
 0x3c3   : > { %v4786_v34 = vpack.c.bf16 %v4098_v36, %v4097_v37  ;;  %v4036_v4 = vmax.f32 %v3908_v22, %v3972_v39  ;;  %v3973_v38 = vmul.f32 0.01, %v3909_v3  ;;  %v3910_v61 = vadd.f32 %v7317_v0, %v3834_v18 }
 0x3c4   : > { %v4099_v16 = vadd.f32 %v4035_v31, %v401_v5  ;;  %v3835_v20 = vadd.f32 %v3726_v60, %v3272_v35  ;;  %v3728_v6 = vpop.f32.mrf.mxu1  ;;  %v406_v22 = vunpack.c.h.bf16 %v5227_v47  ;;  %v408_v60 = vunpack.c.h.bf16 %v5228_v27 }
 0x3c5   : > { %4406 = vst [vmem:[%s7354_s27 + $0x70] sm:$0xff] %v4786_v34  ;;  %v4100_v48 = vadd.f32 %v4036_v4, %v402_v21  ;;  %v4037_v44 = vmax.f32 %v3909_v3, %v3973_v38  ;;  %v3974_v50 = vmul.f32 0.01, %v3910_v61  ;;  %v3836_v45 = vadd.f32 %v3728_v6, %v3273_v53  ;;  %v8256_v21 = vld [vmem:[#allocation46_spill] sm:$0xff]  ;;  %v7512_v4 = vpop.f32.mrf.mxu0 }
 0x3c6   : > { %v3911_v14 = vadd.f32 %v7308_v55, %v3835_v20  ;;  %v3732_v7 = vpop.f32.mrf.mxu1  ;;  %v3277_v10 = vadd.f32 %v7384_v43, %v8256_v21  ;;  %v407_v53 = vunpack.c.l.bf16 %v5228_v27  ;;  %v5230_v21 = vld [vmem:[%s5583_s6 + $0xa0] sm:$0xff] }
 0x3c7   : > { %v4787_v54 = vpack.c.bf16 %v4100_v48, %v4099_v16  ;;  %v4038_v59 = vmax.f32 %v3910_v61, %v3974_v50  ;;  %v3912_v28 = vadd.f32 %v7317_v0, %v3836_v45  ;;  %v3837_v23 = vadd.f32 %v3732_v7, %v3274_v25 }
 0x3c8   : > { %v3975_v24 = vmul.f32 0.01, %v3911_v14  ;;  %v3734_v37 = vpop.f32.mrf.mxu1  ;;  %v4101_v56 = vadd.f32 %v4037_v44, %v403_v19  ;;  %v3278_v19 = vadd.f32 %v7392_v42, %v8257_v51 }
 0x3c9   : > { %4407 = vst [vmem:[%s7354_s27 + $0x78] sm:$0xff] %v4787_v54  ;;  %v4102_v57 = vadd.f32 %v4038_v59, %v404_v62  ;;  %v3976_v5 = vmul.f32 0.01, %v3912_v28  ;;  %v3838_v63 = vadd.f32 %v3734_v37, %v3275_v1  ;;  %v3913_v36 = vadd.f32 %v7308_v55, %v3837_v23  ;;  %v8258_v62 = vld [vmem:[#allocation45_spill] sm:$0xff]  ;;  %v8261_v37 = vld [vmem:[#allocation54_spill] sm:$0xff] }
 0x3ca   : > { %v4039_v32 = vmax.f32 %v3911_v14, %v3975_v24  ;;  %v3736_v39 = vpop.f32.mrf.mxu1  ;;  %v3279_v20 = vadd.f32 %v7402_v17, %v8258_v62  ;;  %v409_v1 = vunpack.c.l.bf16 %v5229_v58  ;;  %v410_v14 = vunpack.c.h.bf16 %v5229_v58 }
 0x3cb   : > { %v4788_v3 = vpack.c.bf16 %v4102_v57, %v4101_v56  ;;  %v4040_v18 = vmax.f32 %v3912_v28, %v3976_v5  ;;  %v3914_v41 = vadd.f32 %v7317_v0, %v3838_v63  ;;  %v3839_v8 = vadd.f32 %v3736_v39, %v3276_v33  ;;  %v7522_v33 = vpop.f32.mrf.mxu0  ;;  %v8259_v28 = vld [vmem:[#allocation55_spill] sm:$0xff] }
 0x3cc   : > { %v4103_v35 = vadd.f32 %v4039_v32, %v405_v13  ;;  %v3977_v31 = vmul.f32 0.01, %v3913_v36  ;;  %v3738_v34 = vpop.f32.mrf.mxu1  ;;  %v3280_v47 = vadd.f32 %v7414_v11, %v8259_v28  ;;  %v8260_v13 = vld [vmem:[#allocation52_spill] sm:$0xff]  ;;  %v3282_v56 = vadd.f32 %v7432_v26, %v8261_v37 }
 0x3cd   : > { %4408 = vst [vmem:[%s7354_s27 + $0x80] sm:$0xff] %v4788_v3  ;;  %v4104_v43 = vadd.f32 %v4040_v18, %v406_v22  ;;  %v3978_v38 = vmul.f32 0.01, %v3914_v41  ;;  %v3915_v61 = vadd.f32 %v7308_v55, %v3839_v8  ;;  %v3840_v16 = vadd.f32 %v3738_v34, %v3277_v10  ;;  %v7534_v11 = vpop.f32.mrf.mxu0 }
 0x3ce   : > { %v4041_v6 = vmax.f32 %v3913_v36, %v3977_v31  ;;  %v3742_v48 = vpop.f32.mrf.mxu1  ;;  %v3281_v24 = vadd.f32 %v7422_v29, %v8260_v13  ;;  %v411_v10 = vunpack.c.l.bf16 %v5230_v21  ;;  %v412_v36 = vunpack.c.h.bf16 %v5230_v21 }
 0x3cf   : > { %v4789_v44 = vpack.c.bf16 %v4104_v43, %v4103_v35  ;;  %v4042_v50 = vmax.f32 %v3914_v41, %v3978_v38  ;;  %v3979_v45 = vmul.f32 0.01, %v3915_v61  ;;  %v3916_v40 = vadd.f32 %v7317_v0, %v3840_v16  ;;  %v8262_v35 = vld [vmem:[#allocation51_spill] sm:$0xff]  ;;  %v5231_v16 = vld [vmem:[%s5583_s6 + $0xa8] sm:$0xff] }
 0x3d0   : > { %v4105_v25 = vadd.f32 %v4041_v6, %v407_v53  ;;  %v3841_v7 = vadd.f32 %v3742_v48, %v3278_v19  ;;  %v3744_v15 = vpop.f32.mrf.mxu1  ;;  %v3283_v26 = vadd.f32 %v7444_v52, %v8262_v35  ;;  %v413_v51 = vunpack.c.l.bf16 %v5231_v16  ;;  %v7542_v6 = vpop.f32.mrf.mxu0 }
 0x3d1   : > { %4409 = vst [vmem:[%s7354_s27 + $0x88] sm:$0xff] %v4789_v44  ;;  %v4106_v42 = vadd.f32 %v4042_v50, %v408_v60  ;;  %v4043_v54 = vmax.f32 %v3915_v61, %v3979_v45  ;;  %v3980_v17 = vmul.f32 0.01, %v3916_v40  ;;  %v3842_v59 = vadd.f32 %v3744_v15, %v3279_v20  ;;  %v8263_v45 = vld [vmem:[#allocation60_spill] sm:$0xff] }
 0x3d2   : > { %v3917_v22 = vadd.f32 %v7308_v55, %v3841_v7  ;;  %v3746_v23 = vpop.f32.mrf.mxu1  ;;  %v414_v62 = vunpack.c.h.bf16 %v5231_v16 }
 0x3d3   : > { %v4790_v57 = vpack.c.bf16 %v4106_v42, %v4105_v25  ;;  %v4044_v5 = vmax.f32 %v3916_v40, %v3980_v17  ;;  %v3918_v63 = vadd.f32 %v7317_v0, %v3842_v59  ;;  %v3843_v39 = vadd.f32 %v3746_v23, %v3280_v47  ;;  %v8264_v25 = vld [vmem:[#allocation58_spill] sm:$0xff]  ;;  %v5232_v59 = vld [vmem:[%s5583_s6 + $0xb0] sm:$0xff] }
 0x3d4   : > { %v3981_v32 = vmul.f32 0.01, %v3917_v22  ;;  %v3748_v3 = vpop.f32.mrf.mxu1  ;;  %v4107_v29 = vadd.f32 %v4043_v54, %v409_v1  ;;  %v3284_v40 = vadd.f32 %v7452_v49, %v8263_v45  ;;  %v3285_v58 = vadd.f32 %v7462_v46, %v8264_v25 }
 0x3d5   : > { %4410 = vst [vmem:[%s7354_s27 + $0x90] sm:$0xff] %v4790_v57  ;;  %v4108_v18 = vadd.f32 %v4044_v5, %v410_v14  ;;  %v3982_v41 = vmul.f32 0.01, %v3918_v63  ;;  %v3844_v8 = vadd.f32 %v3748_v3, %v3281_v24  ;;  %v3919_v53 = vadd.f32 %v7308_v55, %v3843_v39  ;;  %v8266_v5 = vld [vmem:[#allocation57_spill] sm:$0xff] }
 0x3d6   : > { %v4045_v27 = vmax.f32 %v3917_v22, %v3981_v32  ;;  %v3752_v31 = vpop.f32.mrf.mxu1  ;;  %v415_v28 = vunpack.c.l.bf16 %v5232_v59  ;;  %v416_v47 = vunpack.c.h.bf16 %v5232_v59  ;;  %v7552_v22 = vpop.f32.mrf.mxu0  ;;  %v8267_v32 = vld [vmem:[#allocation68_spill] sm:$0xff] }
 0x3d7   : > { %v4791_v60 = vpack.c.bf16 %v4108_v18, %v4107_v29  ;;  %v4046_v34 = vmax.f32 %v3918_v63, %v3982_v41  ;;  %v3920_v43 = vadd.f32 %v7317_v0, %v3844_v8  ;;  %v3845_v38 = vadd.f32 %v3752_v31, %v3282_v56  ;;  %v8265_v56 = vld [vmem:[#allocation59_spill] sm:$0xff]  ;;  %v5233_v18 = vld [vmem:[%s5583_s6 + $0xb8] sm:$0xff] }
 0x3d8   : > { %v4109_v61 = vadd.f32 %v4045_v27, %v411_v10  ;;  %v3983_v19 = vmul.f32 0.01, %v3919_v53  ;;  %v3754_v20 = vpop.f32.mrf.mxu1  ;;  %v3286_v57 = vadd.f32 %v7474_v30, %v8265_v56  ;;  %v3287_v63 = vadd.f32 %v7482_v2, %v8266_v5  ;;  %v7564_v30 = vpop.f32.mrf.mxu0 }
 0x3d9   : > { %4411 = vst [vmem:[%s7354_s27 + $0x98] sm:$0xff] %v4791_v60  ;;  %v4110_v52 = vadd.f32 %v4046_v34, %v412_v36  ;;  %v3984_v48 = vmul.f32 0.01, %v3920_v43  ;;  %v3921_v44 = vadd.f32 %v7308_v55, %v3845_v38  ;;  %v3846_v50 = vadd.f32 %v3754_v20, %v3283_v26  ;;  %v8268_v34 = vld [vmem:[#allocation65_spill] sm:$0xff] }
 0x3da   : > { %v4047_v1 = vmax.f32 %v3919_v53, %v3983_v19  ;;  %v3756_v14 = vpop.f32.mrf.mxu1  ;;  %v3288_v36 = vadd.f32 %v7492_v12, %v8267_v32  ;;  %v417_v41 = vunpack.c.l.bf16 %v5233_v18  ;;  %v418_v35 = vunpack.c.h.bf16 %v5233_v18  ;;  %v8272_v32 = vld [vmem:[#allocation89_spill] sm:$0xff] }
 0x3db   : > { %v4792_v7 = vpack.c.bf16 %v4110_v52, %v4109_v61  ;;  %v4048_v15 = vmax.f32 %v3920_v43, %v3984_v48  ;;  %v3985_v42 = vmul.f32 0.01, %v3921_v44  ;;  %v3922_v54 = vadd.f32 %v7317_v0, %v3846_v50  ;;  %v5234_v52 = vld [vmem:[%s5583_s6 + $0xc0] sm:$0xff] }
 0x3dc   : > { %v4111_v17 = vadd.f32 %v4047_v1, %v413_v51  ;;  %v3847_v13 = vadd.f32 %v3756_v14, %v3284_v40  ;;  %v3758_v24 = vpop.f32.mrf.mxu1  ;;  %v3289_v12 = vadd.f32 %v7504_v9, %v8268_v34  ;;  %v419_v48 = vunpack.c.l.bf16 %v5234_v52  ;;  %v7572_v40 = vpop.f32.mrf.mxu0  ;;  %v8269_v14 = vld [vmem:[#allocation63_spill] sm:$0xff] }
 0x3dd   : > { %4412 = vst [vmem:[%s7354_s27 + $0xa0] sm:$0xff] %v4792_v7  ;;  %v4112_v49 = vadd.f32 %v4048_v15, %v414_v62  ;;  %v4049_v23 = vmax.f32 %v3921_v44, %v3985_v42  ;;  %v3986_v46 = vmul.f32 0.01, %v3922_v54  ;;  %v3848_v37 = vadd.f32 %v3758_v24, %v3285_v58  ;;  %v8270_v15 = vld [vmem:[#allocation74_spill] sm:$0xff] }
 0x3de   : > { %v3923_v21 = vadd.f32 %v7308_v55, %v3847_v13  ;;  %v3762_v10 = vpop.f32.mrf.mxu1  ;;  %v420_v50 = vunpack.c.h.bf16 %v5234_v52  ;;  %v3290_v7 = vadd.f32 %v7512_v4, %v8269_v14  ;;  %v3291_v42 = vadd.f32 %v7522_v33, %v8270_v15  ;;  %v8275_v15 = vld [vmem:[#allocation97_spill] sm:$0xff] }
 0x3df   : > { %v4793_v39 = vpack.c.bf16 %v4112_v49, %v4111_v17  ;;  %v4050_v3 = vmax.f32 %v3922_v54, %v3986_v46  ;;  %v3924_v29 = vadd.f32 %v7317_v0, %v3848_v37  ;;  %v3849_v26 = vadd.f32 %v3762_v10, %v3286_v57  ;;  %v5235_v49 = vld [vmem:[%s5583_s6 + $0xc8] sm:$0xff]  ;;  %v3225_v57 = vpop.f32.mrf.mxu0 }
 0x3e0   : > { %v3987_v8 = vmul.f32 0.01, %v3923_v21  ;;  %v3764_v27 = vpop.f32.mrf.mxu1  ;;  %v4113_v2 = vadd.f32 %v4049_v23, %v415_v28  ;;  %v421_v23 = vunpack.c.l.bf16 %v5235_v49  ;;  %v422_v46 = vunpack.c.h.bf16 %v5235_v49 }
 0x3e1   : > { %4413 = vst [vmem:[%s7354_s27 + $0xa8] sm:$0xff] %v4793_v39  ;;  %v4114_v53 = vadd.f32 %v4050_v3, %v416_v47  ;;  %v3988_v31 = vmul.f32 0.01, %v3924_v29  ;;  %v3850_v60 = vadd.f32 %v3764_v27, %v3287_v63  ;;  %v3925_v38 = vadd.f32 %v7308_v55, %v3849_v26  ;;  %v5236_v26 = vld [vmem:[%s5583_s6 + $0xd0] sm:$0xff] }
 0x3e2   : > { %v4051_v43 = vmax.f32 %v3923_v21, %v3987_v8  ;;  %v3766_v61 = vpop.f32.mrf.mxu1  ;;  %v8271_v21 = vld [vmem:[#allocation76_spill] sm:$0xff]  ;;  %v423_v27 = vunpack.c.l.bf16 %v5236_v26 }
 0x3e3   : > { %v4794_v16 = vpack.c.bf16 %v4114_v53, %v4113_v2  ;;  %v4052_v51 = vmax.f32 %v3924_v29, %v3988_v31  ;;  %v3926_v19 = vadd.f32 %v7317_v0, %v3850_v60  ;;  %v3851_v62 = vadd.f32 %v3766_v61, %v3288_v36  ;;  %v8273_v29 = vld [vmem:[#allocation84_spill] sm:$0xff] }
 0x3e4   : > { %v4115_v20 = vadd.f32 %v4051_v43, %v417_v41  ;;  %v3989_v44 = vmul.f32 0.01, %v3925_v38  ;;  %v3768_v45 = vpop.f32.mrf.mxu1  ;;  %v3292_v10 = vadd.f32 %v7534_v11, %v8271_v21  ;;  %v3293_v36 = vadd.f32 %v7542_v6, %v8272_v32  ;;  %v3229_v11 = vpop.f32.mrf.mxu0 }
 0x3e5   : > { %4414 = vst [vmem:[%s7354_s27 + $0xb0] sm:$0xff] %v4794_v16  ;;  %v4116_v9 = vadd.f32 %v4052_v51, %v418_v35  ;;  %v3990_v25 = vmul.f32 0.01, %v3926_v19  ;;  %v3927_v58 = vadd.f32 %v7308_v55, %v3851_v62  ;;  %v3852_v1 = vadd.f32 %v3768_v45, %v3289_v12 }
 0x3e6   : > { %v4053_v54 = vmax.f32 %v3925_v38, %v3989_v44  ;;  %v3772_v17 = vpop.f32.mrf.mxu1  ;;  %v3294_v18 = vadd.f32 %v7552_v22, %v8273_v29  ;;  %v424_v53 = vunpack.c.h.bf16 %v5236_v26  ;;  %v8274_v38 = vld [vmem:[#allocation81_spill] sm:$0xff]  ;;  %v5237_v44 = vld [vmem:[%s5583_s6 + $0xd8] sm:$0xff] }
 0x3e7   : > { %v4795_v59 = vpack.c.bf16 %v4116_v9, %v4115_v20  ;;  %v4054_v28 = vmax.f32 %v3926_v19, %v3990_v25  ;;  %v3991_v47 = vmul.f32 0.01, %v3927_v58  ;;  %v3928_v13 = vadd.f32 %v7317_v0, %v3852_v1 }
 0x3e8   : > { %v4117_v24 = vadd.f32 %v4053_v54, %v419_v48  ;;  %v3853_v37 = vadd.f32 %v3772_v17, %v3290_v7  ;;  %v3774_v56 = vpop.f32.mrf.mxu1  ;;  %v3295_v22 = vadd.f32 %v7564_v30, %v8274_v38  ;;  %v426_v9 = vunpack.c.h.bf16 %v5237_v44  ;;  %v8276_v54 = vld [vmem:[#allocation95_spill] sm:$0xff] }
 0x3e9   : > { %4415 = vst [vmem:[%s7354_s27 + $0xb8] sm:$0xff] %v4795_v59  ;;  %v4118_v4 = vadd.f32 %v4054_v28, %v420_v50  ;;  %v4055_v5 = vmax.f32 %v3927_v58, %v3991_v47  ;;  %v3992_v63 = vmul.f32 0.01, %v3928_v13  ;;  %v3854_v33 = vadd.f32 %v3774_v56, %v3291_v42  ;;  %v3231_v58 = vpop.f32.mrf.mxu0 }
 0x3ea   : > { %v3929_v39 = vadd.f32 %v7308_v55, %v3853_v37  ;;  %v3776_v3 = vpop.f32.mrf.mxu1  ;;  %v425_v50 = vunpack.c.l.bf16 %v5237_v44  ;;  %v3296_v42 = vadd.f32 %v7572_v40, %v8275_v15  ;;  %v3297_v17 = vadd.f32 %v3225_v57, %v8276_v54 }
 0x3eb   : > { %v4796_v41 = vpack.c.bf16 %v4118_v4, %v4117_v24  ;;  %v4056_v8 = vmax.f32 %v3928_v13, %v3992_v63  ;;  %v3930_v35 = vadd.f32 %v7317_v0, %v3854_v33  ;;  %v3855_v31 = vadd.f32 %v3776_v3, %v3292_v10  ;;  %v3233_v63 = vpop.f32.mrf.mxu0  ;;  %v8277_v10 = vld [vmem:[#allocation91_spill] sm:$0xff] }
 0x3ec   : > { %v3993_v2 = vmul.f32 0.01, %v3929_v39  ;;  %v3778_v60 = vpop.f32.mrf.mxu1  ;;  %v4119_v6 = vadd.f32 %v4055_v5, %v421_v23  ;;  %v3298_v32 = vadd.f32 %v3229_v11, %v8277_v10 }
 0x3ed   : > { %4416 = vst [vmem:[%s7354_s27 + $0xc0] sm:$0xff] %v4796_v41  ;;  %v4120_v34 = vadd.f32 %v4056_v8, %v422_v46  ;;  %v3994_v12 = vmul.f32 0.01, %v3930_v35  ;;  %v3856_v43 = vadd.f32 %v3778_v60, %v3293_v36  ;;  %v3931_v16 = vadd.f32 %v7308_v55, %v3855_v31  ;;  %v5238_v46 = vld [vmem:[%s5583_s6 + $0xe0] sm:$0xff]  ;;  %v8278_v36 = vld [vmem:[#allocation104_spill] sm:$0xff] }
 0x3ee   : > { %v4057_v61 = vmax.f32 %v3929_v39, %v3993_v2  ;;  %v3782_v51 = vpop.f32.mrf.mxu1  ;;  %v427_v37 = vunpack.c.l.bf16 %v5238_v46  ;;  %v428_v56 = vunpack.c.h.bf16 %v5238_v46  ;;  %v3299_v39 = vadd.f32 %v3231_v58, %v8278_v36 }
 0x3ef   : > { %v4797_v19 = vpack.c.bf16 %v4120_v34, %v4119_v6  ;;  %v4058_v62 = vmax.f32 %v3930_v35, %v3994_v12  ;;  %v3932_v20 = vadd.f32 %v7317_v0, %v3856_v43  ;;  %v3857_v52 = vadd.f32 %v3782_v51, %v3294_v18  ;;  %v8279_v18 = vld [vmem:[#allocation105_spill] sm:$0xff]  ;;  %v3235_v34 = vpop.f32.mrf.mxu0 }
 0x3f0   : > { %v4121_v48 = vadd.f32 %v4057_v61, %v423_v27  ;;  %v3995_v45 = vmul.f32 0.01, %v3931_v16  ;;  %v3784_v25 = vpop.f32.mrf.mxu1  ;;  %v3300_v41 = vadd.f32 %v3233_v63, %v8279_v18  ;;  %v5239_v27 = vld [vmem:[%s5583_s6 + $0xe8] sm:$0xff] }
 0x3f1   : > { %4417 = vst [vmem:[%s7354_s27 + $0xc8] sm:$0xff] %v4797_v19  ;;  %v4122_v1 = vadd.f32 %v4058_v62, %v424_v53  ;;  %v3996_v30 = vmul.f32 0.01, %v3932_v20  ;;  %v3933_v14 = vadd.f32 %v7308_v55, %v3857_v52  ;;  %v3858_v7 = vadd.f32 %v3784_v25, %v3295_v22  ;;  %v8280_v22 = vld [vmem:[#allocation115_spill] sm:$0xff] }
 0x3f2   : > { %v4059_v59 = vmax.f32 %v3931_v16, %v3995_v45  ;;  %v3786_v28 = vpop.f32.mrf.mxu1  ;;  %v429_v2 = vunpack.c.l.bf16 %v5239_v27  ;;  %v430_v31 = vunpack.c.h.bf16 %v5239_v27  ;;  %v3301_v61 = vadd.f32 %v3235_v34, %v8280_v22 }
 0x3f3   : > { %v4798_v47 = vpack.c.bf16 %v4122_v1, %v4121_v48  ;;  %v4060_v13 = vmax.f32 %v3932_v20, %v3996_v30  ;;  %v3997_v24 = vmul.f32 0.01, %v3933_v14  ;;  %v3934_v49 = vadd.f32 %v7317_v0, %v3858_v7 }
 0x3f4   : > { %v4123_v23 = vadd.f32 %v4059_v59, %v425_v50  ;;  %v3859_v4 = vadd.f32 %v3786_v28, %v3296_v42  ;;  %v3788_v5 = vpop.f32.mrf.mxu1  ;;  %v5240_v50 = vld [vmem:[%s5583_s6 + $0xf0] sm:$0xff]  ;;  %v5241_v28 = vld [vmem:[%s5583_s6 + $0xf8] sm:$0xff]  ;;  %s5326_s6 = sshll.u32 %s5417_s21, 4  ;;  %s5327_s6 = int_to_ptr.vmem [resolvable:$false] %s5326_s6 }
 0x3f5   : > { %4418 = vst [vmem:[%s7354_s27 + $0xd0] sm:$0xff] %v4798_v47  ;;  %v4124_v33 = vadd.f32 %v4060_v13, %v426_v9  ;;  %v4061_v40 = vmax.f32 %v3933_v14, %v3997_v24  ;;  %v3998_v21 = vmul.f32 0.01, %v3934_v49  ;;  %v3860_v57 = vadd.f32 %v3788_v5, %v3297_v17  ;;  %s5328_s26 = scalar_lea.vmem %s5327_s6, 8192  ;;  %p5329_p2 = scmp.lt.s32.totalorder %s7630_s9, %s5327_s6 }
 0x3f6   : > { %v3935_v3 = vadd.f32 %v7308_v55, %v3859_v4  ;;  %v3792_v29 = vpop.f32.mrf.mxu1  ;;  %v431_v45 = vunpack.c.l.bf16 %v5240_v50  ;;  %v432_v25 = vunpack.c.h.bf16 %v5240_v50  ;;  %v433_v47 = vunpack.c.l.bf16 %v5241_v28  ;;  %p5330_p12 = scmp.lt.s32.totalorder %s5328_s26, %s5322_s16 }
 0x3f7   : > { %v4799_v8 = vpack.c.bf16 %v4124_v33, %v4123_v23  ;;  %v4062_v35 = vmax.f32 %v3934_v49, %v3998_v21  ;;  %v3936_v26 = vadd.f32 %v7317_v0, %v3860_v57  ;;  %v3861_v60 = vadd.f32 %v3792_v29, %v3298_v32 }
 0x3f8   : > { %v3999_v53 = vmul.f32 0.01, %v3935_v3  ;;  %v3794_v6 = vpop.f32.mrf.mxu1  ;;  %v4125_v11 = vadd.f32 %v4061_v40, %v427_v37  ;;  %v434_v13 = vunpack.c.h.bf16 %v5241_v28  ;;  %p5331_p13 = por %p5330_p12, %p5329_p2 }
 0x3f9   : > { %4419 = vst [vmem:[%s7354_s27 + $0xd8] sm:$0xff] %v4799_v8  ;;  %v4126_v12 = vadd.f32 %v4062_v35, %v428_v56  ;;  %v4000_v43 = vmul.f32 0.01, %v3936_v26  ;;  %v3862_v38 = vadd.f32 %v3794_v6, %v3299_v39  ;;  %v3937_v51 = vadd.f32 %v7308_v55, %v3861_v60 }
 0x3fa   : > { %v4063_v16 = vmax.f32 %v3935_v3, %v3999_v53  ;;  %v3796_v19 = vpop.f32.mrf.mxu1  ;;  %p5332_p3 = pnand %p5331_p13, %p5325_p10 }
 0x3fb   : > { %v4800_v62 = vpack.c.bf16 %v4126_v12, %v4125_v11  ;;  %v4064_v20 = vmax.f32 %v3936_v26, %v4000_v43  ;;  %v3938_v52 = vadd.f32 %v7317_v0, %v3862_v38  ;;  %v3863_v48 = vadd.f32 %v3796_v19, %v3300_v41 }
 0x3fc   : > { %v4127_v44 = vadd.f32 %v4063_v16, %v429_v2  ;;  %v4001_v9 = vmul.f32 0.01, %v3937_v51  ;;  %v3798_v58 = vpop.f32.mrf.mxu1 }
 0x3fd   : > { %4420 = vst [vmem:[%s7354_s27 + $0xe0] sm:$0xff] %v4800_v62  ;;  %v4128_v1 = vadd.f32 %v4064_v20, %v430_v31  ;;  %v4002_v30 = vmul.f32 0.01, %v3938_v52  ;;  %v3939_v14 = vadd.f32 %v7308_v55, %v3863_v48  ;;  %v3864_v7 = vadd.f32 %v3798_v58, %v3301_v61 }
 0x3fe   : > { %v4065_v15 = vmax.f32 %v3937_v51, %v4001_v9 }
 0x3ff   : > { %v4801_v42 = vpack.c.bf16 %v4128_v1, %v4127_v44  ;;  %v4066_v54 = vmax.f32 %v3938_v52, %v4002_v30  ;;  %v4003_v17 = vmul.f32 0.01, %v3939_v14  ;;  %v3940_v59 = vadd.f32 %v7317_v0, %v3864_v7 }
 0x400   : > { %v4129_v24 = vadd.f32 %v4065_v15, %v431_v45 }
 0x401   : > { %4421 = vst [vmem:[%s7354_s27 + $0xe8] sm:$0xff] %v4801_v42  ;;  %v4130_v49 = vadd.f32 %v4066_v54, %v432_v25  ;;  %v4067_v23 = vmax.f32 %v3939_v14, %v4003_v17  ;;  %v4004_v55 = vmul.f32 0.01, %v3940_v59 }
 0x403   : > { %v4802_v46 = vpack.c.bf16 %v4130_v49, %v4129_v24  ;;  %v4068_v37 = vmax.f32 %v3940_v59, %v4004_v55  ;;  %v4131_v56 = vadd.f32 %v4067_v23, %v433_v47 }
 0x405   : > { %4422 = vst [vmem:[%s7354_s27 + $0xf0] sm:$0xff] %v4802_v46  ;;  %v4132_v4 = vadd.f32 %v4068_v37, %v434_v13 }
 0x407   : > { %v4803_v0 = vpack.c.bf16 %v4132_v4, %v4131_v56 }
 0x409   : > { %4423 = vst [vmem:[%s7354_s27 + $0xf8] sm:$0xff] %v4803_v0 }
 0x40a   : > { %5335 = shalt.err (!%p5332_p3)
}
 0x40b   : > { %s5336_s28 = scalar_lea.hbm %s7628_s15, 4096  ;;  %s5340_s24 = scalar_lea.hbm %s7683_s5, 16384 }
 0x40c   : > { %p5337_p0 = scmp.ne.s32.totalorder %s7628_s15, %s5336_s28  ;;  %p5341_p6 = scmp.lt.s32.totalorder %s7628_s15, %s7683_s5 }
 0x40d   : > { %p5342_p11 = scmp.lt.s32.totalorder %s5340_s24, %s5336_s28 }
 0x40e   : > { %p5338_p1 = pnand %p5337_p0, %p5547_p7 }
 0x40f   : > { %p5343_p5 = por %p5342_p11, %p5341_p6 }
 0x410   : > { %p5339_p4 = pneg %p5338_p1 }
 0x412   : > { %p5344_p8 = pnand %p5343_p5, %p5339_p4 }
 0x414   : > { %5347 = shalt.err (!%p5344_p8)
}
 0x415   : > { %s5418_s11 = smov 128   ;;  %s5419_s13 = smov 8  }
 0x416   : > { %4960 = dma.vmem_to_hbm [thread:$0]  (%p5547_p7), %s7630_s9, 4096, %s7628_s15, %s4425_s1, %s5418_s11, %s5418_s11, %s5419_s13  }
 0x417 PF: > { %p4982_p9 = scmp.ge.s32.totalorder %s5406_s23, 2  ;;  %s4454_s10 = sand.u32 1, %s5386_s18  }
 0x418   : > { %p8281_p10 = scmp.ne.s32.totalorder %s7812_s29, 0  ;;  %s4455_s16 = scalar_lea.sflag [#allocation5], %s4454_s10 }
 0x41a   : > { %p4974_p2 = pnand %p4982_p9, %p8281_p10 }
 0x41c   : > { %p4975_p12 = pneg %p4974_p2 }
 0x41e   : > { %5381 = dma.done.wait (%p4975_p12), %s4455_s16, 4096  }
 0x41f   : > { %5383 = vsyncadd (%p4975_p12), %s4455_s16, 4294963200  ;;  %s22_s23 = sadd.s32 1, %s5406_s23   ;;  %s8282_s18 = smov %s5390_s19 }
 0x420   : > { %p19_p13 = scmp.ge.s32.totalorder %s22_s23, 6   ;;  %s8283_s19 = smov %s5394_s20 }
 0x421   : > { %s8284_s20 = smov %s5556_s14  ;;  %s8285_s21 = smov %s5402_s22 }
 0x422   : > { %s8286_s22 = smov %s8288_s7  ;;  %21 = sbr.rel (!%p19_p13) target bundleno = 9 (0x9), region = 113 }
 0x427   :  { %4460 = vsyncpa [#allocation4], 1 }
 0x428   :  { %4462 = vsyncpa [#allocation4 + $0x1], 1 }
 0x429   :  { %4463 = vsyncpa [#allocation7], 1 }
 0x42a   :  { %4464 = vsyncpa [#allocation5], 1 }
 0x42b   :  { %4466 = vsyncpa [#allocation5 + $0x1], 1 }

</bundles_post_ra>
